<compile_context>
chip_gen: v6e
topology: v6e:2x2x1
jax: 0.10.0
libtpu: 0.0.40
codegen_flags: <defaults>
</compile_context>

<pallas_src>
import functools
import math

import jax
import jax.numpy as jnp
from jax.experimental import pallas as pl
from jax.experimental.pallas import tpu as pltpu


def _round_up(x, m):
    return (x + m - 1) // m * m


def _mm_attn_kernel(img_j_ref, xcat_i_ref, wimg_ref, bimg_ref,
                    wcat_ref, bcat_ref, ws_ref, mask_ref,
                    comb_ref, attn_ref, *, tanh_dtype):
    j = pl.program_id(1)
    nj = pl.num_programs(1)
    tj = img_j_ref.shape[0]
    hp = wimg_ref.shape[1]

    # --- projections (MXU, f32 accumulation) --------------------------------
    # j-block image projection.
    pi_j = jnp.dot(img_j_ref[...], wimg_ref[...],
                   preferred_element_type=jnp.float32) + bimg_ref[...]      # (TJ, Hp)
    # i-block fused projection: one block-diagonal matmul gives [pi_i | pq_i].
    proj_i = jnp.dot(xcat_i_ref[...], wcat_ref[...],
                     preferred_element_type=jnp.float32) + bcat_ref[...]    # (TM, 2Hp)
    pi_i = proj_i[:, :hp]            # lane-aligned views (Hp is a multiple of 128)
    pq_i = proj_i[:, hp:]

    # --- additive-attention scores for this (i, j) tile ----------------------
    # t[m, n, h] = tanh(pq_i[m, h] + pi_j[n, h])
    t = jnp.tanh((pq_i[:, None, :] + pi_j[None, :, :]).astype(tanh_dtype))
    scores = jnp.sum(t.astype(jnp.float32) * ws_ref[...], axis=2)           # (TM, TJ)
    # mask row carries (+b_s) on valid columns and -1e30 on padded j columns
    scores = scores + mask_ref[...]

    # stash raw scores into the resident attention-output row block
    start = pl.multiple_of(j * tj, tj)
    attn_ref[:, pl.ds(start, tj)] = scores

    # --- finalize once the full row of scores is present ---------------------
    @pl.when(j == nj - 1)
    def _():
        sc = attn_ref[...]                                                  # (TM, Bjp)
        m = jnp.max(sc, axis=1, keepdims=True)
        e = jnp.exp(sc - m)
        attn_ref[...] = e / jnp.sum(e, axis=1, keepdims=True)
        # softmax over j sums to 1  =>  (w * pi.unsqueeze(1)).sum(1) == pi_i,
        # so the attention application collapses exactly to pi_i + pq_i.
        comb_ref[...] = pi_i + pq_i


def multimodal_attention(image_features, question_features, params, *,
                         tanh_dtype=jnp.float32):
    """Fused Pallas forward. Use tanh_dtype=jnp.bfloat16 on v6e/v7x; f32 on v5e."""
    f32 = jnp.float32
    image_features = image_features.astype(f32)
    question_features = question_features.astype(f32)

    B, Di = image_features.shape
    _, Dq = question_features.shape
    H = params["w_img"].shape[1]

    Hp = _round_up(H, 128)
    Dip = _round_up(Di, 128)
    Dqp = _round_up(Dq, 128)
    Dcp = Dip + Dqp

    TJ = 128                               # key-row tile (lane-dense attn slices)
    TM = min(128, _round_up(B, 8))         # query-row tile (sublane aligned)
    Bip = _round_up(B, TM)
    Bjp = _round_up(B, TJ)

    # ---- wrapper-side zero padding (lane-dense slabs; results unchanged) ----
    img_p = jnp.zeros((Bjp, Dip), f32).at[:B, :Di].set(image_features)
    xcat_p = (jnp.zeros((Bip, Dcp), f32)
              .at[:B, :Di].set(image_features)
              .at[:B, Dip:Dip + Dq].set(question_features))

    w_img_p = jnp.zeros((Dip, Hp), f32).at[:Di, :H].set(params["w_img"])
    b_img_p = jnp.zeros((1, Hp), f32).at[:, :H].set(params["b_img"])
    w_cat = (jnp.zeros((Dcp, 2 * Hp), f32)
             .at[:Di, :H].set(params["w_img"])
             .at[Dip:Dip + Dq, Hp:Hp + H].set(params["w_q"]))
    b_cat = (jnp.zeros((1, 2 * Hp), f32)
             .at[:, :H].set(params["b_img"])
             .at[:, Hp:Hp + H].set(params["b_q"]))
    ws_p = jnp.zeros((1, Hp), f32).at[:, :H].set(params["w_s"])

    # score bias + padded-column mask folded into one additive row
    b_s_val = params["b_s"].reshape(()).astype(f32)
    cols = jnp.arange(Bjp, dtype=jnp.int32)
    mask_row = jnp.where(cols < B, b_s_val, jnp.float32(-1e30))[None, :]    # (1, Bjp)

    grid = (Bip // TM, Bjp // TJ)

    # VMEM budget: dominated by the (TM, TJ, Hp) tanh intermediate.  Clamp into
    # a range safe on all generations (v7x physical VMEM is only 64 MiB).
    work_bytes = 4 * (2 * (TJ * Dip + TM * Dcp + TJ)
                      + Dip * Hp + 3 * Dcp * Hp
                      + 2 * (TM * Hp + TM * Bjp)
                      + 3 * TM * TJ * Hp)
    vmem_limit = int(min(max(work_bytes, 32 * 1024 * 1024), 64 * 1024 * 1024))

    kernel = functools.partial(_mm_attn_kernel, tanh_dtype=tanh_dtype)

    comb_p, attn_p = pl.pallas_call(
        kernel,
        out_shape=(jax.ShapeDtypeStruct((Bip, Hp), f32),
                   jax.ShapeDtypeStruct((Bip, Bjp), f32)),
        grid=grid,
        in_specs=[
            pl.BlockSpec((TJ, Dip), lambda i, j: (j, 0)),       # image rows (j stream)
            pl.BlockSpec((TM, Dcp), lambda i, j: (i, 0)),       # [img|qst] rows (i stream)
            pl.BlockSpec((Dip, Hp), lambda i, j: (0, 0)),       # W_img
            pl.BlockSpec((1, Hp), lambda i, j: (0, 0)),         # b_img
            pl.BlockSpec((Dcp, 2 * Hp), lambda i, j: (0, 0)),   # block-diag [W_img|W_q]
            pl.BlockSpec((1, 2 * Hp), lambda i, j: (0, 0)),     # [b_img|b_q]
            pl.BlockSpec((1, Hp), lambda i, j: (0, 0)),         # w_s
            pl.BlockSpec((1, TJ), lambda i, j: (0, j)),         # b_s + j-pad mask row
        ],
        out_specs=(
            pl.BlockSpec((TM, Hp), lambda i, j: (i, 0)),        # combined (resident over j)
            pl.BlockSpec((TM, Bjp), lambda i, j: (i, 0)),       # attention row block
        ),
        compiler_params=pltpu.CompilerParams(
            dimension_semantics=("parallel", "arbitrary"),
            vmem_limit_bytes=vmem_limit,
        ),
    )(img_p, xcat_p, w_img_p, b_img_p, w_cat, b_cat, ws_p, mask_row)

    combined = comb_p[:B, :H]
    attention_weights = attn_p[:B, :B, None]      # (B, B, 1), matches PyTorch
    return combined, attention_weights


def init_params(key, image_dim, question_dim, hidden_dim):
    """Deterministic PyTorch-Linear-style init: U(-1/sqrt(fan_in), 1/sqrt(fan_in))."""
    ks = jax.random.split(key, 6)

    def linear(kw, kb, fan_in, w_shape, b_shape):
        bound = 1.0 / math.sqrt(fan_in)
        w = jax.random.uniform(kw, w_shape, jnp.float32, -bound, bound)
        b = jax.random.uniform(kb, b_shape, jnp.float32, -bound, bound)
        return w, b

    w_img, b_img = linear(ks[0], ks[1], image_dim,
                          (image_dim, hidden_dim), (1, hidden_dim))
    w_q, b_q = linear(ks[2], ks[3], question_dim,
                      (question_dim, hidden_dim), (1, hidden_dim))
    # attention_scores: Linear(hidden_dim, 1); stored as (1, H) row + (1, 1) bias
    w_s, b_s = linear(ks[4], ks[5], hidden_dim, (1, hidden_dim), (1, 1))
    return dict(w_img=w_img, b_img=b_img, w_q=w_q, b_q=b_q, w_s=w_s, b_s=b_s)


if __name__ == "__main__":
    B, Di, Dq, H = 8, 32, 16, 32
    key = jax.random.PRNGKey(0)
    k_img, k_qst, k_par = jax.random.split(key, 3)

    image_features = jax.random.normal(k_img, (B, Di), jnp.float32)
    question_features = jax.random.normal(k_qst, (B, Dq), jnp.float32)
    params = init_params(k_par, Di, Dq, H)

    combined, attn = multimodal_attention(image_features, question_features, params)
    jax.block_until_ready((combined, attn))

    # Pure-JAX reference reproducing the exact PyTorch broadcasting.
    pi = image_features @ params["w_img"] + params["b_img"]                 # (B, H)
    pq = question_features @ params["w_q"] + params["b_q"]                  # (B, H)
    t = jnp.tanh(pi[None, :, :] + pq[:, None, :])                           # (B, B, H)
    scores = t @ params["w_s"].T + params["b_s"][0, 0]                      # (B, B, 1)
    ref_attn = jax.nn.softmax(scores, axis=1)                               # (B, B, 1)
    attended = (ref_attn * pi[:, None, :]).sum(axis=1)                      # (B, H)
    ref_combined = attended + pq

    assert combined.shape == (B, H) and attn.shape == (B, B, 1)
    assert jnp.allclose(combined, ref_combined, atol=1e-4), "combined mismatch"
    assert jnp.allclose(attn, ref_attn, atol=1e-4), "attention weights mismatch"
    print("KERNEL_OK")
</pallas_src>

<mosaic_0001>
module attributes {stable_mosaic.version = 11 : i64} {
  func.func @_mm_attn_kernel(%arg0: i32, %arg1: i32, %arg2: memref<128x128xf32, #tpu.memory_space<vmem>>, %arg3: memref<8x256xf32, #tpu.memory_space<vmem>>, %arg4: memref<128x128xf32, #tpu.memory_space<vmem>>, %arg5: memref<1x128xf32, #tpu.memory_space<vmem>>, %arg6: memref<256x256xf32, #tpu.memory_space<vmem>>, %arg7: memref<1x256xf32, #tpu.memory_space<vmem>>, %arg8: memref<1x128xf32, #tpu.memory_space<vmem>>, %arg9: memref<1x128xf32, #tpu.memory_space<vmem>>, %arg10: memref<8x128xf32, #tpu.memory_space<vmem>>, %arg11: memref<8x128xf32, #tpu.memory_space<vmem>>) attributes {dimension_semantics = [#tpu.dimension_semantics<parallel>, #tpu.dimension_semantics<arbitrary>], iteration_bounds = array<i64: 1, 1>, scalar_prefetch = 0 : i64, scratch_operands = 0 : i64, tpu.core_type = #tpu.core_type<tc>, window_params = [{transform_indices = @transform_0, window_bounds = array<i64: 128, 128>}, {transform_indices = @transform_1, window_bounds = array<i64: 8, 256>}, {pipeline_mode = #tpu.pipeline_mode<synchronous>, transform_indices = @transform_2, window_bounds = array<i64: 128, 128>}, {pipeline_mode = #tpu.pipeline_mode<synchronous>, transform_indices = @transform_3, window_bounds = array<i64: 1, 128>}, {pipeline_mode = #tpu.pipeline_mode<synchronous>, transform_indices = @transform_4, window_bounds = array<i64: 256, 256>}, {pipeline_mode = #tpu.pipeline_mode<synchronous>, transform_indices = @transform_5, window_bounds = array<i64: 1, 256>}, {pipeline_mode = #tpu.pipeline_mode<synchronous>, transform_indices = @transform_6, window_bounds = array<i64: 1, 128>}, {transform_indices = @transform_7, window_bounds = array<i64: 1, 128>}, {transform_indices = @transform_8, window_bounds = array<i64: 8, 128>}, {transform_indices = @transform_9, window_bounds = array<i64: 8, 128>}]} {
    %c0 = arith.constant 0 : index
    %c0_0 = arith.constant 0 : index
    %0 = vector.load %arg2[%c0, %c0_0] : memref<128x128xf32, #tpu.memory_space<vmem>>, vector<128x128xf32>
    %c0_1 = arith.constant 0 : index
    %c0_2 = arith.constant 0 : index
    %1 = vector.load %arg4[%c0_1, %c0_2] : memref<128x128xf32, #tpu.memory_space<vmem>>, vector<128x128xf32>
    %cst = arith.constant dense<0.000000e+00> : vector<128x128xf32>
    %2 = tpu.matmul %0, %1, %cst {dimension_numbers = #tpu.dot_dimension_numbers<[1], [0], [0], [1], [0, 0, 1, 1], [], []>} : vector<128x128xf32>, vector<128x128xf32>, vector<128x128xf32> -> vector<128x128xf32>
    %c0_3 = arith.constant 0 : index
    %c0_4 = arith.constant 0 : index
    %3 = vector.load %arg5[%c0_3, %c0_4] : memref<1x128xf32, #tpu.memory_space<vmem>>, vector<1x128xf32>
    %4 = vector.broadcast %3 : vector<1x128xf32> to vector<128x128xf32>
    %5 = arith.addf %2, %4 : vector<128x128xf32>
    %c0_5 = arith.constant 0 : index
    %c0_6 = arith.constant 0 : index
    %6 = vector.load %arg3[%c0_5, %c0_6] : memref<8x256xf32, #tpu.memory_space<vmem>>, vector<8x256xf32>
    %c0_7 = arith.constant 0 : index
    %c0_8 = arith.constant 0 : index
    %7 = vector.load %arg6[%c0_7, %c0_8] : memref<256x256xf32, #tpu.memory_space<vmem>>, vector<256x256xf32>
    %cst_9 = arith.constant dense<0.000000e+00> : vector<8x256xf32>
    %8 = tpu.matmul %6, %7, %cst_9 {dimension_numbers = #tpu.dot_dimension_numbers<[1], [0], [0], [1], [0, 0, 1, 1], [], []>} : vector<8x256xf32>, vector<256x256xf32>, vector<8x256xf32> -> vector<8x256xf32>
    %c0_10 = arith.constant 0 : index
    %c0_11 = arith.constant 0 : index
    %9 = vector.load %arg7[%c0_10, %c0_11] : memref<1x256xf32, #tpu.memory_space<vmem>>, vector<1x256xf32>
    %10 = vector.broadcast %9 : vector<1x256xf32> to vector<8x256xf32>
    %11 = arith.addf %8, %10 : vector<8x256xf32>
    %12 = vector.extract_strided_slice %11 {offsets = [0, 0], sizes = [8, 128], strides = [1, 1]} : vector<8x256xf32> to vector<8x128xf32>
    %13 = vector.extract_strided_slice %11 {offsets = [0, 128], sizes = [8, 128], strides = [1, 1]} : vector<8x256xf32> to vector<8x128xf32>
    %14 = vector.shape_cast %13 : vector<8x128xf32> to vector<8x1x128xf32>
    %15 = vector.shape_cast %5 : vector<128x128xf32> to vector<1x128x128xf32>
    %16 = vector.broadcast %14 : vector<8x1x128xf32> to vector<8x128x128xf32>
    %17 = vector.broadcast %15 : vector<1x128x128xf32> to vector<8x128x128xf32>
    %18 = arith.addf %16, %17 : vector<8x128x128xf32>
    %19 = math.tanh %18 : vector<8x128x128xf32>
    %c0_12 = arith.constant 0 : index
    %c0_13 = arith.constant 0 : index
    %20 = vector.load %arg8[%c0_12, %c0_13] : memref<1x128xf32, #tpu.memory_space<vmem>>, vector<1x128xf32>
    %21 = vector.shape_cast %20 : vector<1x128xf32> to vector<1x1x128xf32>
    %22 = vector.broadcast %21 : vector<1x1x128xf32> to vector<8x128x128xf32>
    %23 = arith.mulf %19, %22 : vector<8x128x128xf32>
    %cst_14 = arith.constant dense<0.000000e+00> : vector<8x128xf32>
    %24 = vector.multi_reduction <add>, %23, %cst_14 [2] : vector<8x128x128xf32> to vector<8x128xf32>
    %c0_15 = arith.constant 0 : index
    %c0_16 = arith.constant 0 : index
    %25 = vector.load %arg9[%c0_15, %c0_16] : memref<1x128xf32, #tpu.memory_space<vmem>>, vector<1x128xf32>
    %26 = vector.broadcast %25 : vector<1x128xf32> to vector<8x128xf32>
    %27 = arith.addf %24, %26 : vector<8x128xf32>
    %c128_i32 = arith.constant 128 : i32
    %28 = arith.muli %arg1, %c128_i32 : i32
    %29 = tpu.assume_multiple %28, 128 : i32
    %c0_17 = arith.constant 0 : index
    %30 = arith.index_cast %29 : i32 to index
    %31 = vector.load %arg11[%c0_17, %30] : memref<8x128xf32, #tpu.memory_space<vmem>>, vector<8x128xf32>
    tpu.vector_store %arg11[%c0_17, %30], %27 {strides = array<i32>} : memref<8x128xf32, #tpu.memory_space<vmem>>, vector<8x128xf32>,
    %c0_i32 = arith.constant 0 : i32
    %32 = arith.cmpi eq, %arg1, %c0_i32 : i32
    %33 = arith.extui %32 : i1 to i32
    %c0_i32_18 = arith.constant 0 : i32
    %34 = arith.cmpi ne, %33, %c0_i32_18 : i32
    scf.if %34 {
      %c0_19 = arith.constant 0 : index
      %c0_20 = arith.constant 0 : index
      %35 = vector.load %arg11[%c0_19, %c0_20] : memref<8x128xf32, #tpu.memory_space<vmem>>, vector<8x128xf32>
      %cst_21 = arith.constant dense<0xFF800000> : vector<8xf32>
      %36 = vector.multi_reduction <maximumf>, %35, %cst_21 [1] : vector<8x128xf32> to vector<8xf32>
      %37 = vector.shape_cast %36 : vector<8xf32> to vector<8x1xf32>
      %38 = vector.broadcast %37 : vector<8x1xf32> to vector<8x128xf32>
      %39 = arith.subf %35, %38 : vector<8x128xf32>
      %40 = math.exp %39 : vector<8x128xf32>
      %cst_22 = arith.constant dense<0.000000e+00> : vector<8xf32>
      %41 = vector.multi_reduction <add>, %40, %cst_22 [1] : vector<8x128xf32> to vector<8xf32>
      %42 = vector.shape_cast %41 : vector<8xf32> to vector<8x1xf32>
      %43 = vector.broadcast %42 : vector<8x1xf32> to vector<8x128xf32>
      %44 = arith.divf %40, %43 : vector<8x128xf32>
      %c0_23 = arith.constant 0 : index
      %c0_24 = arith.constant 0 : index
      %45 = vector.load %arg11[%c0_23, %c0_24] : memref<8x128xf32, #tpu.memory_space<vmem>>, vector<8x128xf32>
      tpu.vector_store %arg11[%c0_23, %c0_24], %44 {strides = array<i32>} : memref<8x128xf32, #tpu.memory_space<vmem>>, vector<8x128xf32>,
      %46 = arith.addf %12, %13 : vector<8x128xf32>
      %c0_25 = arith.constant 0 : index
      %c0_26 = arith.constant 0 : index
      %47 = vector.load %arg10[%c0_25, %c0_26] : memref<8x128xf32, #tpu.memory_space<vmem>>, vector<8x128xf32>
      tpu.vector_store %arg10[%c0_25, %c0_26], %46 {strides = array<i32>} : memref<8x128xf32, #tpu.memory_space<vmem>>, vector<8x128xf32>,
    } else {
    }
    return
  }
  func.func @transform_0(%arg0: i32, %arg1: i32) -> (i32, i32) {
    %c0_i32 = arith.constant 0 : i32
    %c0_i32_0 = arith.constant 0 : i32
    return %arg1, %c0_i32 : i32, i32
  }
  func.func @transform_1(%arg0: i32, %arg1: i32) -> (i32, i32) {
    %c0_i32 = arith.constant 0 : i32
    %c0_i32_0 = arith.constant 0 : i32
    return %arg0, %c0_i32 : i32, i32
  }
  func.func @transform_2(%arg0: i32, %arg1: i32) -> (i32, i32) {
    %c0_i32 = arith.constant 0 : i32
    %c0_i32_0 = arith.constant 0 : i32
    %c0_i32_1 = arith.constant 0 : i32
    return %c0_i32, %c0_i32_0 : i32, i32
  }
  func.func @transform_3(%arg0: i32, %arg1: i32) -> (i32, i32) {
    %c0_i32 = arith.constant 0 : i32
    %c0_i32_0 = arith.constant 0 : i32
    %c0_i32_1 = arith.constant 0 : i32
    return %c0_i32, %c0_i32_0 : i32, i32
  }
  func.func @transform_4(%arg0: i32, %arg1: i32) -> (i32, i32) {
    %c0_i32 = arith.constant 0 : i32
    %c0_i32_0 = arith.constant 0 : i32
    %c0_i32_1 = arith.constant 0 : i32
    return %c0_i32, %c0_i32_0 : i32, i32
  }
  func.func @transform_5(%arg0: i32, %arg1: i32) -> (i32, i32) {
    %c0_i32 = arith.constant 0 : i32
    %c0_i32_0 = arith.constant 0 : i32
    %c0_i32_1 = arith.constant 0 : i32
    return %c0_i32, %c0_i32_0 : i32, i32
  }
  func.func @transform_6(%arg0: i32, %arg1: i32) -> (i32, i32) {
    %c0_i32 = arith.constant 0 : i32
    %c0_i32_0 = arith.constant 0 : i32
    %c0_i32_1 = arith.constant 0 : i32
    return %c0_i32, %c0_i32_0 : i32, i32
  }
  func.func @transform_7(%arg0: i32, %arg1: i32) -> (i32, i32) {
    %c0_i32 = arith.constant 0 : i32
    %c0_i32_0 = arith.constant 0 : i32
    return %c0_i32, %arg1 : i32, i32
  }
  func.func @transform_8(%arg0: i32, %arg1: i32) -> (i32, i32) {
    %c0_i32 = arith.constant 0 : i32
    %c0_i32_0 = arith.constant 0 : i32
    return %arg0, %c0_i32 : i32, i32
  }
  func.func @transform_9(%arg0: i32, %arg1: i32) -> (i32, i32) {
    %c0_i32 = arith.constant 0 : i32
    %c0_i32_0 = arith.constant 0 : i32
    return %arg0, %c0_i32 : i32, i32
  }
}

</mosaic_0001>

<bundles_post_ra>
// kernel: tpu_custom_call.1
= control target key start
LH: loop header
LB: loop body
LE: loop exit
PB: predicated region body
PF: predicated region fallthrough
CT: control target
= control target key end

     0   :  { %15 = vsyncpa [#allocation3], 0  ;;  %s4935_s0 = inlined_call_operand.hbm [shape: f32[128,128], index: 0, kind: input, shape index: {}]   ;;  %s4936_s1 = inlined_call_operand.hbm [shape: f32[8,256], index: 1, kind: input, shape index: {}]   ;;  %s4937_s2 = inlined_call_operand.hbm [shape: f32[128,128], index: 2, kind: input, shape index: {}]   ;;  %s4938_s3 = inlined_call_operand.vmem [shape: f32[1,128], index: 3, kind: input, shape index: {}]   ;;  %s4939_s4 = inlined_call_operand.hbm [shape: f32[256,256], index: 4, kind: input, shape index: {}]   ;;  %s4940_s5 = inlined_call_operand.vmem [shape: f32[1,256], index: 5, kind: input, shape index: {}]   ;;  %s4941_s6 = inlined_call_operand.vmem [shape: f32[1,128], index: 6, kind: input, shape index: {}]   ;;  %s4942_s7 = inlined_call_operand.vmem [shape: f32[1,128], index: 7, kind: input, shape index: {}]   ;;  %s4943_s8 = inlined_call_operand.hbm [shape: f32[8,128], index: 8, kind: output, shape index: {0}]   ;;  %s4944_s9 = inlined_call_operand.hbm [shape: f32[8,128], index: 9, kind: output, shape index: {1}]  }
   0x1   :  { %16 = vsyncpa [#allocation6], 0 }
   0x2   :  { %17 = vsyncpa [#allocation9], 0 }
   0x3   :  { %18 = vsyncpa [#allocation4], 0 }
   0x4   :  { %19 = vsyncpa [#allocation12], 0  ;;  %s3111_s30 = smov [#allocation5]   ;;  %s3112_s11 = smov [#allocation2]  }
   0x5   :  { %s38_s10 = sshll.u32 %s3111_s30, 4  ;;  %s25_s12 = sshll.u32 %s3112_s11, 4  ;;  %s39_s10 = int_to_ptr.vmem [resolvable:$true] %s38_s10  ;;  %s26_s12 = int_to_ptr.vmem [resolvable:$true] %s25_s12 }
   0x6   :  { %s2989_s13 = scalar_lea.vmem %s39_s10, 256  ;;  %p2994_p1 = scmp.lt.s32.totalorder %s39_s10, %s39_s10 }
   0x7   :  { %p2990_p0 = scmp.ne.s32.totalorder %s39_s10, %s2989_s13  ;;  %p2995_p2 = scmp.lt.s32.totalorder %s2989_s13, %s2989_s13 }
   0x9   :  { %p2996_p3 = por %p2995_p2, %p2994_p1 }
   0xb   :  { %p2997_p4 = pnand %p2996_p3, %p2990_p0 }
   0xd   :  { %3000 = shalt.err (!%p2997_p4)
}
   0xe   :  { %41 = dma.hbm_to_vmem [thread:$0]  %s4936_s1, 256, %s39_s10, [#allocation6]  }
   0xf   :  { %s3009_s16 = scalar_lea.vmem %s26_s12, 2048  ;;  %p3014_p6 = scmp.lt.s32.totalorder %s26_s12, %s26_s12 }
  0x10   :  { %p3010_p5 = scmp.ne.s32.totalorder %s26_s12, %s3009_s16  ;;  %p3015_p7 = scmp.lt.s32.totalorder %s3009_s16, %s3009_s16 }
  0x12   :  { %p3016_p8 = por %p3015_p7, %p3014_p6 }
  0x14   :  { %p3017_p9 = pnand %p3016_p8, %p3010_p5 }
  0x16   :  { %3020 = shalt.err (!%p3017_p9)
}
  0x17   :  { %s3113_s17 = smov 128   ;;  %s3114_s18 = smov 8  }
  0x18   :  { %31 = dma.hbm_to_vmem [thread:$0]  %s4935_s0, 2048, %s26_s12, [#allocation3], %s3113_s17, %s3113_s17, %s3114_s18  }
  0x19   :  { %s3115_s21 = smov [#allocation7]   ;;  %s3116_s23 = smov [#allocation8]  }
  0x1a   :  { %s47_s22 = sshll.u32 %s3115_s21, 4  ;;  %s61_s24 = sshll.u32 %s3116_s23, 4  ;;  %s48_s22 = int_to_ptr.vmem [resolvable:$true] %s47_s22  ;;  %s62_s24 = int_to_ptr.vmem [resolvable:$true] %s61_s24 }
  0x1b   :  { %s3029_s1 = scalar_lea.vmem %s48_s22, 2048  ;;  %p3034_p11 = scmp.lt.s32.totalorder %s48_s22, %s48_s22 }
  0x1c   :  { %p3030_p10 = scmp.ne.s32.totalorder %s48_s22, %s3029_s1  ;;  %p3035_p12 = scmp.lt.s32.totalorder %s3029_s1, %s3029_s1 }
  0x1e   :  { %p3036_p13 = por %p3035_p12, %p3034_p11 }
  0x20   :  { %p3037_p0 = pnand %p3036_p13, %p3030_p10 }
  0x22   :  { %3040 = shalt.err (!%p3037_p0)
}
  0x23   :  { %53 = dma.hbm_to_vmem [thread:$0]  %s4937_s2, 2048, %s48_s22, [#allocation6], %s3113_s17, %s3113_s17, %s3114_s18  }
  0x24   :  { %s3049_s27 = scalar_lea.vmem %s62_s24, 8192  ;;  %p3054_p2 = scmp.lt.s32.totalorder %s62_s24, %s62_s24 }
  0x25   :  { %p3050_p1 = scmp.ne.s32.totalorder %s62_s24, %s3049_s27  ;;  %p3055_p3 = scmp.lt.s32.totalorder %s3049_s27, %s3049_s27 }
  0x27   :  { %p3056_p4 = por %p3055_p3, %p3054_p2 }
  0x29   :  { %p3057_p5 = pnand %p3056_p4, %p3050_p1 }
  0x2b   :  { %3060 = shalt.err (!%p3057_p5)
}
  0x2c   :  { %s3117_s0 = smov 256   ;;  %s3118_s28 = smov 16  }
  0x2d   :  { %67 = dma.hbm_to_vmem [thread:$0]  %s4939_s4, 8192, %s62_s24, [#allocation9], %s3117_s0, %s3117_s0, %s3118_s28  }
  0x2e   :  { %3101 = dma.done.wait [#allocation3], 2048  }
  0x2f   :  { %3102 = vsyncadd [#allocation3], 4294965248 }
  0x30   :  { %3103 = dma.done.wait [#allocation6], 2304  }
  0x31   :  { %3104 = vsyncadd [#allocation6], 4294964992 }
  0x32   :  { %3105 = dma.done.wait [#allocation9], 8192  }
  0x33   :  { %3106 = vsyncadd [#allocation9], 4294959104  ;;  %v303_v0 = vld [vmem:[#allocation8 + $0xf8] sm:$0xff]  ;;  %v302_v1 = vld [vmem:[#allocation8 + $0xf0] sm:$0xff]  ;;  %vm1893_vm0 = vcmask 130112   ;;  %vm1900_vm1 = vcmask 195712  }
  0x34   :  { %v301_v2 = vld [vmem:[#allocation8 + $0xe8] sm:$0xff]  ;;  %348 = vmatprep.subr.mxu1 %v303_v0  ;;  %v300_v3 = vld [vmem:[#allocation8 + $0xe0] sm:$0xff]  ;;  %v299_v4 = vld [vmem:[#allocation8 + $0xd8] sm:$0xff]  ;;  %vm1907_vm2 = vcmask 261312   ;;  %vm1914_vm3 = vcmask 326912   ;;  %vm1921_vm4 = vcmask 392512  }
  0x35   :  { %349 = vmatpush1.msra.mxu1 %v302_v1  ;;  %v298_v5 = vld [vmem:[#allocation8 + $0xd0] sm:$0xff]  ;;  %v117_v6 = vld [vmem:[#allocation7 + $0x78] sm:$0xff]  ;;  %v297_v7 = vld [vmem:[#allocation8 + $0xc8] sm:$0xff]  ;;  %vm1928_vm5 = vcmask 458112   ;;  %vm1935_vm6 = vcmask 523712   ;;  %vm1942_vm7 = vcmask 589312  }
  0x36   :  { %350 = vmatprep.subr.mxu1 %v301_v2  ;;  %2649 = vmatprep.subr.mxu0 %v117_v6  ;;  %v116_v8 = vld [vmem:[#allocation7 + $0x70] sm:$0xff]  ;;  %v296_v9 = vld [vmem:[#allocation8 + $0xc0] sm:$0xff]  ;;  %v115_v10 = vld [vmem:[#allocation7 + $0x68] sm:$0xff]  ;;  %vm1949_vm8 = vcmask 654912   ;;  %vm1956_vm9 = vcmask 720512   ;;  %vm4951_vm10 = vcmask 786112  }
  0x37   :  { %351 = vmatpush1.msra.mxu1 %v300_v3  ;;  %2650 = vmatpush3.msra.mxu0 %v117_v6  ;;  %v295_v11 = vld [vmem:[#allocation8 + $0xb8] sm:$0xff]  ;;  %v294_v12 = vld [vmem:[#allocation8 + $0xb0] sm:$0xff]  ;;  %v114_v13 = vld [vmem:[#allocation7 + $0x60] sm:$0xff]  ;;  %vm4950_vm11 = vcmask 851712   ;;  %vm1977_vm12 = vcmask 917312   ;;  %vm1984_vm13 = vcmask 982912  }
  0x38   :  { %352 = vmatprep.subr.mxu1 %v299_v4  ;;  %2651 = vmatprep.subr.mxu0 %v116_v8  ;;  %v293_v14 = vld [vmem:[#allocation8 + $0xa8] sm:$0xff]  ;;  %v292_v15 = vld [vmem:[#allocation8 + $0xa0] sm:$0xff]  ;;  %v113_v16 = vld [vmem:[#allocation7 + $0x58] sm:$0xff]  ;;  %vm1991_vm14 = vcmask 1048512   ;;  %vm2546_vm15 = vcmask 1041409  }
  0x39   :  { %353 = vmatpush1.msra.mxu1 %v298_v5  ;;  %2652 = vmatpush3.msra.mxu0 %v116_v8  ;;  %v291_v17 = vld [vmem:[#allocation8 + $0x98] sm:$0xff]  ;;  %v290_v18 = vld [vmem:[#allocation8 + $0x90] sm:$0xff]  ;;  %v289_v20 = vld [vmem:[#allocation8 + $0x88] sm:$0xff] }
  0x3a   :  { %354 = vmatprep.subr.mxu1 %v297_v7  ;;  %2653 = vmatprep.subr.mxu0 %v115_v10  ;;  %v112_v19 = vld [vmem:[#allocation7 + $0x50] sm:$0xff]  ;;  %v288_v21 = vld [vmem:[#allocation8 + $0x80] sm:$0xff]  ;;  %v111_v22 = vld [vmem:[#allocation7 + $0x48] sm:$0xff] }
  0x3b   :  { %355 = vmatpush1.msra.mxu1 %v296_v9  ;;  %2654 = vmatpush3.msra.mxu0 %v115_v10  ;;  %v287_v23 = vld [vmem:[#allocation8 + $0x78] sm:$0xff]  ;;  %v286_v24 = vld [vmem:[#allocation8 + $0x70] sm:$0xff]  ;;  %v110_v25 = vld [vmem:[#allocation7 + $0x40] sm:$0xff] }
  0x3c   :  { %356 = vmatprep.subr.mxu1 %v295_v11  ;;  %2655 = vmatprep.subr.mxu0 %v114_v13  ;;  %v285_v26 = vld [vmem:[#allocation8 + $0x68] sm:$0xff]  ;;  %v284_v27 = vld [vmem:[#allocation8 + $0x60] sm:$0xff]  ;;  %v109_v28 = vld [vmem:[#allocation7 + $0x38] sm:$0xff] }
  0x3d   :  { %357 = vmatpush1.msra.mxu1 %v294_v12  ;;  %2656 = vmatpush3.msra.mxu0 %v114_v13  ;;  %v283_v29 = vld [vmem:[#allocation8 + $0x58] sm:$0xff]  ;;  %v282_v30 = vld [vmem:[#allocation8 + $0x50] sm:$0xff]  ;;  %v281_v32 = vld [vmem:[#allocation8 + $0x48] sm:$0xff] }
  0x3e   :  { %358 = vmatprep.subr.mxu1 %v293_v14  ;;  %2657 = vmatprep.subr.mxu0 %v113_v16  ;;  %v108_v31 = vld [vmem:[#allocation7 + $0x30] sm:$0xff]  ;;  %v280_v33 = vld [vmem:[#allocation8 + $0x40] sm:$0xff]  ;;  %v107_v34 = vld [vmem:[#allocation7 + $0x28] sm:$0xff] }
  0x3f   :  { %359 = vmatpush1.msra.mxu1 %v292_v15  ;;  %2658 = vmatpush3.msra.mxu0 %v113_v16  ;;  %v279_v35 = vld [vmem:[#allocation8 + $0x38] sm:$0xff]  ;;  %v278_v36 = vld [vmem:[#allocation8 + $0x30] sm:$0xff]  ;;  %v106_v37 = vld [vmem:[#allocation7 + $0x20] sm:$0xff] }
  0x40   :  { %360 = vmatprep.subr.mxu1 %v291_v17  ;;  %2659 = vmatprep.subr.mxu0 %v112_v19  ;;  %v277_v38 = vld [vmem:[#allocation8 + $0x28] sm:$0xff]  ;;  %v276_v39 = vld [vmem:[#allocation8 + $0x20] sm:$0xff]  ;;  %v105_v40 = vld [vmem:[#allocation7 + $0x18] sm:$0xff] }
  0x41   :  { %361 = vmatpush1.msra.mxu1 %v290_v18  ;;  %2660 = vmatpush3.msra.mxu0 %v112_v19  ;;  %v275_v41 = vld [vmem:[#allocation8 + $0x18] sm:$0xff]  ;;  %v274_v42 = vld [vmem:[#allocation8 + $0x10] sm:$0xff]  ;;  %v273_v44 = vld [vmem:[#allocation8 + $0x8] sm:$0xff] }
  0x42   :  { %362 = vmatprep.subr.mxu1 %v289_v20  ;;  %2661 = vmatprep.subr.mxu0 %v111_v22  ;;  %v104_v43 = vld [vmem:[#allocation7 + $0x10] sm:$0xff]  ;;  %v272_v45 = vld [vmem:[#allocation8] sm:$0xff]  ;;  %v103_v46 = vld [vmem:[#allocation7 + $0x8] sm:$0xff] }
  0x43   :  { %363 = vmatpush1.msra.mxu1 %v288_v21  ;;  %2662 = vmatpush3.msra.mxu0 %v111_v22  ;;  %v335_v47 = vld [vmem:[#allocation8 + $0x1f8] sm:$0xff]  ;;  %v334_v48 = vld [vmem:[#allocation8 + $0x1f0] sm:$0xff]  ;;  %v102_v49 = vld [vmem:[#allocation7] sm:$0xff] }
  0x44   :  { %364 = vmatprep.subr.mxu1 %v287_v23  ;;  %2663 = vmatprep.subr.mxu0 %v110_v25  ;;  %v333_v50 = vld [vmem:[#allocation8 + $0x1e8] sm:$0xff]  ;;  %v332_v51 = vld [vmem:[#allocation8 + $0x1e0] sm:$0xff]  ;;  %v86_v52 = vld [vmem:[#allocation2] sm:$0xff] }
  0x45   :  { %365 = vmatpush1.msra.mxu1 %v286_v24  ;;  %2664 = vmatpush3.msra.mxu0 %v110_v25  ;;  %v331_v53 = vld [vmem:[#allocation8 + $0x1d8] sm:$0xff]  ;;  %v330_v55 = vld [vmem:[#allocation8 + $0x1d0] sm:$0xff]  ;;  %v88_v56 = vld [vmem:[#allocation2 + $0x10] sm:$0xff] }
  0x46   :  { %366 = vmatprep.subr.mxu1 %v285_v26  ;;  %2665 = vmatprep.subr.mxu0 %v109_v28  ;;  %v87_v54 = vld [vmem:[#allocation2 + $0x8] sm:$0xff]  ;;  %v329_v57 = vld [vmem:[#allocation8 + $0x1c8] sm:$0xff]  ;;  %v328_v59 = vld [vmem:[#allocation8 + $0x1c0] sm:$0xff] }
  0x47   :  { %367 = vmatpush1.msra.mxu1 %v284_v27  ;;  %2666 = vmatpush3.msra.mxu0 %v109_v28  ;;  %v271_v58 = vld [vmem:[#allocation5 + $0x8] sm:$0xff]  ;;  %v3188_v60 = vld [vmem:[%s4942_s7] ss:$0 sm:$0xff]  ;;  %v89_v62 = vld [vmem:[#allocation2 + $0x18] sm:$0xff] }
  0x48   :  { %368 = vmatprep.subr.mxu1 %v283_v29  ;;  %2667 = vmatprep.subr.mxu0 %v108_v31  ;;  %v327_v61 = vld [vmem:[#allocation8 + $0x1b8] sm:$0xff]  ;;  %v326_v63 = vld [vmem:[#allocation8 + $0x1b0] sm:$0xff]  ;;  %v325_v1 = vld [vmem:[#allocation8 + $0x1a8] sm:$0xff] }
  0x49   :  { %369 = vmatpush1.msra.mxu1 %v282_v30  ;;  %2668 = vmatpush3.msra.mxu0 %v108_v31  ;;  %v90_v0 = vld [vmem:[#allocation2 + $0x20] sm:$0xff]  ;;  %v324_v2 = vld [vmem:[#allocation8 + $0x1a0] sm:$0xff]  ;;  %v323_v3 = vld [vmem:[#allocation8 + $0x198] sm:$0xff] }
  0x4a   :  { %370 = vmatprep.subr.mxu1 %v281_v32  ;;  %2669 = vmatprep.subr.mxu0 %v107_v34  ;;  %v91_v4 = vld [vmem:[#allocation2 + $0x28] sm:$0xff]  ;;  %v322_v5 = vld [vmem:[#allocation8 + $0x190] sm:$0xff]  ;;  %v92_v6 = vld [vmem:[#allocation2 + $0x30] sm:$0xff] }
  0x4b   :  { %371 = vmatpush1.msra.mxu1 %v280_v33  ;;  %2670 = vmatpush3.msra.mxu0 %v107_v34  ;;  %v321_v7 = vld [vmem:[#allocation8 + $0x188] sm:$0xff]  ;;  %v320_v8 = vld [vmem:[#allocation8 + $0x180] sm:$0xff]  ;;  %v319_v9 = vld [vmem:[#allocation8 + $0x178] sm:$0xff] }
  0x4c   :  { %372 = vmatprep.subr.mxu1 %v279_v35  ;;  %2671 = vmatprep.subr.mxu0 %v106_v37  ;;  %v93_v10 = vld [vmem:[#allocation2 + $0x38] sm:$0xff]  ;;  %v318_v11 = vld [vmem:[#allocation8 + $0x170] sm:$0xff]  ;;  %v316_v14 = vld [vmem:[#allocation8 + $0x160] sm:$0xff] }
  0x4d   :  { %373 = vmatpush1.msra.mxu1 %v278_v36  ;;  %2672 = vmatpush3.msra.mxu0 %v106_v37  ;;  %v94_v12 = vld [vmem:[#allocation2 + $0x40] sm:$0xff]  ;;  %v317_v13 = vld [vmem:[#allocation8 + $0x168] sm:$0xff]  ;;  %v315_v15 = vld [vmem:[#allocation8 + $0x158] sm:$0xff] }
  0x4e   :  { %374 = vmatprep.subr.mxu1 %v277_v38  ;;  %2673 = vmatprep.subr.mxu0 %v105_v40  ;;  %v95_v16 = vld [vmem:[#allocation2 + $0x48] sm:$0xff]  ;;  %v314_v17 = vld [vmem:[#allocation8 + $0x150] sm:$0xff]  ;;  %v96_v18 = vld [vmem:[#allocation2 + $0x50] sm:$0xff] }
  0x4f   :  { %375 = vmatpush1.msra.mxu1 %v276_v39  ;;  %2674 = vmatpush3.msra.mxu0 %v105_v40  ;;  %v313_v19 = vld [vmem:[#allocation8 + $0x148] sm:$0xff]  ;;  %v312_v20 = vld [vmem:[#allocation8 + $0x140] sm:$0xff]  ;;  %v311_v21 = vld [vmem:[#allocation8 + $0x138] sm:$0xff] }
  0x50   :  { %376 = vmatprep.subr.mxu1 %v275_v41  ;;  %2675 = vmatprep.subr.mxu0 %v104_v43  ;;  %v97_v22 = vld [vmem:[#allocation2 + $0x58] sm:$0xff]  ;;  %v310_v23 = vld [vmem:[#allocation8 + $0x130] sm:$0xff]  ;;  %v308_v26 = vld [vmem:[#allocation8 + $0x120] sm:$0xff]  ;;  %v4945_v41 = vlaneseq }
  0x51   :  { %377 = vmatpush1.msra.mxu1 %v274_v42  ;;  %2676 = vmatpush3.msra.mxu0 %v104_v43  ;;  %v98_v24 = vld [vmem:[#allocation2 + $0x60] sm:$0xff]  ;;  %v309_v25 = vld [vmem:[#allocation8 + $0x128] sm:$0xff]  ;;  %v307_v27 = vld [vmem:[#allocation8 + $0x118] sm:$0xff] }
  0x52   :  { %378 = vmatprep.subr.mxu1 %v273_v44  ;;  %2677 = vmatprep.subr.mxu0 %v103_v46  ;;  %v99_v28 = vld [vmem:[#allocation2 + $0x68] sm:$0xff]  ;;  %v306_v29 = vld [vmem:[#allocation8 + $0x110] sm:$0xff]  ;;  %v100_v30 = vld [vmem:[#allocation2 + $0x70] sm:$0xff]  ;;  %v3206_v43 = vshrl.u32 %v4945_v41, 7  ;;  %v3119_v44 = vmov 1966171168  }
  0x53   :  { %379 = vmatpush1.msra.mxu1 %v272_v45  ;;  %2678 = vmatpush3.msra.mxu0 %v103_v46  ;;  %v305_v31 = vld [vmem:[#allocation8 + $0x108] sm:$0xff]  ;;  %v304_v32 = vld [vmem:[#allocation8 + $0x100] sm:$0xff]  ;;  %v270_v33 = vld [vmem:[#allocation5] sm:$0xff]  ;;  %v422_v45 = vunpack.c.l.s4 %v3119_v44 }
  0x54   :  { %380 = vmatprep.subr.mxu1 %v335_v47  ;;  %2679 = vmatprep.subr.mxu0 %v102_v49  ;;  %v101_v34 = vld [vmem:[#allocation2 + $0x78] sm:$0xff]  ;;  %4952 = vst [vmem:[#allocation18_spill] sm:$0xff] %v3206_v43  ;;  %v3209_v47 = vsub.s32 0, %v3206_v43 }
  0x55   :  { %381 = vmatpush2.msra.mxu1 %v334_v48  ;;  %2680 = vmatpush3.msra.mxu0 %v102_v49  ;;  %v344_v48 = vsub.s32 1, %v3206_v43  ;;  %v336_v49 = vld [vmem:[%s4940_s5] sm:$0x3] }
  0x56   :  { %382 = vmatprep.subr.mxu1 %v333_v50  ;;  %2681 = vmatprep.mubr.f32.mxu0 %v86_v52  ;;  %v423_v50 = vunpack.c.0.s8 %v422_v45  ;;  %v341_v52 = vrot.slane %v336_v49, %v3209_v47 }
  0x57   :  { %383 = vmatpush2.msra.mxu1 %v332_v51  ;;  %2682 = vmatmul.mubr.f32.vlgmr.msra.gmra.mxu0 %v87_v54 }
  0x58   :  { %384 = vmatprep.subr.mxu1 %v331_v53  ;;  %2684 = vmatprep.mubr.f32.mxu0 %v88_v56  ;;  %v345_v53 = vrot.slane %v336_v49, %v344_v48 }
  0x59   :  { %385 = vmatpush2.msra.mxu1 %v330_v55  ;;  %412 = vmatprep.mubr.f32.mxu1 %v271_v58  ;;  %v426_v55 = vsub.s32 %v423_v50, %v3206_v43 }
  0x5a   :  { %386 = vmatprep.subr.mxu1 %v329_v57  ;;  %1167 = vbcast.lane.b32.xlu1 %v3188_v60, 264 }
  0x5b   :  { %387 = vmatpush2.msra.mxu1 %v328_v59  ;;  %2685 = vmatmul.mubr.f32.gmra.mxu0 %v89_v62 }
  0x5c   :  { %388 = vmatprep.subr.mxu1 %v327_v61  ;;  %2687 = vmatprep.mubr.f32.mxu0 %v90_v0 }
  0x5d   :  { %389 = vmatpush2.msra.mxu1 %v326_v63  ;;  %1163 = vbcast.lane.b32.xlu0 %v3188_v60, 256  ;;  %v2614_v63 = vld [vmem:[%s4938_s3] ss:$0 sm:$0xff] }
  0x5e   :  { %390 = vmatprep.subr.mxu1 %v325_v1  ;;  %1171 = vbcast.lane.b32.xlu1 %v3188_v60, 272 }
  0x5f   :  { %391 = vmatpush2.msra.mxu1 %v324_v2  ;;  %2688 = vmatmul.mubr.f32.gmra.mxu0 %v91_v4 }
  0x60   :  { %392 = vmatprep.subr.mxu1 %v323_v3  ;;  %2690 = vmatprep.mubr.f32.mxu0 %v92_v6 }
  0x61   :  { %393 = vmatpush2.msra.mxu1 %v322_v5  ;;  %1179 = vbcast.lane.b32.xlu0 %v3188_v60, 288 }
  0x62   :  { %394 = vmatprep.subr.mxu1 %v321_v7  ;;  %1175 = vbcast.lane.b32.xlu1 %v3188_v60, 280 }
  0x63   :  { %395 = vmatpush2.msra.mxu1 %v320_v8  ;;  %2691 = vmatmul.mubr.f32.gmra.mxu0 %v93_v10 }
  0x64   :  { %396 = vmatprep.subr.mxu1 %v319_v9  ;;  %2693 = vmatprep.mubr.f32.mxu0 %v94_v12 }
  0x65   :  { %397 = vmatpush2.msra.mxu1 %v318_v11  ;;  %1187 = vbcast.lane.b32.xlu0 %v3188_v60, 304 }
  0x66   :  { %398 = vmatprep.subr.mxu1 %v317_v13  ;;  %1183 = vbcast.lane.b32.xlu1 %v3188_v60, 296 }
  0x67   :  { %399 = vmatpush2.msra.mxu1 %v316_v14  ;;  %2694 = vmatmul.mubr.f32.gmra.mxu0 %v95_v16 }
  0x68   :  { %400 = vmatprep.subr.mxu1 %v315_v15  ;;  %2696 = vmatprep.mubr.f32.mxu0 %v96_v18 }
  0x69   :  { %401 = vmatpush2.msra.mxu1 %v314_v17  ;;  %1195 = vbcast.lane.b32.xlu0 %v3188_v60, 320 }
  0x6a   :  { %402 = vmatprep.subr.mxu1 %v313_v19  ;;  %1191 = vbcast.lane.b32.xlu1 %v3188_v60, 312 }
  0x6b   :  { %403 = vmatpush2.msra.mxu1 %v312_v20  ;;  %2697 = vmatmul.mubr.f32.gmra.mxu0 %v97_v22 }
  0x6c   :  { %404 = vmatprep.subr.mxu1 %v311_v21  ;;  %2699 = vmatprep.mubr.f32.mxu0 %v98_v24 }
  0x6d   :  { %405 = vmatpush2.msra.mxu1 %v310_v23  ;;  %1203 = vbcast.lane.b32.xlu0 %v3188_v60, 336 }
  0x6e   :  { %406 = vmatprep.subr.mxu1 %v309_v25  ;;  %1199 = vbcast.lane.b32.xlu1 %v3188_v60, 328 }
  0x6f   :  { %407 = vmatpush2.msra.mxu1 %v308_v26  ;;  %2700 = vmatmul.mubr.f32.gmra.mxu0 %v99_v28 }
  0x70   :  { %408 = vmatprep.subr.mxu1 %v307_v27  ;;  %2702 = vmatprep.mubr.f32.mxu0 %v100_v30 }
  0x71   :  { %409 = vmatpush2.msra.mxu1 %v306_v29  ;;  %1211 = vbcast.lane.b32.xlu0 %v3188_v60, 352 }
  0x72   :  { %410 = vmatprep.subr.mxu1 %v305_v31  ;;  %1207 = vbcast.lane.b32.xlu1 %v3188_v60, 344 }
  0x73   :  { %411 = vmatpush2.msra.mxu1 %v304_v32  ;;  %2703 = vmatmul.mubr.f32.gmra.mxu0 %v101_v34 }
  0x74   :  { %413 = vmatmul.mubr.f32.vlgmr.msra.gmra.mxu1 %v270_v33  ;;  %v3275_v33 = vld [vmem:[%s4941_s6] ss:$0 sm:$0xff] }
  0x75   :  { %1219 = vbcast.lane.b32.xlu0 %v3188_v60, 368 }
  0x76   :  { %1215 = vbcast.lane.b32.xlu1 %v3188_v60, 360 }
 0x117   :  { %v2683_v35 = vpop.f32.mrf.mxu0 }
 0x118   :  { %v3232_v8 = vadd.f32 %v2683_v35, %v2614_v63 }
 0x119   :  { %v191_v36 = vpop.f32.mrf.mxu0 }
 0x11a   :  { %v3224_v5 = vadd.f32 %v2614_v63, %v191_v36 }
 0x11b   :  { %v2686_v37 = vpop.f32.mrf.mxu0 }
 0x11c   :  { %v3236_v11 = vadd.f32 %v2686_v37, %v2614_v63 }
 0x11d   :  { %v201_v38 = vpop.f32.mrf.mxu0 }
 0x11e   :  { %v3226_v6 = vadd.f32 %v2614_v63, %v201_v38 }
 0x11f   :  { %v2689_v39 = vpop.f32.mrf.mxu0 }
 0x120   :  { %v3238_v12 = vadd.f32 %v2689_v39, %v2614_v63 }
 0x121   :  { %v211_v40 = vpop.f32.mrf.mxu0 }
 0x122   :  { %v3244_v15 = vadd.f32 %v2614_v63, %v211_v40 }
 0x123   :  { %v2692_v42 = vpop.f32.mrf.mxu0 }
 0x124   :  { %v3250_v19 = vadd.f32 %v2692_v42, %v2614_v63 }
 0x125   :  { %v221_v46 = vpop.f32.mrf.mxu0 }
 0x126   :  { %v3254_v21 = vadd.f32 %v2614_v63, %v221_v46 }
 0x127   :  { %v2695_v51 = vpop.f32.mrf.mxu0 }
 0x128   :  { %v3258_v24 = vadd.f32 %v2695_v51, %v2614_v63 }
 0x129   :  { %v231_v57 = vpop.f32.mrf.mxu0 }
 0x12a   :  { %v3262_v26 = vadd.f32 %v2614_v63, %v231_v57 }
 0x12b   :  { %v2698_v0 = vpop.f32.mrf.mxu0 }
 0x12c   :  { %v3266_v30 = vadd.f32 %v2698_v0, %v2614_v63 }
 0x12d   :  { %v241_v9 = vpop.f32.mrf.mxu0 }
 0x12e   :  { %v3270_v32 = vadd.f32 %v2614_v63, %v241_v9 }
 0x12f   :  { %v2701_v18 = vpop.f32.mrf.mxu0 }
 0x130   :  { %v3281_v38 = vadd.f32 %v2701_v18, %v2614_v63 }
 0x131   :  { %v251_v23 = vpop.f32.mrf.mxu0 }
 0x132   :  { %v3283_v39 = vadd.f32 %v2614_v63, %v251_v23 }
 0x133   :  { %v2704_v29 = vpop.f32.mrf.mxu0 }
 0x134   :  { %v414_v54 = vpop.f32.mrf.mxu1 }
 0x135   :  { %v415_v58 = vadd.f32 %v414_v54, %v341_v52  ;;  %v261_v40 = vpop.f32.mrf.mxu0  ;;  %v3291_v52 = vadd.f32 %v2704_v29, %v2614_v63 }
 0x136   :  { %v416_v56 = vpop.f32.mrf.mxu1 }
 0x137   :  { %v417_v59 = vadd.f32 %v416_v56, %v345_v53  ;;  %v3293_v53 = vadd.f32 %v2614_v63, %v261_v40 }
 0x139   :  { %v420_v60 = vcombine.high %v417_v59, %v417_v59  ;;  %v427_v61 = vrot.slane %v417_v59, %v426_v55  ;;  %v2580_v62 = vadd.f32 %v417_v59, %v415_v58 }
 0x13b   :  { %v434_v1 = vrot.slane %v420_v60, %v426_v55  ;;  %v3220_v2 = vrot.slane %v427_v61, %v426_v55  ;;  %2581 = vst [vmem:[#allocation10] sm:$0xff] %v2580_v62  ;;  %v435_v28 = vcombine.high %v427_v61, %v427_v61 }
 0x13d   :  { %v436_v3 = vcombine.high %v434_v1, %v434_v1  ;;  %v3222_v4 = vrot.slane %v434_v1, %v426_v55  ;;  %v3230_v7 = vrot.slane %v3220_v2, %v3209_v47  ;;  %v457_v35 = vrot.slane %v435_v28, %v426_v55 }
 0x13f   :  { %v3234_v10 = vrot.slane %v436_v3, %v426_v55  ;;  %v511_v13 = vadd.f32 %v3230_v7, %v3226_v6  ;;  %v509_v14 = vadd.f32 %v3230_v7, %v3224_v5  ;;  %v512_v16 = vadd.f32 %v3230_v7, %v3236_v11 }
 0x140   :  { %v510_v17 = vadd.f32 %v3230_v7, %v3232_v8  ;;  %v514_v20 = vadd.f32 %v3230_v7, %v3238_v12  ;;  %v513_v22 = vadd.f32 %v3230_v7, %v3244_v15  ;;  %v516_v25 = vadd.f32 %v3230_v7, %v3250_v19 }
 0x141   :  { %2719 = vtanh.f32 %v511_v13  ;;  %v515_v27 = vadd.f32 %v3230_v7, %v3254_v21  ;;  %v518_v31 = vadd.f32 %v3230_v7, %v3258_v24  ;;  %v517_v34 = vadd.f32 %v3230_v7, %v3262_v26 }
 0x142   :  { %2721 = vtanh.f32 %v509_v14  ;;  %v488_v36 = vrot.slane %v3222_v4, %v3209_v47  ;;  %v520_v45 = vadd.f32 %v3230_v7, %v3266_v30  ;;  %v519_v49 = vadd.f32 %v3230_v7, %v3270_v32 }
 0x143   :  { %2723 = vtanh.f32 %v512_v16  ;;  %v467_v51 = vcombine.high %v457_v35, %v457_v35  ;;  %v522_v55 = vadd.f32 %v3230_v7, %v3281_v38  ;;  %v521_v56 = vadd.f32 %v3230_v7, %v3283_v39 }
 0x144   :  { %2725 = vtanh.f32 %v510_v17  ;;  %v3296_v54 = vadd.f32 %v488_v36, %v3232_v8  ;;  %v3303_v57 = vadd.f32 %v488_v36, %v3224_v5  ;;  %v3306_v58 = vadd.f32 %v488_v36, %v3236_v11 }
 0x145   :  { %2727 = vtanh.f32 %v514_v20  ;;  %v3310_v60 = vadd.f32 %v488_v36, %v3226_v6  ;;  %v3313_v61 = vadd.f32 %v488_v36, %v3238_v12  ;;  %v3317_v0 = vadd.f32 %v488_v36, %v3244_v15 }
 0x146   :  { %2729 = vtanh.f32 %v513_v22  ;;  %v3320_v1 = vadd.f32 %v488_v36, %v3250_v19  ;;  %v3323_v9 = vrot.slane %v457_v35, %v3209_v47  ;;  %v484_v13 = vrot.slane %v467_v51, %v3209_v47 }
 0x147   :  { %2731 = vtanh.f32 %v516_v25  ;;  %v3327_v14 = vadd.f32 %v488_v36, %v3254_v21  ;;  %v3330_v16 = vadd.f32 %v488_v36, %v3258_v24  ;;  %v524_v17 = vadd.f32 %v3230_v7, %v3291_v52 }
 0x148   :  { %2733 = vtanh.f32 %v515_v27  ;;  %v523_v18 = vadd.f32 %v3230_v7, %v3293_v53  ;;  %v3337_v20 = vadd.f32 %v488_v36, %v3262_v26  ;;  %v3340_v22 = vadd.f32 %v488_v36, %v3266_v30 }
 0x149   :  { %2735 = vtanh.f32 %v518_v31  ;;  %v3344_v25 = vadd.f32 %v488_v36, %v3270_v32  ;;  %v3347_v27 = vadd.f32 %v488_v36, %v3281_v38  ;;  %v3351_v7 = vadd.f32 %v488_v36, %v3283_v39 }
 0x14a   :  { %2737 = vtanh.f32 %v517_v34  ;;  %v3354_v31 = vadd.f32 %v488_v36, %v3291_v52  ;;  %v3357_v35 = vadd.f32 %v488_v36, %v3293_v53  ;;  %v526_v40 = vadd.f32 %v3323_v9, %v3232_v8 }
 0x14b   :  { %2739 = vtanh.f32 %v520_v45  ;;  %v3370_v45 = vadd.f32 %v484_v13, %v3236_v11  ;;  %v3374_v36 = vadd.f32 %v484_v13, %v3226_v6  ;;  %v3381_v51 = vadd.f32 %v484_v13, %v3244_v15 }
 0x14c   :  { %2741 = vtanh.f32 %v519_v49  ;;  %v3413_v41 = vadd.f32 %v484_v13, %v3283_v39  ;;  %v3416_v43 = vadd.f32 %v484_v13, %v3291_v52 }
 0x14d   :  { %2743 = vtanh.f32 %v522_v55  ;;  %v3384_v55 = vadd.f32 %v484_v13, %v3250_v19 }
 0x14e   :  { %v2720_v37 = vpop.eup %2719  ;;  %2745 = vtanh.f32 %v521_v56  ;;  %4955 = vst [vmem:[#allocation21_spill] sm:$0xff] %v3413_v41  ;;  %4956 = vst [vmem:[#allocation22_spill] sm:$0xff] %v3416_v43 }
 0x14f   :  { %v2722_v42 = vpop.eup %2721  ;;  %v774_v44 = vmul.f32 %v2720_v37, %v3275_v33  ;;  %v3360_v37 = vadd.f32 %v484_v13, %v3232_v8  ;;  %2747 = vtanh.f32 %v524_v17  ;;  %v527_v17 = vadd.f32 %v3323_v9, %v3226_v6 }
 0x150   :  { %v2724_v46 = vpop.eup %2723  ;;  %v772_v48 = vmul.f32 %v2722_v42, %v3275_v33  ;;  %v525_v42 = vadd.f32 %v3323_v9, %v3224_v5  ;;  %2749 = vtanh.f32 %v523_v18  ;;  %v3399_v18 = vadd.f32 %v484_v13, %v3262_v26 }
 0x151   :  { %v2726_v50 = vpop.eup %2725  ;;  %904 = vadd.xlane.f32.xlu1 %v774_v44  ;;  %v775_v59 = vmul.f32 %v2724_v46, %v3275_v33  ;;  %v3367_v44 = vadd.f32 %v484_v13, %v3224_v5  ;;  %2751 = vtanh.f32 %v526_v40  ;;  %v466_v40 = vcombine.high %v3222_v4, %v3222_v4 }
 0x152   :  { %900 = vadd.xlane.f32.xlu0 %v772_v48  ;;  %v2728_v62 = vpop.eup %2727  ;;  %v773_v63 = vmul.f32 %v2726_v50, %v3275_v33  ;;  %v3377_v48 = vadd.f32 %v484_v13, %v3238_v12  ;;  %2753 = vtanh.f32 %v525_v42  ;;  %v530_v42 = vadd.f32 %v3323_v9, %v3238_v12 }
 0x153   :  { %v2730_v3 = vpop.eup %2729  ;;  %v777_v23 = vmul.f32 %v2728_v62, %v3275_v33  ;;  %v3389_v62 = vadd.f32 %v484_v13, %v3254_v21 }
 0x154   :  { %v2732_v28 = vpop.eup %2731  ;;  %v776_v29 = vmul.f32 %v2730_v3, %v3275_v33  ;;  %v528_v3 = vadd.f32 %v3323_v9, %v3236_v11 }
 0x155   :  { %906 = vadd.xlane.f32.xlu1 %v775_v59  ;;  %v2734_v34 = vpop.eup %2733  ;;  %v779_v46 = vmul.f32 %v2732_v28, %v3275_v33  ;;  %v492_v59 = vrot.slane %v3234_v10, %v3209_v47 }
 0x156   :  { %902 = vadd.xlane.f32.xlu0 %v773_v63  ;;  %v2736_v49 = vpop.eup %2735  ;;  %v778_v50 = vmul.f32 %v2734_v34, %v3275_v33  ;;  %v3392_v63 = vadd.f32 %v484_v13, %v3258_v24  ;;  %v3409_v34 = vadd.f32 %v484_v13, %v3281_v38  ;;  %2755 = vtanh.f32 %v528_v3 }
 0x157   :  { %v2738_v56 = vpop.eup %2737  ;;  %v781_v28 = vmul.f32 %v2736_v49, %v3275_v33  ;;  %v3421_v49 = vadd.f32 %v484_v13, %v3293_v53  ;;  %v3431_v43 = vadd.f32 %v492_v59, %v3224_v5  ;;  %v3434_v41 = vadd.f32 %v492_v59, %v3236_v11 }
 0x158   :  { %4954 = vst [vmem:[#allocation20_spill] sm:$0xff] %v3409_v34  ;;  %v3424_v34 = vadd.f32 %v492_v59, %v3232_v8  ;;  %2757 = vtanh.f32 %v527_v17  ;;  %v3452_v3 = vadd.f32 %v492_v59, %v3254_v21  ;;  %v532_v17 = vadd.f32 %v3323_v9, %v3250_v19 }
 0x159   :  { %910 = vadd.xlane.f32.xlu1 %v777_v23  ;;  %v3402_v23 = vadd.f32 %v484_v13, %v3266_v30  ;;  %4957 = vst [vmem:[#allocation23_spill] sm:$0xff] %v3421_v49  ;;  %4959 = vst [vmem:[#allocation25_spill] sm:$0xff] %v3431_v43  ;;  %v3445_v49 = vadd.f32 %v492_v59, %v3244_v15  ;;  %v3448_v43 = vadd.f32 %v492_v59, %v3250_v19 }
 0x15a   :  { %908 = vadd.xlane.f32.xlu0 %v776_v29  ;;  %v3406_v29 = vadd.f32 %v484_v13, %v3270_v32  ;;  %4958 = vst [vmem:[#allocation24_spill] sm:$0xff] %v3424_v34  ;;  %4960 = vst [vmem:[#allocation26_spill] sm:$0xff] %v3434_v41  ;;  %v3438_v13 = vadd.f32 %v492_v59, %v3226_v6  ;;  %2759 = vtanh.f32 %v530_v42 }
 0x15b   :  { %4953 = vst [vmem:[#allocation19_spill] sm:$0xff] %v3402_v23  ;;  %4963 = vst [vmem:[#allocation29_spill] sm:$0xff] %v3445_v49  ;;  %v3462_v49 = vadd.f32 %v492_v59, %v3262_v26  ;;  %v468_v42 = vcombine.high %v3234_v10, %v3234_v10 }
 0x15c   :  { %4961 = vst [vmem:[#allocation27_spill] sm:$0xff] %v3438_v13  ;;  %4964 = vst [vmem:[#allocation30_spill] sm:$0xff] %v3448_v43  ;;  %v3455_v13 = vadd.f32 %v492_v59, %v3258_v24  ;;  %v3465_v43 = vadd.f32 %v492_v59, %v3266_v30 }
 0x15d   :  { %914 = vadd.xlane.f32.xlu1 %v779_v46  ;;  %v2740_v46 = vpop.eup %2739  ;;  %4965 = vst [vmem:[#allocation31_spill] sm:$0xff] %v3452_v3  ;;  %4967 = vst [vmem:[#allocation33_spill] sm:$0xff] %v3462_v49  ;;  %v3479_v49 = vadd.f32 %v492_v59, %v3291_v52 }
 0x15e   :  { %912 = vadd.xlane.f32.xlu0 %v778_v50  ;;  %v780_v50 = vmul.f32 %v2738_v56, %v3275_v33  ;;  %v2742_v23 = vpop.eup %2741  ;;  %v529_v56 = vadd.f32 %v3323_v9, %v3244_v15  ;;  %v783_v4 = vmul.f32 %v2740_v46, %v3275_v33  ;;  %v496_v46 = vrot.slane %v466_v40, %v3209_v47 }
 0x15f   :  { %v782_v34 = vmul.f32 %v2742_v23, %v3275_v33  ;;  %4966 = vst [vmem:[#allocation32_spill] sm:$0xff] %v3455_v13  ;;  %v531_v23 = vadd.f32 %v3323_v9, %v3254_v21  ;;  %4968 = vst [vmem:[#allocation34_spill] sm:$0xff] %v3465_v43 }
 0x160   :  { %2761 = vtanh.f32 %v529_v56  ;;  %4971 = vst [vmem:[#allocation37_spill] sm:$0xff] %v3479_v49  ;;  %v533_v56 = vadd.f32 %v3323_v9, %v3262_v26  ;;  %v3494_v49 = vadd.f32 %v496_v46, %v3224_v5 }
 0x161   :  { %918 = vadd.xlane.f32.xlu1 %v781_v28  ;;  %v3441_v28 = vadd.f32 %v492_v59, %v3238_v12  ;;  %2763 = vtanh.f32 %v532_v17  ;;  %v3515_v17 = vadd.f32 %v496_v46, %v3254_v21 }
 0x162   :  { %916 = vadd.xlane.f32.xlu0 %v780_v50  ;;  %v2744_v50 = vpop.eup %2743  ;;  %4974 = vst [vmem:[#allocation40_spill] sm:$0xff] %v3494_v49  ;;  %2765 = vtanh.f32 %v531_v23  ;;  %v3511_v49 = vadd.f32 %v496_v46, %v3250_v19  ;;  %v535_v23 = vadd.f32 %v3323_v9, %v3270_v32 }
 0x163   :  { %4962 = vst [vmem:[#allocation28_spill] sm:$0xff] %v3441_v28  ;;  %v2746_v41 = vpop.eup %2745  ;;  %v785_v40 = vmul.f32 %v2744_v50, %v3275_v33  ;;  %v3476_v28 = vadd.f32 %v492_v59, %v3283_v39  ;;  %v3484_v50 = vadd.f32 %v492_v59, %v3293_v53  ;;  %4980 = vst [vmem:[#allocation46_spill] sm:$0xff] %v3515_v17 }
 0x164   :  { %v2748_v13 = vpop.eup %2747  ;;  %v784_v3 = vmul.f32 %v2746_v41, %v3275_v33  ;;  %v534_v41 = vadd.f32 %v3323_v9, %v3258_v24  ;;  %4979 = vst [vmem:[#allocation45_spill] sm:$0xff] %v3511_v49  ;;  %v3528_v49 = vadd.f32 %v496_v46, %v3266_v30 }
 0x165   :  { %922 = vadd.xlane.f32.xlu1 %v783_v4  ;;  %v3469_v4 = vadd.f32 %v492_v59, %v3270_v32  ;;  %4970 = vst [vmem:[#allocation36_spill] sm:$0xff] %v3476_v28  ;;  %v2750_v43 = vpop.eup %2749  ;;  %4972 = vst [vmem:[#allocation38_spill] sm:$0xff] %v3484_v50  ;;  %v3497_v28 = vadd.f32 %v496_v46, %v3236_v11  ;;  %v787_v10 = vmul.f32 %v2748_v13, %v3275_v33 }
 0x166   :  { %920 = vadd.xlane.f32.xlu0 %v782_v34  ;;  %v3472_v34 = vadd.f32 %v492_v59, %v3281_v38  ;;  %v3501_v59 = vadd.f32 %v496_v46, %v3226_v6  ;;  %v3508_v50 = vadd.f32 %v496_v46, %v3244_v15  ;;  %v500_v13 = vrot.slane %v468_v42, %v3209_v47 }
 0x167   :  { %4975 = vst [vmem:[#allocation41_spill] sm:$0xff] %v3497_v28  ;;  %4983 = vst [vmem:[#allocation49_spill] sm:$0xff] %v3528_v49  ;;  %2767 = vtanh.f32 %v534_v41  ;;  %v465_v41 = vcombine.high %v3220_v2, %v3220_v2 }
 0x168   :  { %4969 = vst [vmem:[#allocation35_spill] sm:$0xff] %v3472_v34  ;;  %v3487_v34 = vadd.f32 %v496_v46, %v3232_v8  ;;  %4976 = vst [vmem:[#allocation42_spill] sm:$0xff] %v3501_v59  ;;  %v3518_v59 = vadd.f32 %v496_v46, %v3258_v24  ;;  %2769 = vtanh.f32 %v533_v56  ;;  %v537_v56 = vadd.f32 %v3323_v9, %v3283_v39 }
 0x169   :  { %926 = vadd.xlane.f32.xlu1 %v785_v40  ;;  %v2752_v40 = vpop.eup %2751  ;;  %4978 = vst [vmem:[#allocation44_spill] sm:$0xff] %v3508_v50  ;;  %v3525_v50 = vadd.f32 %v496_v46, %v3262_v26 }
 0x16a   :  { %4973 = vst [vmem:[#allocation39_spill] sm:$0xff] %v3487_v34  ;;  %924 = vadd.xlane.f32.xlu0 %v784_v3  ;;  %v3504_v3 = vadd.f32 %v496_v46, %v3238_v12  ;;  %v786_v34 = vmul.f32 %v2750_v43, %v3275_v33  ;;  %v2754_v28 = vpop.eup %2753  ;;  %4981 = vst [vmem:[#allocation47_spill] sm:$0xff] %v3518_v59  ;;  %v536_v43 = vadd.f32 %v3323_v9, %v3266_v30 }
 0x16b   :  { %4982 = vst [vmem:[#allocation48_spill] sm:$0xff] %v3525_v50  ;;  %v789_v42 = vmul.f32 %v2752_v40, %v3275_v33  ;;  %v2756_v59 = vpop.eup %2755  ;;  %v788_v17 = vmul.f32 %v2754_v28, %v3275_v33  ;;  %v3542_v50 = vadd.f32 %v496_v46, %v3291_v52  ;;  %v3547_v40 = vadd.f32 %v496_v46, %v3293_v53 }
 0x16c   :  { %4977 = vst [vmem:[#allocation43_spill] sm:$0xff] %v3504_v3  ;;  %v3539_v3 = vadd.f32 %v496_v46, %v3283_v39  ;;  %v2758_v49 = vpop.eup %2757  ;;  %v538_v28 = vadd.f32 %v3323_v9, %v3281_v38  ;;  %v791_v2 = vmul.f32 %v2756_v59, %v3275_v33  ;;  %2771 = vtanh.f32 %v536_v43 }
 0x16d   :  { %930 = vadd.xlane.f32.xlu1 %v787_v10  ;;  %v3532_v10 = vadd.f32 %v496_v46, %v3270_v32  ;;  %4986 = vst [vmem:[#allocation52_spill] sm:$0xff] %v3542_v50  ;;  %4987 = vst [vmem:[#allocation53_spill] sm:$0xff] %v3547_v40  ;;  %v3557_v50 = vadd.f32 %v500_v13, %v3224_v5  ;;  %2773 = vtanh.f32 %v535_v23 }
 0x16e   :  { %928 = vadd.xlane.f32.xlu0 %v786_v34  ;;  %v3535_v34 = vadd.f32 %v496_v46, %v3281_v38  ;;  %4985 = vst [vmem:[#allocation51_spill] sm:$0xff] %v3539_v3  ;;  %v3560_v3 = vadd.f32 %v500_v13, %v3236_v11  ;;  %v3564_v46 = vadd.f32 %v500_v13, %v3226_v6  ;;  %2775 = vtanh.f32 %v538_v28 }
 0x16f   :  { %4989 = vst [vmem:[#allocation55_spill] sm:$0xff] %v3557_v50  ;;  %v3571_v40 = vadd.f32 %v500_v13, %v3244_v15  ;;  %v3574_v50 = vadd.f32 %v500_v13, %v3250_v19  ;;  %v3577_v59 = vrot.slane %v465_v41, %v3209_v47  ;;  %v3580_v43 = vadd.f32 %v500_v13, %v3254_v21 }
 0x170   :  { %4984 = vst [vmem:[#allocation50_spill] sm:$0xff] %v3535_v34  ;;  %v3550_v34 = vadd.f32 %v500_v13, %v3232_v8  ;;  %4990 = vst [vmem:[#allocation56_spill] sm:$0xff] %v3560_v3  ;;  %v539_v23 = vadd.f32 %v3323_v9, %v3293_v53  ;;  %v3593_v47 = vadd.f32 %v500_v13, %v3266_v30  ;;  %2777 = vtanh.f32 %v537_v56 }
 0x171   :  { %934 = vadd.xlane.f32.xlu1 %v789_v42  ;;  %v2760_v42 = vpop.eup %2759  ;;  %4992 = vst [vmem:[#allocation58_spill] sm:$0xff] %v3574_v50  ;;  %4993 = vst [vmem:[#allocation59_spill] sm:$0xff] %v3580_v43  ;;  %v3590_v50 = vadd.f32 %v500_v13, %v3262_v26  ;;  %v3610_v28 = vadd.f32 %v500_v13, %v3293_v53 }
 0x172   :  { %4988 = vst [vmem:[#allocation54_spill] sm:$0xff] %v3550_v34  ;;  %932 = vadd.xlane.f32.xlu0 %v788_v17  ;;  %v3567_v17 = vadd.f32 %v500_v13, %v3238_v12  ;;  %v790_v34 = vmul.f32 %v2758_v49, %v3275_v33  ;;  %v2762_v3 = vpop.eup %2761  ;;  %v540_v49 = vadd.f32 %v3323_v9, %v3291_v52  ;;  %4996 = vst [vmem:[#allocation62_spill] sm:$0xff] %v3593_v47 }
 0x173   :  { %4995 = vst [vmem:[#allocation61_spill] sm:$0xff] %v3590_v50  ;;  %v793_v41 = vmul.f32 %v2760_v42, %v3275_v33  ;;  %v792_v43 = vmul.f32 %v2762_v3, %v3275_v33  ;;  %v3604_v9 = vadd.f32 %v500_v13, %v3283_v39  ;;  %v3607_v50 = vadd.f32 %v500_v13, %v3291_v52 }
 0x174   :  { %4991 = vst [vmem:[#allocation57_spill] sm:$0xff] %v3567_v17  ;;  %v3583_v17 = vadd.f32 %v500_v13, %v3258_v24  ;;  %2779 = vtanh.f32 %v540_v49 }
 0x175   :  { %938 = vadd.xlane.f32.xlu1 %v791_v2  ;;  %v3597_v2 = vadd.f32 %v500_v13, %v3270_v32  ;;  %4998 = vst [vmem:[#allocation64_spill] sm:$0xff] %v3604_v9  ;;  %4999 = vst [vmem:[#allocation65_spill] sm:$0xff] %v3607_v50  ;;  %2781 = vtanh.f32 %v539_v23  ;;  %v541_v9 = vadd.f32 %v3577_v59, %v3224_v5 }
 0x176   :  { %4994 = vst [vmem:[#allocation60_spill] sm:$0xff] %v3583_v17  ;;  %936 = vadd.xlane.f32.xlu0 %v790_v34  ;;  %v3600_v34 = vadd.f32 %v500_v13, %v3281_v38  ;;  %v2764_v17 = vpop.eup %2763 }
 0x177   :  { %v2766_v47 = vpop.eup %2765  ;;  %v795_v42 = vmul.f32 %v2764_v17, %v3275_v33  ;;  %v544_v17 = vadd.f32 %v3577_v59, %v3236_v11  ;;  %v545_v11 = vadd.f32 %v3577_v59, %v3244_v15 }
 0x178   :  { %4997 = vst [vmem:[#allocation63_spill] sm:$0xff] %v3600_v34  ;;  %v542_v34 = vadd.f32 %v3577_v59, %v3232_v8  ;;  %v2768_v3 = vpop.eup %2767  ;;  %v794_v56 = vmul.f32 %v2766_v47, %v3275_v33  ;;  %v543_v8 = vadd.f32 %v3577_v59, %v3226_v6  ;;  %v546_v47 = vadd.f32 %v3577_v59, %v3238_v12 }
 0x179   :  { %942 = vadd.xlane.f32.xlu1 %v793_v41  ;;  %v2770_v50 = vpop.eup %2769  ;;  %v797_v13 = vmul.f32 %v2768_v3, %v3275_v33  ;;  %v547_v12 = vadd.f32 %v3577_v59, %v3254_v21 }
 0x17a   :  { %940 = vadd.xlane.f32.xlu0 %v792_v43  ;;  %2783 = vtanh.f32 %v542_v34  ;;  %v2772_v43 = vpop.eup %2771  ;;  %v796_v49 = vmul.f32 %v2770_v50, %v3275_v33 }
 0x17b   :  { %2785 = vtanh.f32 %v541_v9  ;;  %v2774_v23 = vpop.eup %2773  ;;  %v799_v5 = vmul.f32 %v2772_v43, %v3275_v33  ;;  %v548_v9 = vadd.f32 %v3577_v59, %v3250_v19  ;;  %v549_v19 = vadd.f32 %v3577_v59, %v3262_v26 }
 0x17c   :  { %2787 = vtanh.f32 %v544_v17  ;;  %v2776_v41 = vpop.eup %2775  ;;  %v798_v34 = vmul.f32 %v2774_v23, %v3275_v33 }
 0x17d   :  { %946 = vadd.xlane.f32.xlu1 %v795_v42  ;;  %2789 = vtanh.f32 %v543_v8  ;;  %v2778_v50 = vpop.eup %2777  ;;  %v801_v6 = vmul.f32 %v2776_v41, %v3275_v33  ;;  %v552_v8 = vadd.f32 %v3577_v59, %v3266_v30  ;;  %v554_v41 = vadd.f32 %v3577_v59, %v3281_v38 }
 0x17e   :  { %944 = vadd.xlane.f32.xlu0 %v794_v56  ;;  %2791 = vtanh.f32 %v546_v47  ;;  %v800_v3 = vmul.f32 %v2778_v50, %v3275_v33  ;;  %v553_v30 = vadd.f32 %v3577_v59, %v3283_v39  ;;  %v555_v38 = vadd.f32 %v3577_v59, %v3293_v53 }
 0x17f   :  { %2793 = vtanh.f32 %v545_v11 }
 0x180   :  { %2795 = vtanh.f32 %v548_v9 }
 0x181   :  { %950 = vadd.xlane.f32.xlu1 %v797_v13  ;;  %v2780_v42 = vpop.eup %2779  ;;  %v550_v13 = vadd.f32 %v3577_v59, %v3258_v24  ;;  %2797 = vtanh.f32 %v547_v12  ;;  %v551_v24 = vadd.f32 %v3577_v59, %v3270_v32 }
 0x182   :  { %948 = vadd.xlane.f32.xlu0 %v796_v49  ;;  %v2782_v56 = vpop.eup %2781  ;;  %v803_v15 = vmul.f32 %v2780_v42, %v3275_v33 }
 0x183   :  { %v802_v43 = vmul.f32 %v2782_v56, %v3275_v33  ;;  %2799 = vtanh.f32 %v550_v13 }
 0x184   :  { %2801 = vtanh.f32 %v549_v19 }
 0x185   :  { %954 = vadd.xlane.f32.xlu1 %v799_v5  ;;  %2803 = vtanh.f32 %v552_v8 }
 0x186   :  { %952 = vadd.xlane.f32.xlu0 %v798_v34  ;;  %2805 = vtanh.f32 %v551_v24 }
 0x187   :  { %v2784_v17 = vpop.eup %2783  ;;  %2807 = vtanh.f32 %v554_v41 }
 0x188   :  { %v2786_v49 = vpop.eup %2785  ;;  %v805_v21 = vmul.f32 %v2784_v17, %v3275_v33  ;;  %2809 = vtanh.f32 %v553_v30 }
 0x189   :  { %958 = vadd.xlane.f32.xlu1 %v801_v6  ;;  %v2788_v23 = vpop.eup %2787  ;;  %v804_v5 = vmul.f32 %v2786_v49, %v3275_v33  ;;  %v556_v6 = vadd.f32 %v3577_v59, %v3291_v52 }
 0x18a   :  { %956 = vadd.xlane.f32.xlu0 %v800_v3  ;;  %v2790_v47 = vpop.eup %2789  ;;  %v807_v26 = vmul.f32 %v2788_v23, %v3275_v33  ;;  %v3676_v23 = vpop.permute.xlu1 %1167 }
 0x18b   :  { %v2792_v34 = vpop.eup %2791  ;;  %v806_v11 = vmul.f32 %v2790_v47, %v3275_v33  ;;  %2811 = vtanh.f32 %v556_v6 }
 0x18c   :  { %v2794_v50 = vpop.eup %2793  ;;  %v809_v32 = vmul.f32 %v2792_v34, %v3275_v33  ;;  %2813 = vtanh.f32 %v555_v38 }
 0x18d   :  { %962 = vadd.xlane.f32.xlu1 %v803_v15  ;;  %v2796_v9 = vpop.eup %2795  ;;  %v808_v42 = vmul.f32 %v2794_v50, %v3275_v33  ;;  %2815 = vtanh.f32 %v3296_v54 }
 0x18e   :  { %960 = vadd.xlane.f32.xlu0 %v802_v43  ;;  %v2798_v3 = vpop.eup %2797  ;;  %v811_v39 = vmul.f32 %v2796_v9, %v3275_v33  ;;  %2817 = vtanh.f32 %v3303_v57  ;;  %v3686_v41 = vpop.permute.xlu1 %1171 }
 0x18f   :  { %v810_v56 = vmul.f32 %v2798_v3, %v3275_v33  ;;  %2819 = vtanh.f32 %v3306_v58 }
 0x190   :  { %v2800_v12 = vpop.eup %2799  ;;  %2821 = vtanh.f32 %v3310_v60 }
 0x191   :  { %966 = vadd.xlane.f32.xlu1 %v805_v21  ;;  %v2802_v15 = vpop.eup %2801  ;;  %v813_v52 = vmul.f32 %v2800_v12, %v3275_v33  ;;  %2823 = vtanh.f32 %v3313_v61 }
 0x192   :  { %964 = vadd.xlane.f32.xlu0 %v804_v5  ;;  %v2804_v13 = vpop.eup %2803  ;;  %v812_v53 = vmul.f32 %v2802_v15, %v3275_v33  ;;  %2825 = vtanh.f32 %v3317_v0 }
 0x193   :  { %v2806_v59 = vpop.eup %2805  ;;  %v815_v17 = vmul.f32 %v2804_v13, %v3275_v33  ;;  %2827 = vtanh.f32 %v3320_v1 }
 0x194   :  { %v2808_v43 = vpop.eup %2807  ;;  %v814_v19 = vmul.f32 %v2806_v59, %v3275_v33  ;;  %2829 = vtanh.f32 %v3327_v14 }
 0x195   :  { %970 = vadd.xlane.f32.xlu1 %v807_v26  ;;  %v2810_v49 = vpop.eup %2809  ;;  %v817_v54 = vmul.f32 %v2808_v43, %v3275_v33  ;;  %2831 = vtanh.f32 %v3330_v16  ;;  %v3684_v26 = vpop.permute.xlu0 %1163 }
 0x196   :  { %968 = vadd.xlane.f32.xlu0 %v806_v11  ;;  %v816_v21 = vmul.f32 %v2810_v49, %v3275_v33  ;;  %2833 = vtanh.f32 %v3337_v20 }
 0x197   :  { %2835 = vtanh.f32 %v3340_v22 }
 0x198   :  { %v2812_v57 = vpop.eup %2811  ;;  %2837 = vtanh.f32 %v3344_v25 }
 0x199   :  { %974 = vadd.xlane.f32.xlu1 %v809_v32  ;;  %v2814_v8 = vpop.eup %2813  ;;  %v819_v58 = vmul.f32 %v2812_v57, %v3275_v33  ;;  %v3693_v30 = vpop.permute.xlu0 %1179  ;;  %2839 = vtanh.f32 %v3347_v27 }
 0x19a   :  { %972 = vadd.xlane.f32.xlu0 %v808_v42  ;;  %v2816_v60 = vpop.eup %2815  ;;  %v818_v5 = vmul.f32 %v2814_v8, %v3275_v33  ;;  %v3696_v32 = vpop.permute.xlu1 %1175  ;;  %2841 = vtanh.f32 %v3351_v7 }
 0x19b   :  { %v2818_v61 = vpop.eup %2817  ;;  %v837_v24 = vmul.f32 %v2816_v60, %v3275_v33  ;;  %2843 = vtanh.f32 %v3354_v31 }
 0x19c   :  { %v2820_v0 = vpop.eup %2819  ;;  %v836_v47 = vmul.f32 %v2818_v61, %v3275_v33  ;;  %2845 = vtanh.f32 %v3357_v35 }
 0x19d   :  { %978 = vadd.xlane.f32.xlu1 %v811_v39  ;;  %v2822_v1 = vpop.eup %2821  ;;  %v839_v14 = vmul.f32 %v2820_v0, %v3275_v33  ;;  %v3704_v38 = vpop.permute.xlu0 %1187  ;;  %2847 = vtanh.f32 %v3360_v37  ;;  %v5001_v0 = vld [vmem:[#allocation20_spill] sm:$0xff] }
 0x19e   :  { %976 = vadd.xlane.f32.xlu0 %v810_v56  ;;  %v2824_v34 = vpop.eup %2823  ;;  %v838_v11 = vmul.f32 %v2822_v1, %v3275_v33  ;;  %v3706_v3 = vpop.permute.xlu1 %1183  ;;  %2849 = vtanh.f32 %v3367_v44 }
 0x19f   :  { %v2826_v16 = vpop.eup %2825  ;;  %v841_v20 = vmul.f32 %v2824_v34, %v3275_v33  ;;  %2851 = vtanh.f32 %v3370_v45 }
 0x1a0   :  { %v2828_v50 = vpop.eup %2827  ;;  %v840_v6 = vmul.f32 %v2826_v16, %v3275_v33  ;;  %2853 = vtanh.f32 %v3374_v36 }
 0x1a1   :  { %982 = vadd.xlane.f32.xlu1 %v813_v52  ;;  %v2830_v22 = vpop.eup %2829  ;;  %v843_v25 = vmul.f32 %v2828_v50, %v3275_v33  ;;  %v3713_v56 = vpop.permute.xlu0 %1195  ;;  %2855 = vtanh.f32 %v3377_v48 }
 0x1a2   :  { %980 = vadd.xlane.f32.xlu0 %v812_v53  ;;  %v2832_v9 = vpop.eup %2831  ;;  %v842_v42 = vmul.f32 %v2830_v22, %v3275_v33  ;;  %v3716_v52 = vpop.permute.xlu1 %1191  ;;  %2857 = vtanh.f32 %v3381_v51  ;;  %v5004_v22 = vld [vmem:[#allocation23_spill] sm:$0xff] }
 0x1a3   :  { %v2834_v27 = vpop.eup %2833  ;;  %v845_v7 = vmul.f32 %v2832_v9, %v3275_v33  ;;  %2859 = vtanh.f32 %v3384_v55 }
 0x1a4   :  { %v2836_v39 = vpop.eup %2835  ;;  %v844_v12 = vmul.f32 %v2834_v27, %v3275_v33  ;;  %2861 = vtanh.f32 %v3389_v62 }
 0x1a5   :  { %986 = vadd.xlane.f32.xlu1 %v815_v17  ;;  %v2838_v31 = vpop.eup %2837  ;;  %v847_v35 = vmul.f32 %v2836_v39, %v3275_v33  ;;  %v3724_v17 = vpop.permute.xlu0 %1203  ;;  %2863 = vtanh.f32 %v3392_v63 }
 0x1a6   :  { %984 = vadd.xlane.f32.xlu0 %v814_v19  ;;  %v2840_v15 = vpop.eup %2839  ;;  %v846_v13 = vmul.f32 %v2838_v31, %v3275_v33  ;;  %v3726_v43 = vpop.permute.xlu1 %1199  ;;  %2865 = vtanh.f32 %v3399_v18  ;;  %v5006_v31 = vld [vmem:[#allocation25_spill] sm:$0xff] }
 0x1a7   :  { %v2842_v37 = vpop.eup %2841  ;;  %v849_v44 = vmul.f32 %v2840_v15, %v3275_v33  ;;  %v3120_v15 = vmov 0  }
 0x1a8   :  { %v2844_v53 = vpop.eup %2843  ;;  %v848_v59 = vmul.f32 %v2842_v37, %v3275_v33  ;;  %2717 = vset.pattern.permute.xlu0 %v3120_v15  ;;  %2718 = vset.pattern.permute.xlu1 %v3120_v15 }
 0x1a9   :  { %990 = vadd.xlane.f32.xlu1 %v817_v54  ;;  %v2846_v45 = vpop.eup %2845  ;;  %v851_v36 = vmul.f32 %v2844_v53, %v3275_v33  ;;  %v3733_v54 = vpop.permute.xlu0 %1211  ;;  %v5007_v53 = vld [vmem:[#allocation26_spill] sm:$0xff] }
 0x1aa   :  { %988 = vadd.xlane.f32.xlu0 %v816_v21  ;;  %v2848_v19 = vpop.eup %2847  ;;  %v850_v49 = vmul.f32 %v2846_v45, %v3275_v33  ;;  %v3736_v21 = vpop.permute.xlu1 %1207 }
 0x1ab   :  { %v2850_v48 = vpop.eup %2849  ;;  %v821_v51 = vmul.f32 %v2848_v19, %v3275_v33 }
 0x1ac   :  { %v2852_v57 = vpop.eup %2851  ;;  %v820_v8 = vmul.f32 %v2850_v48, %v3275_v33 }
 0x1ad   :  { %994 = vadd.xlane.f32.xlu1 %v819_v58  ;;  %v2854_v55 = vpop.eup %2853  ;;  %v823_v62 = vmul.f32 %v2852_v57, %v3275_v33  ;;  %v5000_v58 = vld [vmem:[#allocation19_spill] sm:$0xff]  ;;  %v3744_v61 = vpop.permute.xlu0 %1219  ;;  %v5009_v57 = vld [vmem:[#allocation28_spill] sm:$0xff] }
 0x1ae   :  { %992 = vadd.xlane.f32.xlu0 %v818_v5  ;;  %2867 = vtanh.f32 %v5000_v58  ;;  %v2856_v60 = vpop.eup %2855  ;;  %v822_v5 = vmul.f32 %v2854_v55, %v3275_v33 }
 0x1af   :  { %2869 = vtanh.f32 %v3406_v29  ;;  %v2858_v63 = vpop.eup %2857  ;;  %v825_v18 = vmul.f32 %v2856_v60, %v3275_v33 }
 0x1b0   :  { %2871 = vtanh.f32 %v5001_v0  ;;  %v824_v1 = vmul.f32 %v2858_v63, %v3275_v33 }
 0x1b1   :  { %1030 = vadd.xlane.f32.xlu1 %v837_v24  ;;  %v3746_v24 = vpop.permute.xlu1 %1215 }
 0x1b2   :  { %1028 = vadd.xlane.f32.xlu0 %v836_v47  ;;  %v2860_v47 = vpop.eup %2859 }
 0x1b3   :  { %v2862_v34 = vpop.eup %2861  ;;  %v827_v16 = vmul.f32 %v2860_v47, %v3275_v33 }
 0x1b4   :  { %v2864_v50 = vpop.eup %2863 }
 0x1b5   :  { %1034 = vadd.xlane.f32.xlu1 %v839_v14  ;;  %v5002_v14 = vld [vmem:[#allocation21_spill] sm:$0xff]  ;;  %v829_v27 = vmul.f32 %v2864_v50, %v3275_v33  ;;  %v5013_v50 = vld [vmem:[#allocation32_spill] sm:$0xff] }
 0x1b6   :  { %1032 = vadd.xlane.f32.xlu0 %v838_v11  ;;  %2873 = vtanh.f32 %v5002_v14 }
 0x1b9   :  { %1038 = vadd.xlane.f32.xlu1 %v841_v20  ;;  %v5003_v20 = vld [vmem:[#allocation22_spill] sm:$0xff] }
 0x1ba   :  { %1036 = vadd.xlane.f32.xlu0 %v840_v6  ;;  %2875 = vtanh.f32 %v5003_v20  ;;  %v826_v6 = vmul.f32 %v2862_v34, %v3275_v33 }
 0x1bb   :  { %2877 = vtanh.f32 %v5004_v22 }
 0x1bd   :  { %1042 = vadd.xlane.f32.xlu1 %v843_v25  ;;  %v2866_v25 = vpop.eup %2865 }
 0x1be   :  { %1040 = vadd.xlane.f32.xlu0 %v842_v42  ;;  %v2868_v39 = vpop.eup %2867 }
 0x1c1   :  { %1046 = vadd.xlane.f32.xlu1 %v845_v7  ;;  %v5005_v7 = vld [vmem:[#allocation24_spill] sm:$0xff] }
 0x1c2   :  { %1044 = vadd.xlane.f32.xlu0 %v844_v12  ;;  %2879 = vtanh.f32 %v5005_v7  ;;  %v828_v12 = vmul.f32 %v2866_v25, %v3275_v33  ;;  %v5014_v25 = vld [vmem:[#allocation33_spill] sm:$0xff] }
 0x1c3   :  { %2881 = vtanh.f32 %v5006_v31  ;;  %v5015_v31 = vld [vmem:[#allocation34_spill] sm:$0xff] }
 0x1c4   :  { %2883 = vtanh.f32 %v5007_v53 }
 0x1c5   :  { %1050 = vadd.xlane.f32.xlu1 %v847_v35  ;;  %v2870_v35 = vpop.eup %2869 }
 0x1c6   :  { %1048 = vadd.xlane.f32.xlu0 %v846_v13  ;;  %v830_v45 = vmul.f32 %v2870_v35, %v3275_v33 }
 0x1c9   :  { %1054 = vadd.xlane.f32.xlu1 %v849_v44  ;;  %v831_v44 = vmul.f32 %v2868_v39, %v3275_v33 }
 0x1ca   :  { %1052 = vadd.xlane.f32.xlu0 %v848_v59  ;;  %v2872_v59 = vpop.eup %2871 }
 0x1cb   :  { %v2874_v19 = vpop.eup %2873 }
 0x1cc   :  { %v832_v55 = vmul.f32 %v2874_v19, %v3275_v33 }
 0x1cd   :  { %1058 = vadd.xlane.f32.xlu1 %v851_v36  ;;  %v5008_v36 = vld [vmem:[#allocation27_spill] sm:$0xff] }
 0x1ce   :  { %1056 = vadd.xlane.f32.xlu0 %v850_v49  ;;  %2885 = vtanh.f32 %v5008_v36  ;;  %v5016_v36 = vld [vmem:[#allocation35_spill] sm:$0xff] }
 0x1cf   :  { %2887 = vtanh.f32 %v5009_v57 }
 0x1d1   :  { %998 = vadd.xlane.f32.xlu1 %v821_v51  ;;  %v833_v51 = vmul.f32 %v2872_v59, %v3275_v33 }
 0x1d2   :  { %996 = vadd.xlane.f32.xlu0 %v820_v8  ;;  %v2876_v8 = vpop.eup %2875 }
 0x1d3   :  { %v2878_v58 = vpop.eup %2877  ;;  %v835_v63 = vmul.f32 %v2876_v8, %v3275_v33 }
 0x1d4   :  { %v2880_v0 = vpop.eup %2879  ;;  %v834_v47 = vmul.f32 %v2878_v58, %v3275_v33  ;;  %v5018_v58 = vld [vmem:[#allocation37_spill] sm:$0xff] }
 0x1d5   :  { %1002 = vadd.xlane.f32.xlu1 %v823_v62  ;;  %v5010_v62 = vld [vmem:[#allocation29_spill] sm:$0xff]  ;;  %v2882_v14 = vpop.eup %2881  ;;  %v853_v20 = vmul.f32 %v2880_v0, %v3275_v33  ;;  %v5019_v0 = vld [vmem:[#allocation38_spill] sm:$0xff] }
 0x1d6   :  { %1000 = vadd.xlane.f32.xlu0 %v822_v5  ;;  %2889 = vtanh.f32 %v5010_v62  ;;  %v852_v22 = vmul.f32 %v2882_v14, %v3275_v33 }
 0x1d9   :  { %1006 = vadd.xlane.f32.xlu1 %v825_v18  ;;  %v5011_v18 = vld [vmem:[#allocation30_spill] sm:$0xff] }
 0x1da   :  { %1004 = vadd.xlane.f32.xlu0 %v824_v1  ;;  %v3752_v29 = vpop.xlane.xlu1 %904  ;;  %2891 = vtanh.f32 %v5011_v18  ;;  %v5012_v1 = vld [vmem:[#allocation31_spill] sm:$0xff] }
 0x1db   :  { %v3754_v11 = vpop.xlane.xlu0 %900  ;;  %2893 = vtanh.f32 %v5012_v1 }
 0x1dc   :  { %2895 = vtanh.f32 %v5013_v50  ;;  %v5021_v50 = vld [vmem:[#allocation39_spill] sm:$0xff] }
 0x1dd   :  { %1010 = vadd.xlane.f32.xlu1 %v827_v16  ;;  %2897 = vtanh.f32 %v5014_v25  ;;  %v5022_v25 = vld [vmem:[#allocation40_spill] sm:$0xff] }
 0x1de   :  { %1008 = vadd.xlane.f32.xlu0 %v826_v6  ;;  %v3760_v9 = vpop.xlane.xlu1 %906  ;;  %v2884_v6 = vpop.eup %2883  ;;  %2899 = vtanh.f32 %v5015_v31 }
 0x1df   :  { %v3762_v42 = vpop.xlane.xlu0 %902  ;;  %2901 = vtanh.f32 %v3469_v4  ;;  %v5017_v4 = vld [vmem:[#allocation36_spill] sm:$0xff] }
 0x1e0   :  { %2903 = vtanh.f32 %v5016_v36  ;;  %v5025_v36 = vld [vmem:[#allocation42_spill] sm:$0xff] }
 0x1e1   :  { %1014 = vadd.xlane.f32.xlu1 %v829_v27  ;;  %v2886_v27 = vpop.eup %2885  ;;  %2905 = vtanh.f32 %v5017_v4 }
 0x1e2   :  { %1012 = vadd.xlane.f32.xlu0 %v828_v12  ;;  %v3768_v13 = vpop.xlane.xlu1 %910  ;;  %v855_v12 = vmul.f32 %v2884_v6, %v3275_v33  ;;  %v2888_v35 = vpop.eup %2887  ;;  %v854_v15 = vmul.f32 %v2886_v27, %v3275_v33  ;;  %2907 = vtanh.f32 %v5018_v58 }
 0x1e3   :  { %v3770_v37 = vpop.xlane.xlu0 %908  ;;  %2909 = vtanh.f32 %v5019_v0 }
 0x1e4   :  { %2911 = vtanh.f32 %v5021_v50 }
 0x1e5   :  { %1018 = vadd.xlane.f32.xlu1 %v831_v44  ;;  %v2890_v44 = vpop.eup %2889  ;;  %2913 = vtanh.f32 %v5022_v25 }
 0x1e6   :  { %1016 = vadd.xlane.f32.xlu0 %v830_v45  ;;  %v3776_v49 = vpop.xlane.xlu1 %914  ;;  %v857_v45 = vmul.f32 %v2888_v35, %v3275_v33 }
 0x1e7   :  { %v3778_v48 = vpop.xlane.xlu0 %912  ;;  %v2892_v19 = vpop.eup %2891 }
 0x1e8   :  { %v2894_v8 = vpop.eup %2893 }
 0x1e9   :  { %1022 = vadd.xlane.f32.xlu1 %v833_v51  ;;  %v3817_v51 = vld [vmem:[%s4941_s6] ss:$0 sm:$0xff] }
 0x1ea   :  { %1020 = vadd.xlane.f32.xlu0 %v832_v55  ;;  %v3784_v60 = vpop.xlane.xlu1 %918  ;;  %v856_v57 = vmul.f32 %v3817_v51, %v2890_v44  ;;  %v859_v33 = vmul.f32 %v3817_v51, %v2892_v19  ;;  %v858_v18 = vmul.f32 %v3817_v51, %v2894_v8 }
 0x1eb   :  { %v3786_v5 = vpop.xlane.xlu0 %916 }
 0x1ed   :  { %1026 = vadd.xlane.f32.xlu1 %v835_v63  ;;  %v2896_v63 = vpop.eup %2895 }
 0x1ee   :  { %1024 = vadd.xlane.f32.xlu0 %v834_v47  ;;  %v3792_v34 = vpop.xlane.xlu1 %922  ;;  %v2898_v47 = vpop.eup %2897 }
 0x1ef   :  { %v3794_v16 = vpop.xlane.xlu0 %920  ;;  %v2900_v6 = vpop.eup %2899 }
 0x1f0   :  { %v2902_v27 = vpop.eup %2901  ;;  %v863_v35 = vmul.f32 %v3817_v51, %v2900_v6  ;;  %v5030_v6 = vld [vmem:[#allocation45_spill] sm:$0xff] }
 0x1f1   :  { %1062 = vadd.xlane.f32.xlu1 %v853_v20  ;;  %v861_v20 = vmul.f32 %v3817_v51, %v2896_v63  ;;  %v2904_v44 = vpop.eup %2903 }
 0x1f2   :  { %1060 = vadd.xlane.f32.xlu0 %v852_v22  ;;  %v3800_v7 = vpop.xlane.xlu1 %926  ;;  %v860_v22 = vmul.f32 %v3817_v51, %v2898_v47  ;;  %v2906_v19 = vpop.eup %2905  ;;  %v865_v8 = vmul.f32 %v3817_v51, %v2904_v44 }
 0x1f3   :  { %v3802_v39 = vpop.xlane.xlu0 %924  ;;  %v2908_v58 = vpop.eup %2907  ;;  %v864_v63 = vmul.f32 %v3817_v51, %v2906_v19 }
 0x1f4   :  { %v2910_v0 = vpop.eup %2909  ;;  %v867_v50 = vmul.f32 %v3817_v51, %v2908_v58 }
 0x1f5   :  { %1066 = vadd.xlane.f32.xlu1 %v855_v12  ;;  %v866_v25 = vmul.f32 %v3817_v51, %v2910_v0 }
 0x1f6   :  { %1064 = vadd.xlane.f32.xlu0 %v854_v15  ;;  %v3808_v53 = vpop.xlane.xlu1 %930  ;;  %v5024_v15 = vld [vmem:[#allocation41_spill] sm:$0xff] }
 0x1f7   :  { %v3810_v59 = vpop.xlane.xlu0 %928  ;;  %2915 = vtanh.f32 %v5024_v15 }
 0x1f8   :  { %2917 = vtanh.f32 %v5025_v36  ;;  %v5033_v36 = vld [vmem:[#allocation47_spill] sm:$0xff] }
 0x1f9   :  { %1070 = vadd.xlane.f32.xlu1 %v857_v45  ;;  %v862_v45 = vmul.f32 %v3817_v51, %v2902_v27  ;;  %v5031_v27 = vld [vmem:[#allocation46_spill] sm:$0xff] }
 0x1fa   :  { %1068 = vadd.xlane.f32.xlu0 %v856_v57  ;;  %v3821_v55 = vpop.xlane.xlu1 %934 }
 0x1fb   :  { %v3823_v62 = vpop.xlane.xlu0 %932 }
 0x1fd   :  { %1074 = vadd.xlane.f32.xlu1 %v859_v33  ;;  %v5027_v33 = vld [vmem:[#allocation43_spill] sm:$0xff] }
 0x1fe   :  { %1072 = vadd.xlane.f32.xlu0 %v858_v18  ;;  %v3829_v1 = vpop.xlane.xlu1 %938  ;;  %2919 = vtanh.f32 %v5027_v33  ;;  %v5028_v18 = vld [vmem:[#allocation44_spill] sm:$0xff] }
 0x1ff   :  { %5020 = vst [vmem:[#allocation19_spill] sm:$0xff] %v3829_v1  ;;  %v3831_v14 = vpop.xlane.xlu0 %936  ;;  %2921 = vtanh.f32 %v5028_v18  ;;  %v5034_v33 = vld [vmem:[#allocation48_spill] sm:$0xff] }
 0x200   :  { %2923 = vtanh.f32 %v5030_v6 }
 0x201   :  { %1078 = vadd.xlane.f32.xlu1 %v861_v20  ;;  %2925 = vtanh.f32 %v5031_v27 }
 0x202   :  { %1076 = vadd.xlane.f32.xlu0 %v860_v22  ;;  %v3837_v12 = vpop.xlane.xlu1 %942  ;;  %v2912_v22 = vpop.eup %2911  ;;  %2927 = vtanh.f32 %v5033_v36  ;;  %v5038_v36 = vld [vmem:[#allocation50_spill] sm:$0xff] }
 0x203   :  { %5023 = vst [vmem:[#allocation20_spill] sm:$0xff] %v3837_v12  ;;  %v3839_v31 = vpop.xlane.xlu0 %940  ;;  %2929 = vtanh.f32 %v5034_v33  ;;  %v5039_v33 = vld [vmem:[#allocation51_spill] sm:$0xff] }
 0x205   :  { %1082 = vadd.xlane.f32.xlu1 %v863_v35  ;;  %v2914_v35 = vpop.eup %2913 }
 0x206   :  { %1080 = vadd.xlane.f32.xlu0 %v862_v45  ;;  %v3845_v57 = vpop.xlane.xlu1 %946  ;;  %v869_v45 = vmul.f32 %v3817_v51, %v2912_v22  ;;  %v2916_v19 = vpop.eup %2915 }
 0x207   :  { %5026 = vst [vmem:[#allocation21_spill] sm:$0xff] %v3845_v57  ;;  %v3847_v4 = vpop.xlane.xlu0 %944  ;;  %v2918_v58 = vpop.eup %2917  ;;  %v871_v0 = vmul.f32 %v3817_v51, %v2916_v19 }
 0x208   :  { %v870_v22 = vmul.f32 %v3817_v51, %v2918_v58 }
 0x209   :  { %1086 = vadd.xlane.f32.xlu1 %v865_v8  ;;  %v868_v8 = vmul.f32 %v3817_v51, %v2914_v35 }
 0x20a   :  { %1084 = vadd.xlane.f32.xlu0 %v864_v63  ;;  %v3853_v47 = vpop.xlane.xlu1 %950 }
 0x20b   :  { %5029 = vst [vmem:[#allocation22_spill] sm:$0xff] %v3853_v47  ;;  %v3855_v20 = vpop.xlane.xlu0 %948  ;;  %v2920_v6 = vpop.eup %2919 }
 0x20d   :  { %1090 = vadd.xlane.f32.xlu1 %v867_v50  ;;  %v5036_v50 = vld [vmem:[#allocation49_spill] sm:$0xff] }
 0x20e   :  { %1088 = vadd.xlane.f32.xlu0 %v866_v25  ;;  %v3861_v15 = vpop.xlane.xlu1 %954  ;;  %2931 = vtanh.f32 %v5036_v50  ;;  %v2922_v25 = vpop.eup %2921 }
 0x20f   :  { %5032 = vst [vmem:[#allocation23_spill] sm:$0xff] %v3861_v15  ;;  %v3863_v44 = vpop.xlane.xlu0 %952  ;;  %2933 = vtanh.f32 %v3532_v10  ;;  %v872_v19 = vmul.f32 %v3817_v51, %v2922_v25 }
 0x210   :  { %2935 = vtanh.f32 %v5038_v36  ;;  %v5042_v36 = vld [vmem:[#allocation53_spill] sm:$0xff] }
 0x211   :  { %1094 = vadd.xlane.f32.xlu1 %v869_v45  ;;  %v873_v45 = vmul.f32 %v3817_v51, %v2920_v6  ;;  %2937 = vtanh.f32 %v5039_v33  ;;  %v5044_v33 = vld [vmem:[#allocation54_spill] sm:$0xff] }
 0x212   :  { %1092 = vadd.xlane.f32.xlu0 %v868_v8  ;;  %v3869_v63 = vpop.xlane.xlu1 %958  ;;  %v2924_v8 = vpop.eup %2923 }
 0x213   :  { %5035 = vst [vmem:[#allocation24_spill] sm:$0xff] %v3869_v63  ;;  %v3871_v18 = vpop.xlane.xlu0 %956  ;;  %v2926_v50 = vpop.eup %2925 }
 0x214   :  { %v874_v6 = vmul.f32 %v3817_v51, %v2926_v50 }
 0x215   :  { %1098 = vadd.xlane.f32.xlu1 %v871_v0  ;;  %v875_v0 = vmul.f32 %v3817_v51, %v2924_v8 }
 0x216   :  { %1096 = vadd.xlane.f32.xlu0 %v870_v22  ;;  %v3877_v27 = vpop.xlane.xlu1 %962  ;;  %v5041_v22 = vld [vmem:[#allocation52_spill] sm:$0xff] }
 0x217   :  { %5037 = vst [vmem:[#allocation25_spill] sm:$0xff] %v3877_v27  ;;  %v3879_v35 = vpop.xlane.xlu0 %960  ;;  %2939 = vtanh.f32 %v5041_v22  ;;  %v2928_v27 = vpop.eup %2927  ;;  %v5045_v22 = vld [vmem:[#allocation55_spill] sm:$0xff] }
 0x218   :  { %2941 = vtanh.f32 %v5042_v36  ;;  %v2930_v63 = vpop.eup %2929  ;;  %v5047_v36 = vld [vmem:[#allocation56_spill] sm:$0xff] }
 0x219   :  { %1102 = vadd.xlane.f32.xlu1 %v873_v45  ;;  %2943 = vtanh.f32 %v5044_v33  ;;  %v876_v8 = vmul.f32 %v3817_v51, %v2930_v63 }
 0x21a   :  { %1100 = vadd.xlane.f32.xlu0 %v872_v19  ;;  %v3885_v10 = vpop.xlane.xlu1 %966  ;;  %v877_v19 = vmul.f32 %v3817_v51, %v2928_v27  ;;  %2945 = vtanh.f32 %v5045_v22  ;;  %v5049_v22 = vld [vmem:[#allocation57_spill] sm:$0xff] }
 0x21b   :  { %5040 = vst [vmem:[#allocation26_spill] sm:$0xff] %v3885_v10  ;;  %v3887_v58 = vpop.xlane.xlu0 %964  ;;  %v2932_v10 = vpop.eup %2931  ;;  %2947 = vtanh.f32 %v5047_v36 }
 0x21c   :  { %v2934_v15 = vpop.eup %2933  ;;  %2949 = vtanh.f32 %v3564_v46 }
 0x21d   :  { %1106 = vadd.xlane.f32.xlu1 %v875_v0  ;;  %v878_v27 = vmul.f32 %v3817_v51, %v2934_v15  ;;  %2951 = vtanh.f32 %v5049_v22  ;;  %v5052_v22 = vld [vmem:[#allocation59_spill] sm:$0xff] }
 0x21e   :  { %1104 = vadd.xlane.f32.xlu0 %v874_v6  ;;  %v3893_v25 = vpop.xlane.xlu1 %970  ;;  %v879_v6 = vmul.f32 %v3817_v51, %v2932_v10  ;;  %2953 = vtanh.f32 %v3571_v40 }
 0x21f   :  { %5043 = vst [vmem:[#allocation27_spill] sm:$0xff] %v3893_v25  ;;  %v3895_v45 = vpop.xlane.xlu0 %968  ;;  %v2936_v25 = vpop.eup %2935 }
 0x220   :  { %v2938_v33 = vpop.eup %2937 }
 0x221   :  { %1110 = vadd.xlane.f32.xlu1 %v877_v19  ;;  %v880_v10 = vmul.f32 %v3817_v51, %v2938_v33 }
 0x222   :  { %1108 = vadd.xlane.f32.xlu0 %v876_v8  ;;  %v3901_v50 = vpop.xlane.xlu1 %974  ;;  %v881_v8 = vmul.f32 %v3817_v51, %v2936_v25 }
 0x223   :  { %5046 = vst [vmem:[#allocation28_spill] sm:$0xff] %v3901_v50  ;;  %v3903_v0 = vpop.xlane.xlu0 %972 }
 0x224   :  { %v2940_v50 = vpop.eup %2939 }
 0x225   :  { %1114 = vadd.xlane.f32.xlu1 %v879_v6  ;;  %v2942_v36 = vpop.eup %2941  ;;  %v883_v6 = vmul.f32 %v3817_v51, %v2940_v50 }
 0x226   :  { %1112 = vadd.xlane.f32.xlu0 %v878_v27  ;;  %v3909_v63 = vpop.xlane.xlu1 %978  ;;  %v5051_v27 = vld [vmem:[#allocation58_spill] sm:$0xff]  ;;  %v882_v25 = vmul.f32 %v3817_v51, %v2942_v36 }
 0x227   :  { %5048 = vst [vmem:[#allocation29_spill] sm:$0xff] %v3909_v63  ;;  %v3911_v19 = vpop.xlane.xlu0 %976  ;;  %2955 = vtanh.f32 %v5051_v27  ;;  %v2944_v63 = vpop.eup %2943  ;;  %v5055_v27 = vld [vmem:[#allocation61_spill] sm:$0xff] }
 0x228   :  { %2957 = vtanh.f32 %v5052_v22  ;;  %v2946_v47 = vpop.eup %2945  ;;  %v5057_v22 = vld [vmem:[#allocation62_spill] sm:$0xff] }
 0x229   :  { %1118 = vadd.xlane.f32.xlu1 %v881_v8  ;;  %v885_v8 = vmul.f32 %v3817_v51, %v2944_v63  ;;  %v884_v50 = vmul.f32 %v3817_v51, %v2946_v47 }
 0x22a   :  { %1116 = vadd.xlane.f32.xlu0 %v880_v10  ;;  %v3917_v46 = vpop.xlane.xlu1 %982  ;;  %v5054_v10 = vld [vmem:[#allocation60_spill] sm:$0xff] }
 0x22b   :  { %5050 = vst [vmem:[#allocation30_spill] sm:$0xff] %v3917_v46  ;;  %v3919_v15 = vpop.xlane.xlu0 %980  ;;  %2959 = vtanh.f32 %v5054_v10  ;;  %v2948_v46 = vpop.eup %2947 }
 0x22c   :  { %2961 = vtanh.f32 %v5055_v27  ;;  %v2950_v57 = vpop.eup %2949  ;;  %v5059_v27 = vld [vmem:[#allocation63_spill] sm:$0xff] }
 0x22d   :  { %1122 = vadd.xlane.f32.xlu1 %v883_v6  ;;  %2963 = vtanh.f32 %v5057_v22  ;;  %v886_v63 = vmul.f32 %v3817_v51, %v2950_v57  ;;  %v5060_v22 = vld [vmem:[#allocation64_spill] sm:$0xff] }
 0x22e   :  { %1120 = vadd.xlane.f32.xlu0 %v882_v25  ;;  %v3925_v40 = vpop.xlane.xlu1 %986  ;;  %v887_v25 = vmul.f32 %v3817_v51, %v2948_v46  ;;  %2965 = vtanh.f32 %v3597_v2 }
 0x22f   :  { %5053 = vst [vmem:[#allocation31_spill] sm:$0xff] %v3925_v40  ;;  %v3927_v33 = vpop.xlane.xlu0 %984  ;;  %v2952_v40 = vpop.eup %2951  ;;  %2967 = vtanh.f32 %v5059_v27 }
 0x230   :  { %v2954_v10 = vpop.eup %2953  ;;  %2969 = vtanh.f32 %v5060_v22 }
 0x231   :  { %1126 = vadd.xlane.f32.xlu1 %v885_v8  ;;  %v888_v46 = vmul.f32 %v3817_v51, %v2954_v10 }
 0x232   :  { %1124 = vadd.xlane.f32.xlu0 %v884_v50  ;;  %v3933_v36 = vpop.xlane.xlu1 %990  ;;  %v889_v50 = vmul.f32 %v3817_v51, %v2952_v40 }
 0x233   :  { %5056 = vst [vmem:[#allocation32_spill] sm:$0xff] %v3933_v36  ;;  %v3935_v6 = vpop.xlane.xlu0 %988 }
 0x234   :  { %v2956_v36 = vpop.eup %2955 }
 0x235   :  { %1130 = vadd.xlane.f32.xlu1 %v887_v25  ;;  %v2958_v12 = vpop.eup %2957  ;;  %v891_v25 = vmul.f32 %v3817_v51, %v2956_v36 }
 0x236   :  { %1128 = vadd.xlane.f32.xlu0 %v886_v63  ;;  %v3941_v47 = vpop.xlane.xlu1 %994  ;;  %v5062_v63 = vld [vmem:[#allocation65_spill] sm:$0xff]  ;;  %v890_v40 = vmul.f32 %v3817_v51, %v2958_v12 }
 0x237   :  { %5058 = vst [vmem:[#allocation33_spill] sm:$0xff] %v3941_v47  ;;  %v3943_v8 = vpop.xlane.xlu0 %992  ;;  %2971 = vtanh.f32 %v5062_v63 }
 0x238   :  { %v2960_v47 = vpop.eup %2959  ;;  %2973 = vtanh.f32 %v3610_v28 }
 0x239   :  { %1134 = vadd.xlane.f32.xlu1 %v889_v50  ;;  %v2962_v27 = vpop.eup %2961 }
 0x23a   :  { %1132 = vadd.xlane.f32.xlu0 %v888_v46  ;;  %v3949_v2 = vpop.xlane.xlu1 %1030  ;;  %v893_v46 = vmul.f32 %v3817_v51, %v2960_v47  ;;  %v2964_v22 = vpop.eup %2963 }
 0x23b   :  { %5061 = vst [vmem:[#allocation34_spill] sm:$0xff] %v3949_v2  ;;  %v3951_v57 = vpop.xlane.xlu0 %1028  ;;  %v892_v2 = vmul.f32 %v3817_v51, %v2962_v27  ;;  %v2966_v36 = vpop.eup %2965  ;;  %v895_v28 = vmul.f32 %v3817_v51, %v2964_v22 }
 0x23d   :  { %1138 = vadd.xlane.f32.xlu1 %v891_v25  ;;  %v2968_v25 = vpop.eup %2967 }
 0x23e   :  { %1136 = vadd.xlane.f32.xlu0 %v890_v40  ;;  %v3957_v10 = vpop.xlane.xlu1 %1034  ;;  %v894_v40 = vmul.f32 %v3817_v51, %v2966_v36  ;;  %v897_v27 = vmul.f32 %v3817_v51, %v2968_v25 }
 0x23f   :  { %5063 = vst [vmem:[#allocation35_spill] sm:$0xff] %v3957_v10  ;;  %v3959_v50 = vpop.xlane.xlu0 %1032  ;;  %v2970_v10 = vpop.eup %2969 }
 0x241   :  { %1142 = vadd.xlane.f32.xlu1 %v893_v46 }
 0x242   :  { %1140 = vadd.xlane.f32.xlu0 %v892_v2  ;;  %v3963_v63 = vpop.xlane.xlu1 %1038  ;;  %v896_v2 = vmul.f32 %v3817_v51, %v2970_v10 }
 0x243   :  { %5064 = vst [vmem:[#allocation36_spill] sm:$0xff] %v3963_v63  ;;  %v3965_v12 = vpop.xlane.xlu0 %1036 }
 0x244   :  { %5065 = vst [vmem:[#allocation37_spill] sm:$0xff] %v3965_v12  ;;  %v2972_v46 = vpop.eup %2971 }
 0x245   :  { %1146 = vadd.xlane.f32.xlu1 %v895_v28  ;;  %v2974_v63 = vpop.eup %2973  ;;  %v899_v22 = vmul.f32 %v3817_v51, %v2972_v46 }
 0x246   :  { %1144 = vadd.xlane.f32.xlu0 %v894_v40  ;;  %v3969_v1 = vpop.xlane.xlu1 %1042  ;;  %v898_v36 = vmul.f32 %v3817_v51, %v2974_v63  ;;  %v2980_v51 = vld [vmem:[%s4942_s7] ss:$0 sm:$0xff]  ;;  %s3121_s7 = smov [#allocation10]  }
 0x247   :  { %5066 = vst [vmem:[#allocation38_spill] sm:$0xff] %v3969_v1  ;;  %v3971_v47 = vpop.xlane.xlu0 %1040  ;;  %s2588_s17 = sshll.u32 %s3121_s7, 4  ;;  %s2589_s17 = int_to_ptr.vmem [resolvable:$true] %s2588_s17 }
 0x248   :  { %s3061_s18 = scalar_lea.vmem %s2589_s17, 128  ;;  %p3066_p7 = scmp.lt.s32.totalorder %s2589_s17, %s2589_s17 }
 0x249   :  { %1150 = vadd.xlane.f32.xlu1 %v897_v27  ;;  %p3062_p6 = scmp.ne.s32.totalorder %s2589_s17, %s3061_s18  ;;  %p3067_p8 = scmp.lt.s32.totalorder %s3061_s18, %s3061_s18 }
 0x24a   :  { %1148 = vadd.xlane.f32.xlu0 %v896_v2  ;;  %v3975_v12 = vpop.xlane.xlu1 %1046 }
 0x24b   :  { %v3979_v28 = vpop.xlane.xlu0 %1044  ;;  %p3068_p9 = por %p3067_p8, %p3066_p7 }
 0x24d   :  { %1154 = vadd.xlane.f32.xlu1 %v899_v22  ;;  %v1242_v22 = vadd.f32 %v3676_v23, %v3762_v42  ;;  %v1245_v42 = vadd.f32 %v3693_v30, %v3770_v37  ;;  %v1249_v37 = vadd.f32 %v3713_v56, %v3786_v5  ;;  %p3069_p10 = pnand %p3068_p9, %p3062_p6 }
 0x24e   :  { %1152 = vadd.xlane.f32.xlu0 %v898_v36  ;;  %v3981_v40 = vpop.xlane.xlu1 %1050  ;;  %v1241_v36 = vadd.f32 %v3684_v26, %v3754_v11  ;;  %v1246_v11 = vadd.f32 %v3706_v3, %v3768_v13 }
 0x24f   :  { %5067 = vst [vmem:[#allocation39_spill] sm:$0xff] %v3981_v40  ;;  %v3985_v25 = vpop.xlane.xlu0 %1048 }
 0x252   :  { %v3983_v1 = vpop.xlane.xlu1 %1054 }
 0x253   :  { %5068 = vst [vmem:[#allocation40_spill] sm:$0xff] %v3983_v1  ;;  %v3989_v27 = vpop.xlane.xlu0 %1052  ;;  %v1243_v1 = vadd.f32 %v3686_v41, %v3752_v29 }
 0x254   :  { %5070 = vst [vmem:[#allocation42_spill] sm:$0xff] %v3989_v27 }
 0x256   :  { %v3987_v10 = vpop.xlane.xlu1 %1058 }
 0x257   :  { %5069 = vst [vmem:[#allocation41_spill] sm:$0xff] %v3987_v10  ;;  %v3998_v46 = vpop.xlane.xlu0 %1056 }
 0x25a   :  { %v3991_v2 = vpop.xlane.xlu1 %998 }
 0x25b   :  { %v4008_v27 = vpop.xlane.xlu0 %996 }
 0x25e   :  { %1223 = vbcast.lane.b32.xlu1 %v2980_v51, 376  ;;  %v3996_v63 = vpop.xlane.xlu1 %1002  ;;  %v1244_v51 = vadd.f32 %v3696_v32, %v3760_v9  ;;  %v1248_v9 = vadd.f32 %v3716_v52, %v3776_v49  ;;  %v1252_v49 = vadd.f32 %v3736_v21, %v3792_v34 }
 0x25f   :  { %v4020_v29 = vpop.xlane.xlu0 %1000 }
 0x262   :  { %v4004_v10 = vpop.xlane.xlu1 %1006  ;;  %1502 = vperm.xlu1 %2718, %v1242_v22  }
 0x263   :  { %v4030_v13 = vpop.xlane.xlu0 %1004 }
 0x264   :  { %1499 = vperm.xlu0 %2717, %v1241_v36   ;;  %v1247_v36 = vadd.f32 %v3704_v38, %v3778_v48  ;;  %v1251_v48 = vadd.f32 %v3724_v17, %v3794_v16  ;;  %v1255_v16 = vadd.f32 %v3744_v61, %v3810_v59  ;;  %v1261_v59 = vadd.f32 %v3693_v30, %v3839_v31 }
 0x265   :  { %v1267_v31 = vadd.f32 %v3724_v17, %v3863_v44  ;;  %v1273_v44 = vadd.f32 %v3684_v26, %v3887_v58  ;;  %v1279_v58 = vadd.f32 %v3704_v38, %v3911_v19  ;;  %v1285_v19 = vadd.f32 %v3733_v54, %v3935_v6 }
 0x266   :  { %v4012_v40 = vpop.xlane.xlu1 %1010  ;;  %1505 = vperm.xlu1 %2718, %v1243_v1   ;;  %v1307_v6 = vadd.f32 %v3686_v41, %v3959_v50  ;;  %v1293_v50 = vadd.f32 %v3693_v30, %v4030_v13 }
 0x267   :  { %v4042_v5 = vpop.xlane.xlu0 %1008 }
 0x268   :  { %1508 = vperm.xlu0 %2717, %v1244_v51   ;;  %v1250_v51 = vadd.f32 %v3726_v43, %v3784_v60  ;;  %v1254_v60 = vadd.f32 %v3746_v24, %v3800_v7  ;;  %v1259_v7 = vadd.f32 %v3686_v41, %v3831_v14  ;;  %v1265_v14 = vadd.f32 %v3713_v56, %v3855_v20 }
 0x269   :  { %v1271_v20 = vadd.f32 %v3744_v61, %v3879_v35  ;;  %v1277_v35 = vadd.f32 %v3693_v30, %v3903_v0  ;;  %v1283_v0 = vadd.f32 %v3724_v17, %v3927_v33  ;;  %v1305_v33 = vadd.f32 %v3684_v26, %v3951_v57 }
 0x26a   :  { %v4018_v22 = vpop.xlane.xlu1 %1014  ;;  %1511 = vperm.xlu1 %2718, %v1245_v42   ;;  %v1291_v57 = vadd.f32 %v3686_v41, %v4020_v29 }
 0x26b   :  { %v4052_v34 = vpop.xlane.xlu0 %1012 }
 0x26c   :  { %1514 = vperm.xlu0 %2717, %v1246_v11   ;;  %v1297_v29 = vadd.f32 %v3713_v56, %v4052_v34 }
 0x26e   :  { %v4026_v1 = vpop.xlane.xlu1 %1018  ;;  %1517 = vperm.xlu1 %2718, %v1247_v36   ;;  %v1253_v36 = vadd.f32 %v3733_v54, %v3802_v39 }
 0x270   :  { %1520 = vperm.xlu0 %2717, %v1248_v9  }
 0x272   :  { %v4034_v42 = vpop.xlane.xlu1 %1022  ;;  %1523 = vperm.xlu1 %2718, %v1249_v37  }
 0x274   :  { %1526 = vperm.xlu0 %2717, %v1250_v51   ;;  %v1257_v51 = vadd.f32 %v3684_v26, %v3823_v62  ;;  %v1263_v62 = vadd.f32 %v3704_v38, %v3847_v4  ;;  %v1269_v4 = vadd.f32 %v3733_v54, %v3871_v18  ;;  %v1275_v18 = vadd.f32 %v3686_v41, %v3895_v45 }
 0x275   :  { %v1281_v45 = vadd.f32 %v3713_v56, %v3919_v15  ;;  %v1287_v15 = vadd.f32 %v3744_v61, %v3943_v8  ;;  %v1289_v8 = vadd.f32 %v3684_v26, %v4008_v27  ;;  %v1295_v27 = vadd.f32 %v3704_v38, %v4042_v5 }
 0x276   :  { %v4040_v11 = vpop.xlane.xlu1 %1026  ;;  %1529 = vperm.xlu1 %2718, %v1251_v48   ;;  %v4060_v48 = vpop.xlane.xlu0 %1016 }
 0x278   :  { %1532 = vperm.xlu0 %2717, %v1252_v49  }
 0x27a   :  { %v4048_v9 = vpop.xlane.xlu1 %1062  ;;  %1535 = vperm.xlu1 %2718, %v1253_v36   ;;  %v4068_v36 = vpop.xlane.xlu0 %1020 }
 0x27b   :  { %v1301_v34 = vadd.f32 %v3733_v54, %v4068_v36  ;;  %v1322_v36 = vadd.f32 %v3676_v23, %v4048_v9 }
 0x27c   :  { %1538 = vperm.xlu0 %2717, %v1254_v60  }
 0x27e   :  { %v4054_v37 = vpop.xlane.xlu1 %1066  ;;  %1541 = vperm.xlu1 %2718, %v1255_v16  }
 0x282   :  { %v4058_v39 = vpop.xlane.xlu1 %1070  ;;  %1547 = vperm.xlu1 %2718, %v1257_v51   ;;  %v4076_v51 = vpop.xlane.xlu0 %1024 }
 0x283   :  { %5071 = vst [vmem:[#allocation43_spill] sm:$0xff] %v4058_v39 }
 0x286   :  { %v4064_v49 = vpop.xlane.xlu1 %1074  ;;  %1553 = vperm.xlu1 %2718, %v1259_v7  }
 0x287   :  { %5072 = vst [vmem:[#allocation44_spill] sm:$0xff] %v4064_v49  ;;  %v4084_v49 = vpop.xlane.xlu0 %1060 }
 0x28a   :  { %v4070_v60 = vpop.xlane.xlu1 %1078  ;;  %1559 = vperm.xlu1 %2718, %v1261_v59  }
 0x28b   :  { %5073 = vst [vmem:[#allocation45_spill] sm:$0xff] %v4070_v60 }
 0x28e   :  { %v4074_v16 = vpop.xlane.xlu1 %1082  ;;  %1565 = vperm.xlu1 %2718, %v1263_v62  }
 0x28f   :  { %5074 = vst [vmem:[#allocation46_spill] sm:$0xff] %v4074_v16  ;;  %v4092_v16 = vpop.xlane.xlu0 %1064 }
 0x292   :  { %v4080_v7 = vpop.xlane.xlu1 %1086  ;;  %1571 = vperm.xlu1 %2718, %v1265_v14  }
 0x293   :  { %5075 = vst [vmem:[#allocation47_spill] sm:$0xff] %v4080_v7  ;;  %v4100_v7 = vpop.xlane.xlu0 %1068 }
 0x296   :  { %v4086_v59 = vpop.xlane.xlu1 %1090  ;;  %1577 = vperm.xlu1 %2718, %v1267_v31  }
 0x297   :  { %v4108_v60 = vpop.xlane.xlu0 %1072 }
 0x298   :  { %5076 = vst [vmem:[#allocation48_spill] sm:$0xff] %v4108_v60 }
 0x29a   :  { %v4090_v62 = vpop.xlane.xlu1 %1094  ;;  %1583 = vperm.xlu1 %2718, %v1269_v4  }
 0x29b   :  { %v4116_v39 = vpop.xlane.xlu0 %1076 }
 0x29c   :  { %5077 = vst [vmem:[#allocation49_spill] sm:$0xff] %v4116_v39 }
 0x29e   :  { %v4096_v14 = vpop.xlane.xlu1 %1098  ;;  %1589 = vperm.xlu1 %2718, %v1271_v20  }
 0x29f   :  { %v4124_v60 = vpop.xlane.xlu0 %1080 }
 0x2a0   :  { %5078 = vst [vmem:[#allocation50_spill] sm:$0xff] %v4124_v60 }
 0x2a2   :  { %v4102_v31 = vpop.xlane.xlu1 %1102  ;;  %1595 = vperm.xlu1 %2718, %v1273_v44  }
 0x2a3   :  { %v4132_v39 = vpop.xlane.xlu0 %1084 }
 0x2a4   :  { %5080 = vst [vmem:[#allocation52_spill] sm:$0xff] %v4132_v39 }
 0x2a6   :  { %v4106_v4 = vpop.xlane.xlu1 %1106  ;;  %1601 = vperm.xlu1 %2718, %v1275_v18  }
 0x2a7   :  { %v4140_v60 = vpop.xlane.xlu0 %1088 }
 0x2a8   :  { %5081 = vst [vmem:[#allocation53_spill] sm:$0xff] %v4140_v60 }
 0x2aa   :  { %v4112_v20 = vpop.xlane.xlu1 %1110  ;;  %1607 = vperm.xlu1 %2718, %v1277_v35  }
 0x2ae   :  { %v4118_v44 = vpop.xlane.xlu1 %1114  ;;  %1613 = vperm.xlu1 %2718, %v1279_v58  }
 0x2b2   :  { %v4122_v18 = vpop.xlane.xlu1 %1118  ;;  %1619 = vperm.xlu1 %2718, %v1281_v45  }
 0x2b6   :  { %v4128_v35 = vpop.xlane.xlu1 %1122  ;;  %1625 = vperm.xlu1 %2718, %v1283_v0  }
 0x2b7   :  { %5079 = vst [vmem:[#allocation51_spill] sm:$0xff] %v4128_v35  ;;  %v4148_v35 = vpop.xlane.xlu0 %1092 }
 0x2ba   :  { %v4134_v58 = vpop.xlane.xlu1 %1126  ;;  %1631 = vperm.xlu1 %2718, %v1285_v19  }
 0x2bb   :  { %v4156_v60 = vpop.xlane.xlu0 %1096 }
 0x2be   :  { %v4138_v45 = vpop.xlane.xlu1 %1130  ;;  %1637 = vperm.xlu1 %2718, %v1287_v15  }
 0x2bf   :  { %v4164_v39 = vpop.xlane.xlu0 %1100 }
 0x2c2   :  { %v4144_v0 = vpop.xlane.xlu1 %1134  ;;  %1691 = vperm.xlu1 %2718, %v1305_v33  }
 0x2c6   :  { %v4150_v19 = vpop.xlane.xlu1 %1138  ;;  %1697 = vperm.xlu1 %2718, %v1307_v6  }
 0x2ca   :  { %v4154_v15 = vpop.xlane.xlu1 %1142  ;;  %1643 = vperm.xlu1 %2718, %v1289_v8  }
 0x2cb   :  { %5082 = vst [vmem:[#allocation54_spill] sm:$0xff] %v4154_v15  ;;  %v4172_v15 = vpop.xlane.xlu0 %1104 }
 0x2ce   :  { %v4160_v33 = vpop.xlane.xlu1 %1146  ;;  %1649 = vperm.xlu1 %2718, %v1291_v57  }
 0x2cf   :  { %5083 = vst [vmem:[#allocation55_spill] sm:$0xff] %v4160_v33  ;;  %v4182_v33 = vpop.xlane.xlu0 %1108 }
 0x2d2   :  { %v4166_v6 = vpop.xlane.xlu1 %1150  ;;  %1655 = vperm.xlu1 %2718, %v1293_v50   ;;  %v1299_v50 = vadd.f32 %v3724_v17, %v4060_v48 }
 0x2d3   :  { %v4194_v48 = vpop.xlane.xlu0 %1112 }
 0x2d6   :  { %v4170_v8 = vpop.xlane.xlu1 %1154  ;;  %1661 = vperm.xlu1 %2718, %v1295_v27   ;;  %v1258_v27 = vadd.f32 %v3676_v23, %v3821_v55  ;;  %v5089_v55 = vld [vmem:[#allocation20_spill] sm:$0xff] }
 0x2d7   :  { %5084 = vst [vmem:[#allocation56_spill] sm:$0xff] %v4170_v8 }
 0x2da   :  { %v4176_v57 = vpop.permute.xlu1 %1223  ;;  %1667 = vperm.xlu1 %2718, %v1297_v29  }
 0x2db   :  { %5085 = vst [vmem:[#allocation57_spill] sm:$0xff] %v4176_v57  ;;  %v1256_v13 = vadd.f32 %v4176_v57, %v3808_v53  ;;  %v5088_v53 = vld [vmem:[#allocation19_spill] sm:$0xff] }
 0x2dc   :  { %v1260_v8 = vadd.f32 %v3696_v32, %v5088_v53  ;;  %v5091_v53 = vld [vmem:[#allocation21_spill] sm:$0xff] }
 0x2dd   :  { %1544 = vperm.xlu0 %2717, %v1256_v13   ;;  %v1303_v13 = vadd.f32 %v3744_v61, %v4076_v51  ;;  %v1323_v51 = vadd.f32 %v3686_v41, %v4092_v16  ;;  %v1324_v16 = vadd.f32 %v3696_v32, %v4054_v37 }
 0x2de   :  { %v4184_v5 = vpop.permute.xlu1 %1502  ;;  %1673 = vperm.xlu1 %2718, %v1299_v50  }
 0x2df   :  { %5086 = vst [vmem:[#allocation58_spill] sm:$0xff] %v4184_v5  ;;  %v1262_v5 = vadd.f32 %v3706_v3, %v5089_v55 }
 0x2e1   :  { %1550 = vperm.xlu0 %2717, %v1258_v27   ;;  %v4204_v27 = vpop.xlane.xlu0 %1116 }
 0x2e2   :  { %v4190_v29 = vpop.permute.xlu1 %1505  ;;  %1679 = vperm.xlu1 %2718, %v1301_v34  }
 0x2e3   :  { %5087 = vst [vmem:[#allocation59_spill] sm:$0xff] %v4190_v29  ;;  %v1264_v29 = vadd.f32 %v3716_v52, %v5091_v53  ;;  %v5096_v53 = vld [vmem:[#allocation23_spill] sm:$0xff] }
 0x2e5   :  { %1556 = vperm.xlu0 %2717, %v1260_v8   ;;  %v4216_v9 = vpop.xlane.xlu0 %1120 }
 0x2e6   :  { %v4198_v50 = vpop.permute.xlu1 %1511  ;;  %1685 = vperm.xlu1 %2718, %v1303_v13   ;;  %v5093_v13 = vld [vmem:[#allocation22_spill] sm:$0xff]  ;;  %5094 = vst [vmem:[#allocation62_spill] sm:$0xff] %v4216_v9 }
 0x2e7   :  { %v1266_v55 = vadd.f32 %v3726_v43, %v5093_v13  ;;  %v5098_v13 = vld [vmem:[#allocation24_spill] sm:$0xff] }
 0x2e8   :  { %v1270_v9 = vadd.f32 %v3746_v24, %v5098_v13  ;;  %v5103_v13 = vld [vmem:[#allocation27_spill] sm:$0xff] }
 0x2e9   :  { %1562 = vperm.xlu0 %2717, %v1262_v5   ;;  %v1338_v5 = vadd.f32 %v3676_v23, %v4090_v62 }
 0x2ea   :  { %v4206_v34 = vpop.permute.xlu1 %1517  ;;  %1742 = vperm.xlu1 %2718, %v1322_v36  }
 0x2eb   :  { %5090 = vst [vmem:[#allocation60_spill] sm:$0xff] %v4206_v34  ;;  %v1268_v34 = vadd.f32 %v3736_v21, %v5096_v53 }
 0x2ed   :  { %1568 = vperm.xlu0 %2717, %v1264_v29   ;;  %v1125_v29 = vpop.xlane.xlu0 %1124 }
 0x2ee   :  { %v4212_v8 = vpop.permute.xlu1 %1523  ;;  %1745 = vperm.xlu1 %2718, %v1323_v51   ;;  %v1353_v62 = vadd.f32 %v3684_v26, %v1125_v29  ;;  %v1340_v29 = vadd.f32 %v3696_v32, %v4096_v14  ;;  %v1341_v14 = vadd.f32 %v3693_v30, %v4164_v39 }
 0x2ef   :  { %5092 = vst [vmem:[#allocation61_spill] sm:$0xff] %v4212_v8 }
 0x2f1   :  { %1574 = vperm.xlu0 %2717, %v1266_v55  }
 0x2f2   :  { %v4220_v36 = vpop.permute.xlu1 %1529  ;;  %1790 = vperm.xlu1 %2718, %v1338_v5   ;;  %v5100_v5 = vld [vmem:[#allocation25_spill] sm:$0xff] }
 0x2f3   :  { %5095 = vst [vmem:[#allocation63_spill] sm:$0xff] %v4220_v36  ;;  %v1272_v53 = vadd.f32 %v4176_v57, %v5100_v5  ;;  %v5101_v36 = vld [vmem:[#allocation36_spill] sm:$0xff] }
 0x2f4   :  { %v1310_v37 = vadd.f32 %v3706_v3, %v5101_v36  ;;  %v1311_v36 = vadd.f32 %v3704_v38, %v3971_v47  ;;  %v5106_v47 = vld [vmem:[#allocation38_spill] sm:$0xff] }
 0x2f5   :  { %1580 = vperm.xlu0 %2717, %v1268_v34  }
 0x2f6   :  { %v4226_v51 = vpop.permute.xlu1 %1535  ;;  %1748 = vperm.xlu1 %2718, %v1324_v16   ;;  %v5102_v16 = vld [vmem:[#allocation26_spill] sm:$0xff] }
 0x2f7   :  { %5097 = vst [vmem:[#allocation64_spill] sm:$0xff] %v4226_v51  ;;  %v1274_v51 = vadd.f32 %v3676_v23, %v5102_v16 }
 0x2f9   :  { %1586 = vperm.xlu0 %2717, %v1270_v9  }
 0x2fa   :  { %v4231_v55 = vpop.permute.xlu1 %1541  ;;  %1835 = vperm.xlu1 %2718, %v1353_v62   ;;  %v1276_v62 = vadd.f32 %v3696_v32, %v5103_v13 }
 0x2fb   :  { %5099 = vst [vmem:[#allocation65_spill] sm:$0xff] %v4231_v55 }
 0x2fd   :  { %1592 = vperm.xlu0 %2717, %v1272_v53   ;;  %v5104_v53 = vld [vmem:[#allocation28_spill] sm:$0xff] }
 0x2fe   :  { %v4237_v34 = vpop.permute.xlu1 %1547  ;;  %1706 = vperm.xlu1 %2718, %v1310_v37   ;;  %v1278_v37 = vadd.f32 %v3706_v3, %v5104_v53  ;;  %v5108_v53 = vld [vmem:[#allocation30_spill] sm:$0xff] }
 0x2ff   :  { %v1282_v39 = vadd.f32 %v3726_v43, %v5108_v53  ;;  %v5112_v53 = vld [vmem:[#allocation32_spill] sm:$0xff] }
 0x301   :  { %1598 = vperm.xlu0 %2717, %v1274_v51   ;;  %v4255_v51 = vpop.xlane.xlu0 %1128 }
 0x302   :  { %v4243_v9 = vpop.permute.xlu1 %1553  ;;  %1796 = vperm.xlu1 %2718, %v1340_v29   ;;  %v5105_v29 = vld [vmem:[#allocation29_spill] sm:$0xff] }
 0x303   :  { %v1280_v13 = vadd.f32 %v3716_v52, %v5105_v29  ;;  %v5110_v29 = vld [vmem:[#allocation31_spill] sm:$0xff] }
 0x304   :  { %v1284_v8 = vadd.f32 %v3736_v21, %v5110_v29  ;;  %v5114_v29 = vld [vmem:[#allocation33_spill] sm:$0xff] }
 0x305   :  { %1604 = vperm.xlu0 %2717, %v1276_v62   ;;  %v1312_v62 = vadd.f32 %v3716_v52, %v5106_v47 }
 0x306   :  { %v4249_v5 = vpop.permute.xlu1 %1559  ;;  %1709 = vperm.xlu1 %2718, %v1311_v36   ;;  %v4263_v36 = vpop.xlane.xlu0 %1132 }
 0x309   :  { %1610 = vperm.xlu0 %2717, %v1278_v37   ;;  %v1342_v37 = vadd.f32 %v3706_v3, %v4102_v31  ;;  %v1343_v31 = vadd.f32 %v3704_v38, %v4172_v15  ;;  %v1344_v15 = vadd.f32 %v3716_v52, %v4106_v4  ;;  %v1292_v4 = vadd.f32 %v3696_v32, %v3996_v63 }
 0x30a   :  { %v4257_v16 = vpop.permute.xlu1 %1565  ;;  %1799 = vperm.xlu1 %2718, %v1341_v14   ;;  %v4277_v47 = vpop.xlane.xlu0 %1136  ;;  %v1296_v63 = vadd.f32 %v3716_v52, %v4012_v40  ;;  %v1300_v40 = vadd.f32 %v3736_v21, %v4026_v1  ;;  %v1304_v1 = vadd.f32 %v4176_v57, %v4040_v11  ;;  %v5119_v11 = vld [vmem:[#allocation35_spill] sm:$0xff] }
 0x30d   :  { %1616 = vperm.xlu0 %2717, %v1280_v13   ;;  %v1313_v13 = vadd.f32 %v3713_v56, %v3979_v28  ;;  %v1288_v28 = vadd.f32 %v4176_v57, %v5114_v29  ;;  %v1290_v29 = vadd.f32 %v3676_v23, %v3991_v2  ;;  %v1294_v2 = vadd.f32 %v3706_v3, %v4004_v10 }
 0x30e   :  { %v4265_v55 = vpop.permute.xlu1 %1571  ;;  %1712 = vperm.xlu1 %2718, %v1312_v62   ;;  %v1298_v10 = vadd.f32 %v3726_v43, %v4018_v22  ;;  %v1302_v22 = vadd.f32 %v3746_v24, %v4034_v42  ;;  %v1321_v42 = vadd.f32 %v3684_v26, %v4084_v49  ;;  %v1337_v49 = vadd.f32 %v3684_v26, %v4148_v35 }
 0x30f   :  { %5107 = vst [vmem:[#allocation19_spill] sm:$0xff] %v4265_v55  ;;  %v1286_v55 = vadd.f32 %v3746_v24, %v5112_v53  ;;  %v5115_v53 = vld [vmem:[#allocation34_spill] sm:$0xff]  ;;  %v1339_v26 = vadd.f32 %v3686_v41, %v4156_v60  ;;  %v1325_v60 = vadd.f32 %v3693_v30, %v4100_v7 }
 0x311   :  { %1622 = vperm.xlu0 %2717, %v1282_v39   ;;  %v4285_v39 = vpop.xlane.xlu0 %1140 }
 0x312   :  { %v4271_v14 = vpop.permute.xlu1 %1577  ;;  %1802 = vperm.xlu1 %2718, %v1342_v37  }
 0x313   :  { %5109 = vst [vmem:[#allocation20_spill] sm:$0xff] %v4271_v14 }
 0x315   :  { %1628 = vperm.xlu0 %2717, %v1284_v8   ;;  %v1314_v8 = vadd.f32 %v3726_v43, %v3975_v12  ;;  %v1315_v12 = vadd.f32 %v3724_v17, %v3985_v25  ;;  %v5116_v25 = vld [vmem:[#allocation39_spill] sm:$0xff] }
 0x316   :  { %v4279_v62 = vpop.permute.xlu1 %1583  ;;  %1715 = vperm.xlu1 %2718, %v1313_v13  }
 0x317   :  { %5111 = vst [vmem:[#allocation21_spill] sm:$0xff] %v4279_v62  ;;  %v1306_v62 = vadd.f32 %v3676_v23, %v5115_v53 }
 0x319   :  { %1634 = vperm.xlu0 %2717, %v1286_v55   ;;  %v4299_v55 = vpop.xlane.xlu0 %1144 }
 0x31a   :  { %v4287_v37 = vpop.permute.xlu1 %1589  ;;  %1805 = vperm.xlu1 %2718, %v1343_v31  }
 0x31b   :  { %5113 = vst [vmem:[#allocation22_spill] sm:$0xff] %v4287_v37 }
 0x31d   :  { %1640 = vperm.xlu0 %2717, %v1288_v28   ;;  %v4307_v28 = vpop.xlane.xlu0 %1148 }
 0x31e   :  { %v4293_v13 = vpop.permute.xlu1 %1595  ;;  %1718 = vperm.xlu1 %2718, %v1314_v8  }
 0x321   :  { %1694 = vperm.xlu0 %2717, %v1306_v62   ;;  %v1345_v62 = vadd.f32 %v3713_v56, %v4182_v33  ;;  %v1346_v33 = vadd.f32 %v3726_v43, %v4112_v20  ;;  %v1347_v20 = vadd.f32 %v3724_v17, %v4194_v48  ;;  %v1348_v48 = vadd.f32 %v3736_v21, %v4118_v44 }
 0x322   :  { %v4301_v31 = vpop.permute.xlu1 %1601  ;;  %1808 = vperm.xlu1 %2718, %v1344_v15   ;;  %v1316_v15 = vadd.f32 %v3736_v21, %v5116_v25  ;;  %v5117_v25 = vld [vmem:[#allocation42_spill] sm:$0xff]  ;;  %v1349_v44 = vadd.f32 %v3733_v54, %v4204_v27 }
 0x325   :  { %1646 = vperm.xlu0 %2717, %v1290_v29   ;;  %v4321_v29 = vpop.xlane.xlu0 %1152 }
 0x326   :  { %v4309_v8 = vpop.permute.xlu1 %1607  ;;  %1721 = vperm.xlu1 %2718, %v1315_v12  }
 0x329   :  { %1652 = vperm.xlu0 %2717, %v1292_v4   ;;  %v4329_v4 = vpop.permute.xlu0 %1499 }
 0x32a   :  { %v4315_v53 = vpop.permute.xlu1 %1613  ;;  %1811 = vperm.xlu1 %2718, %v1345_v62  }
 0x32d   :  { %1658 = vperm.xlu0 %2717, %v1294_v2   ;;  %v1317_v2 = vadd.f32 %v3733_v54, %v5117_v25 }
 0x32e   :  { %v4323_v12 = vpop.permute.xlu1 %1619  ;;  %1724 = vperm.xlu1 %2718, %v1316_v15   ;;  %v4337_v15 = vpop.permute.xlu0 %1508 }
 0x331   :  { %1664 = vperm.xlu0 %2717, %v1296_v63  }
 0x332   :  { %v4331_v62 = vpop.permute.xlu1 %1625  ;;  %1814 = vperm.xlu1 %2718, %v1346_v33   ;;  %v5118_v33 = vld [vmem:[#allocation40_spill] sm:$0xff]  ;;  %v4351_v25 = vpop.permute.xlu0 %1514 }
 0x335   :  { %1670 = vperm.xlu0 %2717, %v1298_v10   ;;  %v1318_v10 = vadd.f32 %v3746_v24, %v5118_v33 }
 0x336   :  { %v4339_v37 = vpop.permute.xlu1 %1631  ;;  %1727 = vperm.xlu1 %2718, %v1317_v2  }
 0x339   :  { %1676 = vperm.xlu0 %2717, %v1300_v40   ;;  %v4359_v40 = vpop.permute.xlu0 %1520 }
 0x33a   :  { %v4345_v63 = vpop.permute.xlu1 %1637  ;;  %1817 = vperm.xlu1 %2718, %v1347_v20  }
 0x33d   :  { %1682 = vperm.xlu0 %2717, %v1302_v22   ;;  %v1319_v22 = vadd.f32 %v3744_v61, %v3998_v46  ;;  %v5120_v46 = vld [vmem:[#allocation41_spill] sm:$0xff] }
 0x33e   :  { %v4353_v2 = vpop.permute.xlu1 %1691  ;;  %1730 = vperm.xlu1 %2718, %v1318_v10   ;;  %v1308_v10 = vadd.f32 %v3696_v32, %v5119_v11  ;;  %v5121_v11 = vld [vmem:[#allocation37_spill] sm:$0xff] }
 0x33f   :  { %v1309_v27 = vadd.f32 %v3693_v30, %v5121_v11 }
 0x341   :  { %1688 = vperm.xlu0 %2717, %v1304_v1   ;;  %v4373_v1 = vpop.permute.xlu0 %1526 }
 0x342   :  { %v4361_v20 = vpop.permute.xlu1 %1697  ;;  %1820 = vperm.xlu1 %2718, %v1348_v48  }
 0x345   :  { %1739 = vperm.xlu0 %2717, %v1321_v42   ;;  %v1320_v42 = vadd.f32 %v4176_v57, %v5120_v46 }
 0x346   :  { %v4367_v33 = vpop.permute.xlu1 %1643  ;;  %1733 = vperm.xlu1 %2718, %v1319_v22   ;;  %v4381_v22 = vpop.permute.xlu0 %1532 }
 0x349   :  { %1700 = vperm.xlu0 %2717, %v1308_v10   ;;  %v1350_v10 = vadd.f32 %v3746_v24, %v4122_v18  ;;  %v1366_v18 = vadd.f32 %v3746_v24, %v4166_v6 }
 0x34a   :  { %v4375_v48 = vpop.permute.xlu1 %1649  ;;  %1823 = vperm.xlu1 %2718, %v1349_v44   ;;  %v4393_v35 = vpop.permute.xlu0 %1538 }
 0x34b   :  { %5122 = vst [vmem:[#allocation23_spill] sm:$0xff] %v4393_v35 }
 0x34d   :  { %1787 = vperm.xlu0 %2717, %v1337_v49   ;;  %v1336_v49 = vadd.f32 %v4176_v57, %v4086_v59  ;;  %v1367_v59 = vadd.f32 %v3744_v61, %v4321_v29 }
 0x34e   :  { %v4383_v14 = vpop.permute.xlu1 %1655  ;;  %1736 = vperm.xlu1 %2718, %v1320_v42   ;;  %v1354_v42 = vadd.f32 %v3676_v23, %v4134_v58  ;;  %v1355_v23 = vadd.f32 %v3686_v41, %v4255_v51  ;;  %v5129_v51 = vld [vmem:[#allocation48_spill] sm:$0xff] }
 0x351   :  { %1703 = vperm.xlu0 %2717, %v1309_v27  }
 0x352   :  { %v4389_v44 = vpop.permute.xlu1 %1661  ;;  %1826 = vperm.xlu1 %2718, %v1350_v10  }
 0x355   :  { %1793 = vperm.xlu0 %2717, %v1339_v26  }
 0x356   :  { %v4397_v46 = vpop.permute.xlu1 %1667  ;;  %1784 = vperm.xlu1 %2718, %v1336_v49   ;;  %v5126_v49 = vld [vmem:[#allocation43_spill] sm:$0xff] }
 0x357   :  { %v1326_v7 = vadd.f32 %v3706_v3, %v5126_v49 }
 0x358   :  { %v4403_v11 = vpop.permute.xlu0 %1544 }
 0x359   :  { %5123 = vst [vmem:[#allocation24_spill] sm:$0xff] %v4403_v11  ;;  %1838 = vperm.xlu0 %2717, %v1354_v42   ;;  %v5139_v11 = vld [vmem:[#allocation18_spill] sm:$0xff] }
 0x35a   :  { %v4405_v27 = vpop.permute.xlu1 %1673  ;;  %1874 = vperm.xlu1 %2718, %v1366_v18   ;;  %v1356_v18 = vadd.f32 %v3696_v32, %v4138_v45  ;;  %v5132_v45 = vld [vmem:[#allocation44_spill] sm:$0xff] }
 0x35c   :  { %v4411_v10 = vpop.permute.xlu0 %1550 }
 0x35d   :  { %1751 = vperm.xlu0 %2717, %v1325_v60  }
 0x35e   :  { %v4413_v26 = vpop.permute.xlu1 %1679  ;;  %1877 = vperm.xlu1 %2718, %v1367_v59   ;;  %v1327_v59 = vadd.f32 %v3704_v38, %v5129_v51 }
 0x35f   :  { %5124 = vst [vmem:[#allocation25_spill] sm:$0xff] %v4413_v26 }
 0x360   :  { %v4417_v58 = vpop.permute.xlu0 %1556 }
 0x361   :  { %1841 = vperm.xlu0 %2717, %v1355_v23  }
 0x362   :  { %v4419_v6 = vpop.permute.xlu1 %1685 }
 0x363   :  { %5125 = vst [vmem:[#allocation36_spill] sm:$0xff] %v4419_v6 }
 0x364   :  { %v4423_v42 = vpop.permute.xlu0 %1562 }
 0x365   :  { %1754 = vperm.xlu0 %2717, %v1326_v7   ;;  %v1357_v7 = vadd.f32 %v3693_v30, %v4263_v36 }
 0x366   :  { %v4425_v29 = vpop.permute.xlu1 %1742 }
 0x367   :  { %5127 = vst [vmem:[#allocation26_spill] sm:$0xff] %v4425_v29 }
 0x368   :  { %v4429_v60 = vpop.permute.xlu0 %1568 }
 0x369   :  { %1844 = vperm.xlu0 %2717, %v1356_v18   ;;  %v1328_v18 = vadd.f32 %v3716_v52, %v5132_v45  ;;  %v5138_v45 = vld [vmem:[#allocation49_spill] sm:$0xff] }
 0x36a   :  { %v4431_v41 = vpop.permute.xlu1 %1745 }
 0x36b   :  { %5128 = vst [vmem:[#allocation27_spill] sm:$0xff] %v4431_v41  ;;  %v5133_v41 = vlaneseq }
 0x36c   :  { %v4435_v23 = vpop.permute.xlu0 %1574 }
 0x36d   :  { %1757 = vperm.xlu0 %2717, %v1327_v59   ;;  %v4448_v6 = vand.u32 127, %v5133_v41  ;;  %v1329_v41 = vadd.f32 %v3713_v56, %v5138_v45 }
 0x36e   :  { %v4437_v49 = vpop.permute.xlu1 %1790 }
 0x36f   :  { %5130 = vst [vmem:[#allocation28_spill] sm:$0xff] %v4437_v49  ;;  %v1358_v49 = vadd.f32 %v3706_v3, %v4144_v0  ;;  %v1888_v30 = vadd.s32 4294967288, %v4448_v6  ;;  %v1895_v36 = vadd.s32 4294967280, %v4448_v6  ;;  %v1902_v3 = vadd.s32 4294967272, %v4448_v6 }
 0x370   :  { %v4441_v29 = vpop.permute.xlu0 %1580  ;;  %v1916_v26 = vadd.s32 4294967256, %v4448_v6 }
 0x371   :  { %1847 = vperm.xlu0 %2717, %v1357_v7   ;;  %v4465_v35 = vsub.s32 %v1888_v30, %v5139_v11  ;;  %v4473_v0 = vsub.s32 %v1895_v36, %v5139_v11  ;;  %v1359_v36 = vadd.f32 %v3704_v38, %v4277_v47  ;;  %v4486_v57 = vsub.s32 %v1902_v3, %v5139_v11  ;;  %v5142_v3 = vld [vmem:[#allocation45_spill] sm:$0xff] }
 0x372   :  { %v4443_v32 = vpop.permute.xlu1 %1748 }
 0x373   :  { %5131 = vst [vmem:[#allocation29_spill] sm:$0xff] %v4443_v32  ;;  %v2084_v30 = vrot.slane %v4301_v31, %v4473_v0 }
 0x374   :  { %v4450_v51 = vpop.permute.xlu0 %1586 }
 0x375   :  { %5134 = vst [vmem:[#allocation38_spill] sm:$0xff] %v4450_v51  ;;  %1760 = vperm.xlu0 %2717, %v1328_v18   ;;  %v4469_v18 = vsub.s32 %v4448_v6, %v5139_v11 }
 0x376   :  { %v4452_v59 = vpop.permute.xlu1 %1835 }
 0x377   :  { %5135 = vst [vmem:[#allocation30_spill] sm:$0xff] %v4452_v59  ;;  %v1909_v59 = vadd.s32 4294967264, %v4448_v6 }
 0x378   :  { %v4458_v7 = vpop.permute.xlu0 %1592 }
 0x379   :  { %5136 = vst [vmem:[#allocation31_spill] sm:$0xff] %v4458_v7  ;;  %1850 = vperm.xlu0 %2717, %v1358_v49  }
 0x37a   :  { %v4460_v32 = vpop.permute.xlu1 %1706 }
 0x37b   :  { %5137 = vst [vmem:[#allocation32_spill] sm:$0xff] %v4460_v32  ;;  %v2075_v32 = vrot.slane %v4293_v13, %v4469_v18 }
 0x37c   :  { %v1599_v49 = vpop.permute.xlu0 %1598 }
 0x37d   :  { %v2079_v45 = vrot.slane %v1599_v49, %v4465_v35  ;;  %1763 = vperm.xlu0 %2717, %v1329_v41   ;;  %v4491_v49 = vsub.s32 %v1909_v59, %v5139_v11  ;;  %v1923_v41 = vadd.s32 4294967248, %v4448_v6  ;;  %v4503_v59 = vsub.s32 %v1916_v26, %v5139_v11 }
 0x37e   :  { %v4481_v7 = vpop.permute.xlu1 %1796 }
 0x37f   :  { %5140 = vst [vmem:[#allocation33_spill] sm:$0xff] %v4481_v7  ;;  %v2080_v13 = vsel %vm1893_vm0, %v2079_v45, %v2075_v32  ;;  %v2094_v38 = vrot.slane %v4309_v8, %v4491_v49  ;;  %v1330_v32 = vadd.f32 %v3726_v43, %v5142_v3  ;;  %v1930_v45 = vadd.s32 4294967240, %v4448_v6 }
 0x380   :  { %v2085_v51 = vsel %vm1900_vm1, %v2084_v30, %v2080_v13  ;;  %v1605_v31 = vpop.permute.xlu0 %1604  ;;  %v4508_v13 = vsub.s32 %v1923_v41, %v5139_v11  ;;  %v1944_v41 = vadd.s32 4294967224, %v4448_v6 }
 0x381   :  { %v2089_v7 = vrot.slane %v1605_v31, %v4486_v57  ;;  %1853 = vperm.xlu0 %2717, %v1359_v36   ;;  %v1937_v36 = vadd.s32 4294967232, %v4448_v6 }
 0x382   :  { %v4498_v47 = vpop.permute.xlu1 %1709  ;;  %v2104_v26 = vrot.slane %v4315_v53, %v4508_v13 }
 0x383   :  { %5141 = vst [vmem:[#allocation34_spill] sm:$0xff] %v4498_v47  ;;  %v2090_v30 = vsel %vm1907_vm2, %v2089_v7, %v2085_v51  ;;  %v1360_v51 = vadd.f32 %v3716_v52, %v4150_v19  ;;  %v4520_v7 = vsub.s32 %v1930_v45, %v5139_v11  ;;  %v5145_v45 = vld [vmem:[#allocation50_spill] sm:$0xff] }
 0x384   :  { %v2095_v31 = vsel %vm1914_vm3, %v2094_v38, %v2090_v30  ;;  %v1611_v8 = vpop.permute.xlu0 %1610  ;;  %v4525_v30 = vsub.s32 %v1937_v36, %v5139_v11  ;;  %v4537_v36 = vsub.s32 %v1944_v41, %v5139_v11 }
 0x385   :  { %v2099_v47 = vrot.slane %v1611_v8, %v4503_v59  ;;  %1766 = vperm.xlu0 %2717, %v1330_v32   ;;  %v1951_v32 = vadd.s32 4294967216, %v4448_v6 }
 0x386   :  { %v4515_v3 = vpop.permute.xlu1 %1799  ;;  %v2114_v52 = vrot.slane %v4323_v12, %v4525_v30 }
 0x387   :  { %5143 = vst [vmem:[#allocation39_spill] sm:$0xff] %v4515_v3  ;;  %v2100_v38 = vsel %vm1921_vm4, %v2099_v47, %v2095_v31  ;;  %v1331_v47 = vadd.f32 %v3724_v17, %v5145_v45  ;;  %v1958_v31 = vadd.s32 4294967208, %v4448_v6 }
 0x388   :  { %v2105_v8 = vsel %vm1928_vm5, %v2104_v26, %v2100_v38  ;;  %v1617_v53 = vpop.permute.xlu0 %1616  ;;  %v4542_v38 = vsub.s32 %v1951_v32, %v5139_v11 }
 0x389   :  { %v2109_v3 = vrot.slane %v1617_v53, %v4520_v7  ;;  %1856 = vperm.xlu0 %2717, %v1360_v51   ;;  %v1965_v51 = vadd.s32 4294967200, %v4448_v6  ;;  %v4554_v32 = vsub.s32 %v1958_v31, %v5139_v11  ;;  %v5148_v31 = vld [vmem:[#allocation46_spill] sm:$0xff] }
 0x38a   :  { %v4532_v19 = vpop.permute.xlu1 %1712  ;;  %v2124_v41 = vrot.slane %v4331_v62, %v4542_v38 }
 0x38b   :  { %5144 = vst [vmem:[#allocation42_spill] sm:$0xff] %v4532_v19  ;;  %v2110_v26 = vsel %vm1935_vm6, %v2109_v3, %v2105_v8  ;;  %v1361_v3 = vadd.f32 %v3713_v56, %v4285_v39  ;;  %v1972_v8 = vadd.s32 4294967192, %v4448_v6 }
 0x38c   :  { %v2115_v53 = vsel %vm1942_vm7, %v2114_v52, %v2110_v26  ;;  %v1623_v12 = vpop.permute.xlu0 %1622  ;;  %v4559_v26 = vsub.s32 %v1965_v51, %v5139_v11 }
 0x38d   :  { %v2119_v19 = vrot.slane %v1623_v12, %v4537_v36  ;;  %1769 = vperm.xlu0 %2717, %v1331_v47   ;;  %v1979_v47 = vadd.s32 4294967184, %v4448_v6  ;;  %v4571_v51 = vsub.s32 %v1972_v8, %v5139_v11  ;;  %v5149_v8 = vld [vmem:[#allocation54_spill] sm:$0xff] }
 0x38e   :  { %v4549_v45 = vpop.permute.xlu1 %1802  ;;  %v2134_v56 = vrot.slane %v4339_v37, %v4559_v26 }
 0x38f   :  { %5146 = vst [vmem:[#allocation40_spill] sm:$0xff] %v4549_v45  ;;  %v2120_v52 = vsel %vm1949_vm8, %v2119_v19, %v2115_v53  ;;  %v1332_v19 = vadd.f32 %v3736_v21, %v5148_v31  ;;  %v1986_v53 = vadd.s32 4294967176, %v4448_v6  ;;  %v1362_v6 = vadd.f32 %v3726_v43, %v5149_v8 }
 0x390   :  { %v2125_v12 = vsel %vm1956_vm9, %v2124_v41, %v2120_v52  ;;  %v1629_v62 = vpop.permute.xlu0 %1628  ;;  %v4576_v52 = vsub.s32 %v1979_v47, %v5139_v11  ;;  %v2000_v43 = vrot.slane %v4411_v10, %v4465_v35  ;;  %v1996_v8 = vrot.slane %v4237_v34, %v4469_v18  ;;  %v5152_v10 = vld [vmem:[#allocation59_spill] sm:$0xff] }
 0x391   :  { %v2129_v45 = vrot.slane %v1629_v62, %v4554_v32  ;;  %1859 = vperm.xlu0 %2717, %v1361_v3   ;;  %v2010_v34 = vrot.slane %v4417_v58, %v4486_v57 }
 0x392   :  { %v4566_v39 = vpop.permute.xlu1 %1715  ;;  %v2144_v31 = vrot.slane %v4345_v63, %v4576_v52  ;;  %v5150_v63 = vld [vmem:[#allocation52_spill] sm:$0xff] }
 0x393   :  { %5147 = vst [vmem:[#allocation35_spill] sm:$0xff] %v4566_v39  ;;  %v2130_v41 = vsel %vm4951_vm10, %v2129_v45, %v2125_v12  ;;  %v4587_v45 = vsub.s32 %v1986_v53, %v5139_v11  ;;  %v5151_v53 = vld [vmem:[#allocation58_spill] sm:$0xff] }
 0x394   :  { %v2135_v3 = vsel %vm4950_vm11, %v2134_v56, %v2130_v41  ;;  %v1635_v62 = vpop.permute.xlu0 %1634 }
 0x395   :  { %v2139_v37 = vrot.slane %v1635_v62, %v4571_v51  ;;  %1772 = vperm.xlu0 %2717, %v1332_v19   ;;  %v1333_v62 = vadd.f32 %v3733_v54, %v5150_v63  ;;  %v2001_v63 = vsel %vm1893_vm0, %v2000_v43, %v1996_v8  ;;  %v2163_v43 = vrot.slane %v4375_v48, %v4473_v0 }
 0x396   :  { %v4582_v39 = vpop.permute.xlu1 %1805 }
 0x397   :  { %v2140_v47 = vsel %vm1977_vm12, %v2139_v37, %v2135_v3  ;;  %v1892_v3 = vrot.slane %v5151_v53, %v4465_v35 }
 0x398   :  { %v2145_v12 = vsel %vm1984_vm13, %v2144_v31, %v2140_v47  ;;  %v1641_v56 = vpop.permute.xlu0 %1640  ;;  %v1887_v31 = vrot.slane %v4329_v4, %v4469_v18  ;;  %v1363_v4 = vadd.f32 %v3724_v17, %v4299_v55  ;;  %v2154_v17 = vrot.slane %v4367_v33, %v4469_v18 }
 0x399   :  { %v2149_v19 = vrot.slane %v1641_v56, %v4587_v45  ;;  %1862 = vperm.xlu0 %2717, %v1362_v6   ;;  %v2233_v6 = vrot.slane %v4353_v2, %v4469_v18  ;;  %v2242_v56 = vrot.slane %v4361_v20, %v4473_v0 }
 0x39a   :  { %v4592_v41 = vpop.permute.xlu1 %1718  ;;  %v1894_v20 = vsel %vm1893_vm0, %v1892_v3, %v1887_v31  ;;  %v5153_v31 = vld [vmem:[#allocation47_spill] sm:$0xff] }
 0x39b   :  { %v4599_v11 = vsel %vm1991_vm14, %v2149_v19, %v2145_v12  ;;  %v1899_v12 = vrot.slane %v5152_v10, %v4473_v0  ;;  %v1906_v10 = vrot.slane %v4337_v15, %v4486_v57  ;;  %v1334_v15 = vadd.f32 %v3746_v24, %v5153_v31 }
 0x39c   :  { %v1695_v37 = vpop.permute.xlu0 %1694 }
 0x39d   :  { %v2237_v47 = vrot.slane %v1695_v37, %v4465_v35  ;;  %1775 = vperm.xlu0 %2717, %v1333_v62   ;;  %v2005_v62 = vrot.slane %v4243_v9, %v4473_v0  ;;  %v1901_v58 = vsel %vm1900_vm1, %v1899_v12, %v1894_v20  ;;  %v1913_v9 = vrot.slane %v4198_v50, %v4491_v49 }
 0x39e   :  { %v4614_v19 = vpop.permute.xlu1 %1808  ;;  %v2015_v50 = vrot.slane %v4249_v5, %v4491_v49 }
 0x39f   :  { %v2238_v2 = vsel %vm1893_vm0, %v2237_v47, %v2233_v6  ;;  %v2006_v8 = vsel %vm1900_vm1, %v2005_v62, %v2001_v63  ;;  %v2020_v6 = vrot.slane %v4423_v42, %v4503_v59  ;;  %v5154_v42 = vld [vmem:[#allocation60_spill] sm:$0xff] }
 0x3a0   :  { %v1647_v53 = vpop.permute.xlu0 %1646  ;;  %v4625_v37 = vsel %vm1900_vm1, %v2242_v56, %v2238_v2  ;;  %v2011_v33 = vsel %vm1907_vm2, %v2010_v34, %v2006_v8  ;;  %v1908_v56 = vsel %vm1907_vm2, %v1906_v10, %v1901_v58  ;;  %v1927_v34 = vrot.slane %v5154_v42, %v4508_v13 }
 0x3a1   :  { %v2158_v55 = vrot.slane %v1647_v53, %v4465_v35  ;;  %1865 = vperm.xlu0 %2717, %v1363_v4   ;;  %v1920_v4 = vrot.slane %v4351_v25, %v4503_v59  ;;  %v1915_v63 = vsel %vm1914_vm3, %v1913_v9, %v1908_v56  ;;  %v2173_v2 = vrot.slane %v4383_v14, %v4491_v49  ;;  %v5155_v53 = vld [vmem:[#allocation55_spill] sm:$0xff] }
 0x3a2   :  { %v4639_v3 = vpop.permute.xlu1 %1721  ;;  %v2016_v5 = vsel %vm1914_vm3, %v2015_v50, %v2011_v33  ;;  %v1364_v20 = vadd.f32 %v3736_v21, %v5155_v53  ;;  %v2030_v10 = vrot.slane %v4429_v60, %v4520_v7  ;;  %v5156_v60 = vld [vmem:[#allocation61_spill] sm:$0xff]  ;;  %v2040_v50 = vrot.slane %v4435_v23, %v4537_v36 }
 0x3a3   :  { %v2159_v47 = vsel %vm1893_vm0, %v2158_v55, %v2154_v17  ;;  %v2021_v25 = vsel %vm1921_vm4, %v2020_v6, %v2016_v5  ;;  %v2025_v55 = vrot.slane %v4257_v16, %v4508_v13  ;;  %v1922_v9 = vsel %vm1921_vm4, %v1920_v4, %v1915_v63  ;;  %v5157_v6 = vld [vmem:[#allocation53_spill] sm:$0xff] }
 0x3a4   :  { %v2164_v12 = vsel %vm1900_vm1, %v2163_v43, %v2159_v47  ;;  %v1653_v48 = vpop.permute.xlu0 %1652  ;;  %v1934_v43 = vrot.slane %v4359_v40, %v4520_v7  ;;  %v1929_v8 = vsel %vm1928_vm5, %v1927_v34, %v1922_v9  ;;  %v1941_v31 = vrot.slane %v5156_v60, %v4525_v30 }
 0x3a5   :  { %v2168_v24 = vrot.slane %v1653_v48, %v4486_v57  ;;  %1778 = vperm.xlu0 %2717, %v1334_v15   ;;  %v2183_v15 = vrot.slane %v4389_v44, %v4508_v13  ;;  %v2026_v16 = vsel %vm1928_vm5, %v2025_v55, %v2021_v25  ;;  %v1335_v47 = vadd.f32 %v3744_v61, %v5157_v6  ;;  %v5158_v48 = vld [vmem:[#allocation19_spill] sm:$0xff] }
 0x3a6   :  { %v4660_v62 = vpop.permute.xlu1 %1811  ;;  %v2031_v40 = vsel %vm1935_vm6, %v2030_v10, %v2026_v16  ;;  %v2035_v56 = vrot.slane %v5158_v48, %v4525_v30  ;;  %v1936_v63 = vsel %vm1935_vm6, %v1934_v43, %v1929_v8  ;;  %v1948_v23 = vrot.slane %v4373_v1, %v4537_v36 }
 0x3a7   :  { %v2169_v17 = vsel %vm1907_vm2, %v2168_v24, %v2164_v12  ;;  %v1365_v24 = vadd.f32 %v3733_v54, %v4307_v28  ;;  %v1943_v34 = vsel %vm1942_vm7, %v1941_v31, %v1936_v63  ;;  %v2050_v25 = vrot.slane %v4441_v29, %v4554_v32  ;;  %v5166_v63 = vld [vmem:[#allocation51_spill] sm:$0xff] }
 0x3a8   :  { %v2174_v58 = vsel %vm1914_vm3, %v2173_v2, %v2169_v17  ;;  %v1659_v14 = vpop.permute.xlu0 %1658  ;;  %v2193_v2 = vrot.slane %v4397_v46, %v4525_v30  ;;  %v2036_v5 = vsel %vm1942_vm7, %v2035_v56, %v2031_v40  ;;  %v5160_v17 = vld [vmem:[#allocation20_spill] sm:$0xff]  ;;  %v1950_v43 = vsel %vm1949_vm8, %v1948_v23, %v1943_v34  ;;  %v5168_v23 = vld [vmem:[#allocation23_spill] sm:$0xff] }
 0x3a9   :  { %v2178_v21 = vrot.slane %v1659_v14, %v4503_v59  ;;  %1868 = vperm.xlu0 %2717, %v1364_v20   ;;  %v5159_v20 = vld [vmem:[#allocation63_spill] sm:$0xff]  ;;  %v2041_v28 = vsel %vm1949_vm8, %v2040_v50, %v2036_v5  ;;  %v2045_v1 = vrot.slane %v5160_v17, %v4542_v38  ;;  %v2203_v29 = vrot.slane %v4405_v27, %v4542_v38  ;;  %v5170_v17 = vld [vmem:[#allocation65_spill] sm:$0xff] }
 0x3aa   :  { %v4681_v33 = vpop.permute.xlu1 %1724  ;;  %v1955_v54 = vrot.slane %v5159_v20, %v4542_v38  ;;  %v5169_v20 = vld [vmem:[#allocation31_spill] sm:$0xff] }
 0x3ab   :  { %v2179_v12 = vsel %vm1921_vm4, %v2178_v21, %v2174_v58  ;;  %v5161_v58 = vld [vmem:[#allocation62_spill] sm:$0xff]  ;;  %v1962_v21 = vrot.slane %v4381_v22, %v4554_v32  ;;  %v2046_v8 = vsel %vm1956_vm9, %v2045_v1, %v2041_v28  ;;  %v5164_v22 = vld [vmem:[#allocation21_spill] sm:$0xff]  ;;  %v1983_v1 = vrot.slane %v5170_v17, %v4576_v52 }
 0x3ac   :  { %v2184_v4 = vsel %vm1928_vm5, %v2183_v15, %v2179_v12  ;;  %v1665_v44 = vpop.permute.xlu0 %1664  ;;  %v1351_v14 = vadd.f32 %v3744_v61, %v5161_v58  ;;  %v1957_v31 = vsel %vm1956_vm9, %v1955_v54, %v1950_v43  ;;  %v2051_v15 = vsel %vm4951_vm10, %v2050_v25, %v2046_v8  ;;  %v5162_v61 = vld [vmem:[#allocation38_spill] sm:$0xff] }
 0x3ad   :  { %v2188_v42 = vrot.slane %v1665_v44, %v4520_v7  ;;  %1781 = vperm.xlu0 %2717, %v1335_v47   ;;  %v2060_v16 = vrot.slane %v5162_v61, %v4571_v51  ;;  %v5163_v47 = vld [vmem:[#allocation64_spill] sm:$0xff]  ;;  %v2055_v50 = vrot.slane %v5164_v22, %v4559_v26  ;;  %v1964_v56 = vsel %vm4951_vm10, %v1962_v21, %v1957_v31 }
 0x3ae   :  { %v4702_v53 = vpop.permute.xlu1 %1814  ;;  %v1969_v40 = vrot.slane %v5163_v47, %v4559_v26  ;;  %v2070_v54 = vrot.slane %v5169_v20, %v4587_v45  ;;  %v5177_v20 = vld [vmem:[#allocation29_spill] sm:$0xff] }
 0x3af   :  { %v2189_v10 = vsel %vm1935_vm6, %v2188_v42, %v2184_v4  ;;  %v5165_v4 = vld [vmem:[#allocation25_spill] sm:$0xff] }
 0x3b0   :  { %v2194_v55 = vsel %vm1942_vm7, %v2193_v2, %v2189_v10  ;;  %v1671_v46 = vpop.permute.xlu0 %1670  ;;  %v2213_v44 = vrot.slane %v5165_v4, %v4559_v26  ;;  %v5167_v42 = vld [vmem:[#allocation57_spill] sm:$0xff]  ;;  %v1976_v2 = vrot.slane %v5168_v23, %v4571_v51  ;;  %v1971_v10 = vsel %vm4950_vm11, %v1969_v40, %v1964_v56 }
 0x3b1   :  { %v2198_v9 = vrot.slane %v1671_v46, %v4537_v36  ;;  %1871 = vperm.xlu0 %2717, %v1365_v24   ;;  %v2056_v24 = vsel %vm4950_vm11, %v2055_v50, %v2051_v15  ;;  %v1352_v34 = vadd.f32 %v5167_v42, %v5166_v63  ;;  %v5174_v15 = vld [vmem:[#allocation56_spill] sm:$0xff] }
 0x3b2   :  { %v4722_v60 = vpop.permute.xlu1 %1727  ;;  %v2061_v5 = vsel %vm1977_vm12, %v2060_v16, %v2056_v24  ;;  %v1368_v61 = vadd.f32 %v5167_v42, %v5174_v15  ;;  %v1978_v16 = vsel %vm1977_vm12, %v1976_v2, %v1971_v10  ;;  %v5175_v42 = vld [vmem:[#allocation26_spill] sm:$0xff]  ;;  %v5176_v2 = vld [vmem:[#allocation27_spill] sm:$0xff]  ;;  %v5179_v15 = vld [vmem:[#allocation32_spill] sm:$0xff] }
 0x3b3   :  { %v2199_v6 = vsel %vm1949_vm8, %v2198_v9, %v2194_v55  ;;  %v5171_v55 = vld [vmem:[#allocation22_spill] sm:$0xff]  ;;  %v5172_v9 = vld [vmem:[#allocation24_spill] sm:$0xff]  ;;  %v1985_v40 = vsel %vm1984_vm13, %v1983_v1, %v1978_v16 }
 0x3b4   :  { %v2204_v27 = vsel %vm1956_vm9, %v2203_v29, %v2199_v6  ;;  %v1677_v12 = vpop.permute.xlu0 %1676  ;;  %v2065_v46 = vrot.slane %v5171_v55, %v4576_v52  ;;  %v1990_v43 = vrot.slane %v5172_v9, %v4587_v45  ;;  %v5173_v29 = vld [vmem:[#allocation36_spill] sm:$0xff]  ;;  %v5180_v16 = vld [vmem:[#allocation34_spill] sm:$0xff] }
 0x3b5   :  { %v2208_v48 = vrot.slane %v1677_v12, %v4554_v32  ;;  %1829 = vperm.xlu0 %2717, %v1351_v14   ;;  %v2223_v8 = vrot.slane %v5173_v29, %v4576_v52 }
 0x3b6   :  { %v4747_v25 = vpop.permute.xlu1 %1817  ;;  %v2066_v31 = vsel %vm1984_vm13, %v2065_v46, %v2061_v5  ;;  %v2321_v5 = vrot.slane %v5176_v2, %v4473_v0  ;;  %v2277_v2 = vrot.slane %v4592_v41, %v4537_v36 }
 0x3b7   :  { %v2209_v28 = vsel %vm4951_vm10, %v2208_v48, %v2204_v27  ;;  %v2071_v6 = vsel %vm1991_vm14, %v2070_v54, %v2066_v31  ;;  %v1992_v27 = vsel %vm1991_vm14, %v1990_v43, %v1985_v40  ;;  %vm2550_vm10 = vcmask 1043459   ;;  %v5181_v40 = vld [vmem:[#allocation42_spill] sm:$0xff] }
 0x3b8   :  { %v2214_v58 = vsel %vm4950_vm11, %v2213_v44, %v2209_v28  ;;  %v1683_v14 = vpop.permute.xlu0 %1682  ;;  %vm2548_vm11 = vcmask 1042434   ;;  %v2547_v56 = vsel %vm2546_vm15, %v2071_v6, %v1992_v27  ;;  %v2326_v54 = vrot.slane %v5177_v20, %v4486_v57  ;;  %v5185_v20 = vld [vmem:[#allocation39_spill] sm:$0xff] }
 0x3b9   :  { %v2218_v21 = vrot.slane %v1683_v14, %v4571_v51  ;;  %1832 = vperm.xlu0 %2717, %v1352_v34   ;;  %v2549_v4 = vsel %vm2548_vm11, %v4599_v11, %v2547_v56  ;;  %v2316_v34 = vrot.slane %v5175_v42, %v4465_v35  ;;  %v5178_v14 = vld [vmem:[#allocation28_spill] sm:$0xff]  ;;  %v2262_v6 = vrot.slane %v5180_v16, %v4508_v13 }
 0x3ba   :  { %v4769_v12 = vpop.permute.xlu1 %1730  ;;  %v2395_v9 = vrot.slane %v5178_v14, %v4465_v35  ;;  %vm5188_vm11 = vcmask 851712   ;;  %vm2552_vm15 = vcmask 1044484  }
 0x3bb   :  { %v2219_v47 = vsel %vm1977_vm12, %v2218_v21, %v2214_v58 }
 0x3bc   :  { %v2224_v22 = vsel %vm1984_vm13, %v2223_v8, %v2219_v47  ;;  %v1689_v50 = vpop.permute.xlu0 %1688 }
 0x3bd   :  { %v2228_v48 = vrot.slane %v1689_v50, %v4587_v45  ;;  %1880 = vperm.xlu0 %2717, %v1368_v61   ;;  %v2257_v61 = vrot.slane %v5179_v15, %v4503_v59 }
 0x3be   :  { %v4783_v28 = vpop.permute.xlu1 %1820 }
 0x3bf   :  { %v2229_v44 = vsel %vm1991_vm14, %v2228_v48, %v2224_v22  ;;  %v2267_v22 = vrot.slane %v5181_v40, %v4520_v7  ;;  %v5182_v48 = vld [vmem:[#allocation35_spill] sm:$0xff] }
 0x3c0   :  { %v4774_v24 = vsel %vm2550_vm10, %v2229_v44, %v2549_v4  ;;  %v1740_v63 = vpop.permute.xlu0 %1739  ;;  %v2272_v56 = vrot.slane %v5182_v48, %v4525_v30  ;;  %vm5187_vm10 = vcmask 786112  }
 0x3c1   :  { %v2312_v23 = vrot.slane %v1740_v63, %v4469_v18  ;;  %v5183_v63 = vld [vmem:[#allocation30_spill] sm:$0xff] }
 0x3c2   :  { %v1734_v43 = vpop.permute.xlu1 %1733  ;;  %v2470_v42 = vrot.slane %v5183_v63, %v4469_v18 }
 0x3c3   :  { %v2317_v11 = vsel %vm1893_vm0, %v2316_v34, %v2312_v23  ;;  %v5184_v34 = vld [vmem:[#allocation33_spill] sm:$0xff] }
 0x3c4   :  { %v2322_v10 = vsel %vm1900_vm1, %v2321_v5, %v2317_v11  ;;  %v1701_v17 = vpop.permute.xlu0 %1700  ;;  %v2405_v23 = vrot.slane %v5184_v34, %v4486_v57  ;;  %v2282_v11 = vrot.slane %v4639_v3, %v4542_v38 }
 0x3c5   :  { %v2247_v1 = vrot.slane %v1701_v17, %v4486_v57  ;;  %v2327_v55 = vsel %vm1907_vm2, %v2326_v54, %v2322_v10  ;;  %v2410_v54 = vrot.slane %v5185_v20, %v4491_v49 }
 0x3c6   :  { %v4800_v47 = vpop.permute.xlu1 %1823 }
 0x3c7   :  { %v2248_v46 = vsel %vm1907_vm2, %v2247_v1, %v4625_v37 }
 0x3c8   :  { %v1788_v58 = vpop.permute.xlu0 %1787 }
 0x3c9   :  { %v2391_v21 = vrot.slane %v1788_v58, %v4469_v18  ;;  %v5186_v18 = vld [vmem:[#allocation40_spill] sm:$0xff] }
 0x3ca   :  { %v2415_v1 = vrot.slane %v5186_v18, %v4503_v59 }
 0x3cb   :  { %v2396_v29 = vsel %vm1893_vm0, %v2395_v9, %v2391_v21  ;;  %v2292_v9 = vrot.slane %v4722_v60, %v4559_v26  ;;  %v1737_v21 = vpop.permute.xlu1 %1736 }
 0x3cc   :  { %v1704_v8 = vpop.permute.xlu0 %1703 }
 0x3cd   :  { %v2252_v31 = vrot.slane %v1704_v8, %v4491_v49 }
 0x3cf   :  { %v2253_v37 = vsel %vm1914_vm3, %v2252_v31, %v2248_v46  ;;  %v2287_v46 = vrot.slane %v4681_v33, %v4554_v32  ;;  %v2297_v31 = vrot.slane %v4769_v12, %v4571_v51 }
 0x3d0   :  { %v2258_v50 = vsel %vm1921_vm4, %v2257_v61, %v2253_v37  ;;  %v1794_v27 = vpop.permute.xlu0 %1793  ;;  %v2302_v61 = vrot.slane %v1734_v43, %v4576_v52 }
 0x3d1   :  { %v2263_v4 = vsel %vm1928_vm5, %v2262_v6, %v2258_v50  ;;  %v2400_v44 = vrot.slane %v1794_v27, %v4473_v0  ;;  %v2307_v6 = vrot.slane %v1737_v21, %v4587_v45  ;;  %v2420_v21 = vrot.slane %v4582_v39, %v4508_v13 }
 0x3d2   :  { %v2268_v5 = vsel %vm1935_vm6, %v2267_v22, %v2263_v4  ;;  %v2430_v39 = vrot.slane %v4660_v62, %v4525_v30 }
 0x3d3   :  { %v2273_v10 = vsel %vm1942_vm7, %v2272_v56, %v2268_v5  ;;  %v2401_v17 = vsel %vm1900_vm1, %v2400_v44, %v2396_v29 }
 0x3d4   :  { %v2278_v41 = vsel %vm1949_vm8, %v2277_v2, %v2273_v10  ;;  %v2406_v58 = vsel %vm1907_vm2, %v2405_v23, %v2401_v17  ;;  %v1839_v14 = vpop.permute.xlu0 %1838 }
 0x3d5   :  { %v2283_v3 = vsel %vm1956_vm9, %v2282_v11, %v2278_v41  ;;  %v2411_v8 = vsel %vm1914_vm3, %v2410_v54, %v2406_v58  ;;  %v2474_v29 = vrot.slane %v1839_v14, %v4465_v35 }
 0x3d6   :  { %v2288_v33 = vsel %vm5187_vm10, %v2287_v46, %v2283_v3  ;;  %v2416_v15 = vsel %vm1921_vm4, %v2415_v1, %v2411_v8 }
 0x3d7   :  { %v2475_v16 = vsel %vm1893_vm0, %v2474_v29, %v2470_v42  ;;  %v2293_v60 = vsel %vm5188_vm11, %v2292_v9, %v2288_v33  ;;  %v2421_v3 = vsel %vm1928_vm5, %v2420_v21, %v2416_v15  ;;  %v2425_v29 = vrot.slane %v4614_v19, %v4520_v7  ;;  %vm5189_vm0 = vmmov %vm5187_vm10 }
 0x3d8   :  { %v1752_v37 = vpop.permute.xlu0 %1751  ;;  %v2298_v40 = vsel %vm1977_vm12, %v2297_v31, %v2293_v60  ;;  %v1827_v31 = vpop.permute.xlu1 %1826 }
 0x3d9   :  { %v2331_v35 = vrot.slane %v1752_v37, %v4491_v49  ;;  %v2303_v12 = vsel %vm1984_vm13, %v2302_v61, %v2298_v40 }
 0x3da   :  { %v2308_v22 = vsel %vm1991_vm14, %v2307_v6, %v2303_v12 }
 0x3db   :  { %v2332_v50 = vsel %vm1914_vm3, %v2331_v35, %v2327_v55  ;;  %v4848_v43 = vsel %vm2552_vm15, %v2308_v22, %v4774_v24 }
 0x3dc   :  { %v1842_v27 = vpop.permute.xlu0 %1841 }
 0x3dd   :  { %v2479_v48 = vrot.slane %v1842_v27, %v4473_v0  ;;  %v1785_v27 = vpop.permute.xlu1 %1784 }
 0x3df   :  { %v2480_v56 = vsel %vm1900_vm1, %v2479_v48, %v2475_v16  ;;  %v2426_v16 = vsel %vm1935_vm6, %v2425_v29, %v2421_v3  ;;  %vm2554_vm1 = vcmask 1045509  }
 0x3e0   :  { %v1755_v4 = vpop.permute.xlu0 %1754  ;;  %v2431_v22 = vsel %vm1942_vm7, %v2430_v39, %v2426_v16 }
 0x3e1   :  { %v2336_v44 = vrot.slane %v1755_v4, %v4503_v59 }
 0x3e3   :  { %v2337_v63 = vsel %vm1921_vm4, %v2336_v44, %v2332_v50  ;;  %v2435_v50 = vrot.slane %v4702_v53, %v4537_v36  ;;  %v2386_v53 = vrot.slane %v1785_v27, %v4587_v45 }
 0x3e4   :  { %v1845_v42 = vpop.permute.xlu0 %1844 }
 0x3e5   :  { %v2484_v34 = vrot.slane %v1845_v42, %v4486_v57  ;;  %v2436_v42 = vsel %vm1949_vm8, %v2435_v50, %v2431_v22 }
 0x3e7   :  { %v2485_v23 = vsel %vm1907_vm2, %v2484_v34, %v2480_v56  ;;  %vm5190_vm2 = vmmov %vm5188_vm11  ;;  %v2440_v34 = vrot.slane %v4747_v25, %v4542_v38  ;;  %v2445_v25 = vrot.slane %v4783_v28, %v4554_v32  ;;  %v2450_v28 = vrot.slane %v4800_v47, %v4559_v26 }
 0x3e8   :  { %v1758_v2 = vpop.permute.xlu0 %1757 }
 0x3e9   :  { %v2341_v55 = vrot.slane %v1758_v2, %v4508_v13 }
 0x3eb   :  { %v2342_v24 = vsel %vm1928_vm5, %v2341_v55, %v2337_v63 }
 0x3ec   :  { %v1848_v5 = vpop.permute.xlu0 %1847 }
 0x3ed   :  { %v2489_v0 = vrot.slane %v1848_v5, %v4491_v49 }
 0x3ef   :  { %v2490_v20 = vsel %vm1914_vm3, %v2489_v0, %v2485_v23  ;;  %vm5191_vm3 = vmmov %vm5189_vm0 }
 0x3f0   :  { %v1761_v54 = vpop.permute.xlu0 %1760 }
 0x3f1   :  { %v2346_v49 = vrot.slane %v1761_v54, %v4520_v7  ;;  %v2441_v54 = vsel %vm1956_vm9, %v2440_v34, %v2436_v42 }
 0x3f3   :  { %v2347_v15 = vsel %vm1935_vm6, %v2346_v49, %v2342_v24 }
 0x3f4   :  { %v1851_v11 = vpop.permute.xlu0 %1850 }
 0x3f5   :  { %v2494_v4 = vrot.slane %v1851_v11, %v4503_v59 }
 0x3f7   :  { %v2495_v11 = vsel %vm1921_vm4, %v2494_v4, %v2490_v20  ;;  %vm5192_vm4 = vmmov %vm5190_vm2 }
 0x3f8   :  { %v1764_v10 = vpop.permute.xlu0 %1763 }
 0x3f9   :  { %v2351_v33 = vrot.slane %v1764_v10, %v4525_v30 }
 0x3fb   :  { %v2352_v40 = vsel %vm1942_vm7, %v2351_v33, %v2347_v15 }
 0x3fc   :  { %v1854_v17 = vpop.permute.xlu0 %1853 }
 0x3fd   :  { %v2499_v23 = vrot.slane %v1854_v17, %v4508_v13 }
 0x400   :  { %v1767_v18 = vpop.permute.xlu0 %1766 }
 0x401   :  { %v2356_v61 = vrot.slane %v1767_v18, %v4537_v36 }
 0x403   :  { %v2357_v35 = vsel %vm1949_vm8, %v2356_v61, %v2352_v40 }
 0x404   :  { %v1857_v1 = vpop.permute.xlu0 %1856 }
 0x405   :  { %v2504_v55 = vrot.slane %v1857_v1, %v4520_v7  ;;  %v2500_v7 = vsel %vm1928_vm5, %v2499_v23, %v2495_v11  ;;  %vm5193_vm5 = vmmov %vm5189_vm0 }
 0x407   :  { %v2505_v18 = vsel %vm1935_vm6, %v2504_v55, %v2500_v7  ;;  %vm5194_vm6 = vmmov %vm5190_vm2 }
 0x408   :  { %v1770_v46 = vpop.permute.xlu0 %1769 }
 0x409   :  { %v2361_v60 = vrot.slane %v1770_v46, %v4542_v38  ;;  %v2446_v46 = vsel %vm5191_vm3, %v2445_v25, %v2441_v54 }
 0x40b   :  { %v2362_v62 = vsel %vm1956_vm9, %v2361_v60, %v2357_v35 }
 0x40c   :  { %v1860_v57 = vpop.permute.xlu0 %1859 }
 0x40d   :  { %v2509_v59 = vrot.slane %v1860_v57, %v4525_v30  ;;  %v1875_v30 = vpop.permute.xlu1 %1874 }
 0x40e   :  { %v2534_v21 = vrot.slane %v1875_v30, %v4571_v51 }
 0x40f   :  { %v2510_v20 = vsel %vm1942_vm7, %v2509_v59, %v2505_v18  ;;  %vm2556_vm7 = vcmask 1046534  }
 0x410   :  { %v1773_v41 = vpop.permute.xlu0 %1772 }
 0x411   :  { %v2366_v6 = vrot.slane %v1773_v41, %v4554_v32  ;;  %v1878_v3 = vpop.permute.xlu1 %1877 }
 0x413   :  { %v2367_v48 = vsel %vm5189_vm0, %v2366_v6, %v2362_v62 }
 0x414   :  { %v1863_v58 = vpop.permute.xlu0 %1862 }
 0x415   :  { %v2514_v13 = vrot.slane %v1863_v58, %v4537_v36 }
 0x418   :  { %v1776_v14 = vpop.permute.xlu0 %1775 }
 0x419   :  { %v2371_v19 = vrot.slane %v1776_v14, %v4559_v26 }
 0x41b   :  { %v2372_v44 = vsel %vm5190_vm2, %v2371_v19, %v2367_v48 }
 0x41c   :  { %v1866_v9 = vpop.permute.xlu0 %1865 }
 0x41d   :  { %v2519_v17 = vrot.slane %v1866_v9, %v4542_v38  ;;  %v2451_v38 = vsel %vm5192_vm4, %v2450_v28, %v2446_v46 }
 0x420   :  { %v1779_v8 = vpop.permute.xlu0 %1778 }
 0x421   :  { %v2376_v12 = vrot.slane %v1779_v8, %v4571_v51 }
 0x423   :  { %v2377_v2 = vsel %vm1977_vm12, %v2376_v12, %v2372_v44 }
 0x424   :  { %v1869_v37 = vpop.permute.xlu0 %1868 }
 0x425   :  { %v2524_v1 = vrot.slane %v1869_v37, %v4554_v32  ;;  %v2455_v32 = vrot.slane %v1827_v31, %v4571_v51  ;;  %v2539_v31 = vrot.slane %v1878_v3, %v4576_v52 }
 0x428   :  { %v1782_v56 = vpop.permute.xlu0 %1781 }
 0x429   :  { %v2381_v63 = vrot.slane %v1782_v56, %v4576_v52 }
 0x42b   :  { %v2382_v24 = vsel %vm1984_vm13, %v2381_v63, %v2377_v2 }
 0x42c   :  { %v2387_v5 = vsel %vm1991_vm14, %v2386_v53, %v2382_v24  ;;  %v1872_v0 = vpop.permute.xlu0 %1871 }
 0x42d   :  { %v2555_v10 = vsel %vm2554_vm1, %v2387_v5, %v4848_v43  ;;  %v2529_v36 = vrot.slane %v1872_v0, %v4559_v26  ;;  %v2515_v43 = vsel %vm1949_vm8, %v2514_v13, %v2510_v20  ;;  %v2456_v26 = vsel %vm1977_vm12, %v2455_v32, %v2451_v38 }
 0x42e   :  { %v2520_v41 = vsel %vm1956_vm9, %v2519_v17, %v2515_v43  ;;  %vm2558_vm8 = vcmask 1047559  }
 0x42f   :  { %v2525_v14 = vsel %vm5193_vm5, %v2524_v1, %v2520_v41 }
 0x430   :  { %v1830_v57 = vpop.permute.xlu0 %1829  ;;  %v2530_v9 = vsel %vm5194_vm6, %v2529_v36, %v2525_v14 }
 0x431   :  { %v2460_v58 = vrot.slane %v1830_v57, %v4576_v52  ;;  %v2535_v29 = vsel %vm1977_vm12, %v2534_v21, %v2530_v9 }
 0x432   :  { %v2540_v51 = vsel %vm1984_vm13, %v2539_v31, %v2535_v29 }
 0x433   :  { %v2461_v8 = vsel %vm1984_vm13, %v2460_v58, %v2456_v26 }
 0x434   :  { %v1833_v47 = vpop.permute.xlu0 %1832 }
 0x435   :  { %v2465_v49 = vrot.slane %v1833_v47, %v4587_v45 }
 0x437   :  { %v2466_v33 = vsel %vm1991_vm14, %v2465_v49, %v2461_v8 }
 0x438   :  { %v2557_v61 = vsel %vm2556_vm7, %v2466_v33, %v2555_v10  ;;  %v1881_v16 = vpop.permute.xlu0 %1880 }
 0x439   :  { %v2544_v60 = vrot.slane %v1881_v16, %v4587_v45 }
 0x43b   :  { %v2545_v39 = vsel %vm1991_vm14, %v2544_v60, %v2540_v51 }
 0x43c   :  { %v2559_v15 = vsel %vm2558_vm8, %v2545_v39, %v2557_v61 }
 0x43d   :  { %2570 = vmax.xlane.f32.xlu1 %v2559_v15 }
 0x4c6   :  { %v2571_v6 = vpop.xlane.xlu1 %2570 }
 0x4c7   :  { %v2572_v37 = vsub.f32 %v2559_v15, %v2571_v6 }
 0x4c9   :  { %v2573_v40 = vmul.f32 1.442695, %v2572_v37 }
 0x4cb   :  { %2975 = vpow2.f32 %v2573_v40 }
 0x4d8   :  { %v2976_v19 = vpop.eup %2975 }
 0x4d9   :  { %2575 = vadd.xlane.f32.xlu0 %v2976_v19 }
 0x4da   :  { %3072 = shalt.err (!%p3069_p10)
}
 0x4db   :  { %2591 = dma.vmem_to_hbm [thread:$0]  %s2589_s17, 128, %s4943_s8, [#allocation4]  }
 0x4dc   :  { %s3122_s21 = smov [#allocation11]  }
 0x4dd   :  { %s2598_s22 = sshll.u32 %s3122_s21, 4  ;;  %s2599_s22 = int_to_ptr.vmem [resolvable:$true] %s2598_s22 }
 0x4de   :  { %s3081_s23 = scalar_lea.vmem %s2599_s22, 128  ;;  %p3086_p12 = scmp.lt.s32.totalorder %s2599_s22, %s2599_s22 }
 0x4df   :  { %p3082_p11 = scmp.ne.s32.totalorder %s2599_s22, %s3081_s23  ;;  %p3087_p13 = scmp.lt.s32.totalorder %s3081_s23, %s3081_s23 }
 0x4e1   :  { %p3088_p0 = por %p3087_p13, %p3086_p12 }
 0x4e3   :  { %p3089_p1 = pnand %p3088_p0, %p3082_p11 }
 0x562   :  { %v2576_v52 = vpop.xlane.xlu0 %2575 }
 0x563   :  { %2977 = vrcp.f32 %v2576_v52 }
 0x570   :  { %v2978_v45 = vpop.eup %2977 }
 0x571   :  { %v2578_v35 = vmul.f32 %v2978_v45, %v2976_v19 }
 0x573   :  { %2579 = vst [vmem:[#allocation11] sm:$0xff] %v2578_v35 }
 0x574   :  { %3092 = shalt.err (!%p3089_p1)
}
 0x575   :  { %2601 = dma.vmem_to_hbm [thread:$0]  %s2599_s22, 128, %s4944_s9, [#allocation12]  }
 0x576   :  { %3107 = dma.done.wait [#allocation4], 128  }
 0x577   :  { %3108 = vsyncadd [#allocation4], 4294967168 }
 0x578   :  { %3109 = dma.done.wait [#allocation12], 128  }
 0x579   :  { %3110 = vsyncadd [#allocation12], 4294967168 }
 0x57a   :  { %2608 = vsyncpa [#allocation3], 1 }
 0x57b   :  { %2609 = vsyncpa [#allocation6], 1 }
 0x57c   :  { %2610 = vsyncpa [#allocation9], 1 }
 0x57d   :  { %2611 = vsyncpa [#allocation4], 1 }
 0x57e   :  { %2612 = vsyncpa [#allocation12], 1 }

</bundles_post_ra>
